<compile_context>
chip_gen: v7x
topology: tpu7x:2x2x1
jax: 0.10.0
libtpu: 0.0.40
codegen_flags: <defaults>
</compile_context>

<pallas_src>
import functools

import numpy as np
import jax
import jax.numpy as jnp
from jax import lax
from jax.experimental import pallas as pl
from jax.experimental.pallas import tpu as pltpu

LANES = 128
CW = 2 * LANES            # lane width of conv-stage activations (256)
KSZ = 5                   # conv kernel size
IMG = 32                  # input image H/W (implied by fc1 = 16*5*5)
C1_OUT = 6
C2_IN, C2_OUT = 6, 16
C1_SP = 28                # conv1 spatial output (32 - 5 + 1)
C2_SP = 10                # conv2 spatial output (14 - 5 + 1)
P2_SP = 5                 # pool2 spatial output
FC1_IN, FC1_OUT = 400, 120
FC2_OUT = 84


# ----------------------------------------------------------------------------
# Fused Pallas kernel: whole LeNet forward for ONE image (grid over batch).
# ----------------------------------------------------------------------------
def _shift(v, k, axis):
    """result[..., i, ...] = v[..., i + k, ...]. Tail wraps around; wrapped
    entries are never consumed downstream (checked by construction)."""
    n = v.shape[axis]
    return jnp.concatenate(
        [lax.slice_in_dim(v, k, n, axis=axis),
         lax.slice_in_dim(v, 0, k, axis=axis)], axis=axis)


def _lenet_kernel(x_ref, w1_ref, b1_ref, w2_ref, b2_ref,
                  fw1_ref, fb1_ref, fw2_ref, fb2_ref, fw3_ref, fb3_ref, o_ref):
    x = x_ref[0]                                    # (32, 128): H sublanes, W (pad->128) lanes

    # ---- conv1 (1->6, k=5) + ReLU on the MXU --------------------------------
    # Band matmul: K = (ky, w_in), output columns = 6*w_out + c.
    lhs1 = jnp.concatenate([x[ky:ky + C1_SP, :] for ky in range(KSZ)], axis=-1)   # (28, 640)
    h1 = jnp.dot(lhs1, w1_ref[...], preferred_element_type=jnp.float32)           # (28, 256)
    h1 = jnp.maximum(h1 + b1_ref[...], 0.0)

    # ---- maxpool1 2x2/2 (stride-2 decimation deferred into conv2 weights) ---
    hw = jnp.maximum(h1, _shift(h1, C1_OUT, axis=1))      # max over (w, w+1): cols 6 apart
    p1 = jnp.maximum(hw, _shift(hw, 1, axis=0))           # max over (h, h+1)
    # pooled P1[ho, wo, c] lives at p1[2*ho, 12*wo + c]

    # ---- conv2 (6->16, k=5) + ReLU on the MXU --------------------------------
    lhs2 = jnp.concatenate(
        [p1[2 * ky:2 * ky + 2 * C2_SP, :] for ky in range(KSZ)], axis=-1)          # (20, 1280)
    h2 = jnp.dot(lhs2, w2_ref[...], preferred_element_type=jnp.float32)            # (20, 256)
    h2 = jnp.maximum(h2 + b2_ref[...], 0.0)
    # real conv2 output (h, w, c2) lives at h2[2*h, 16*w + c2]

    # ---- maxpool2 2x2/2 (decimation deferred into fc1 weights) ---------------
    hw2 = jnp.maximum(h2, _shift(h2, C2_OUT, axis=1))     # max over (w, w+1): cols 16 apart
    p2 = jnp.maximum(hw2, _shift(hw2, 2, axis=0))         # max over (h, h+1): rows 2 apart
    # pooled P2[ho, wo, c2] lives at p2[4*ho, 32*wo + c2]

    # ---- fc1 (400->120) + ReLU: one fused K=1280 dot -------------------------
    lhs3 = jnp.concatenate([p2[4 * h:4 * h + 1, :] for h in range(P2_SP)], axis=-1)  # (1, 1280)
    y1 = jnp.dot(lhs3, fw1_ref[...], preferred_element_type=jnp.float32) + fb1_ref[...]
    y1 = jnp.maximum(y1, 0.0)                                                      # (1, 128)

    # ---- fc2 (120->84) + ReLU -------------------------------------------------
    y2 = jnp.dot(y1, fw2_ref[...], preferred_element_type=jnp.float32) + fb2_ref[...]
    y2 = jnp.maximum(y2, 0.0)

    # ---- fc3 (84->num_classes), lane-padded output ----------------------------
    y3 = jnp.dot(y2, fw3_ref[...], preferred_element_type=jnp.float32) + fb3_ref[...]
    o_ref[0] = y3


# ----------------------------------------------------------------------------
# One-time weight preparation (host side): fold taps / pooling decimation /
# flatten permutation into matmul-ready, lane-padded matrices.
# ----------------------------------------------------------------------------
def prepare_params(params, num_classes=10):
    (w1, b1, w2, b2, fw1, fb1, fw2, fb2, fw3, fb3) = [
        np.asarray(p, np.float32) for p in params]

    # conv1 band: rows = ky*128 + w_in, cols = 6*w_out + c
    w1b = np.zeros((KSZ * LANES, CW), np.float32)
    for ky in range(KSZ):
        for w in range(C1_SP):
            for c in range(C1_OUT):
                r0 = ky * LANES + w
                w1b[r0:r0 + KSZ, C1_OUT * w + c] = w1[c, 0, ky, :]
    b1r = np.zeros((1, CW), np.float32)
    for w in range(C1_SP):
        b1r[0, C1_OUT * w:C1_OUT * w + C1_OUT] = b1

    # conv2 band (reads the un-decimated pool1 layout): rows = 256*ky + 12*wi + ci
    w2b = np.zeros((KSZ * CW, CW), np.float32)
    for ky in range(KSZ):
        for kx in range(KSZ):
            for wo in range(C2_SP):
                wi = wo + kx
                r0 = CW * ky + 2 * C1_OUT * wi
                c0 = C2_OUT * wo
                w2b[r0:r0 + C2_IN, c0:c0 + C2_OUT] = w2[:, :, ky, kx].T   # (ci, c2)
    b2r = np.zeros((1, CW), np.float32)
    for wo in range(C2_SP):
        b2r[0, C2_OUT * wo:C2_OUT * wo + C2_OUT] = b2

    # fc1 (reads the un-decimated pool2 layout): rows = 256*ho + 32*wo + c2,
    # columns follow the PyTorch NCHW flatten c2*25 + ho*5 + wo.
    fw1r = fw1.reshape(FC1_OUT, C2_OUT, P2_SP, P2_SP)
    wfc1 = np.zeros((P2_SP * CW, LANES), np.float32)
    for ho in range(P2_SP):
        for wo in range(P2_SP):
            r0 = CW * ho + 2 * C2_OUT * wo
            wfc1[r0:r0 + C2_OUT, :FC1_OUT] = fw1r[:, :, ho, wo].T          # (c2, n)
    fb1r = np.zeros((1, LANES), np.float32)
    fb1r[0, :FC1_OUT] = fb1

    wfc2 = np.zeros((LANES, LANES), np.float32)
    wfc2[:FC1_OUT, :FC2_OUT] = fw2.T
    fb2r = np.zeros((1, LANES), np.float32)
    fb2r[0, :FC2_OUT] = fb2

    wfc3 = np.zeros((LANES, LANES), np.float32)
    wfc3[:FC2_OUT, :num_classes] = fw3.T
    fb3r = np.zeros((1, LANES), np.float32)
    fb3r[0, :num_classes] = fb3

    return tuple(jnp.asarray(a) for a in
                 (w1b, b1r, w2b, b2r, wfc1, fb1r, wfc2, fb2r, wfc3, fb3r))


# ----------------------------------------------------------------------------
# Wrapper: single fused pallas_call, batch as a "parallel" grid dimension.
# ----------------------------------------------------------------------------
def lenet_pallas(x_nchw, prep, num_classes=10):
    B = x_nchw.shape[0]
    x = x_nchw.reshape(B, IMG, IMG).astype(jnp.float32)
    x = jnp.pad(x, ((0, 0), (0, 0), (0, LANES - IMG)))        # W -> 128 lanes

    flops = 2 * B * (C1_SP * (KSZ * LANES) * CW               # conv1
                     + (2 * C2_SP) * (KSZ * CW) * CW          # conv2
                     + (P2_SP * CW) * LANES                   # fc1
                     + LANES * LANES + LANES * LANES)         # fc2, fc3
    bytes_accessed = 4 * (x.size + sum(int(a.size) for a in prep) + B * LANES)

    out = pl.pallas_call(
        _lenet_kernel,
        out_shape=jax.ShapeDtypeStruct((B, 1, LANES), jnp.float32),
        grid=(B,),
        in_specs=[pl.BlockSpec((1, IMG, LANES), lambda b: (b, 0, 0))] +
                 [pl.BlockSpec(a.shape, lambda b: (0, 0)) for a in prep],
        out_specs=pl.BlockSpec((1, 1, LANES), lambda b: (b, 0, 0)),
        compiler_params=pltpu.CompilerParams(dimension_semantics=("parallel",)),
        cost_estimate=pl.CostEstimate(flops=flops, transcendentals=0,
                                      bytes_accessed=bytes_accessed),
    )(x, *prep)
    return out.reshape(B, LANES)[:, :num_classes]


# ----------------------------------------------------------------------------
# Pure-JAX reference and deterministic init (PyTorch layouts).
# ----------------------------------------------------------------------------
def lenet_ref(x, params):
    (w1, b1, w2, b2, fw1, fb1, fw2, fb2, fw3, fb3) = params
    dn = ('NCHW', 'OIHW', 'NCHW')
    hp = lax.Precision.HIGHEST
    y = lax.conv_general_dilated(x, w1, (1, 1), 'VALID', dimension_numbers=dn,
                                 precision=hp)
    y = jnp.maximum(y + b1[None, :, None, None], 0.0)
    y = lax.reduce_window(y, -jnp.inf, lax.max, (1, 1, 2, 2), (1, 1, 2, 2), 'VALID')
    y = lax.conv_general_dilated(y, w2, (1, 1), 'VALID', dimension_numbers=dn,
                                 precision=hp)
    y = jnp.maximum(y + b2[None, :, None, None], 0.0)
    y = lax.reduce_window(y, -jnp.inf, lax.max, (1, 1, 2, 2), (1, 1, 2, 2), 'VALID')
    y = y.reshape(y.shape[0], -1)
    y = jnp.maximum(jnp.dot(y, fw1.T, precision=hp) + fb1, 0.0)
    y = jnp.maximum(jnp.dot(y, fw2.T, precision=hp) + fb2, 0.0)
    return jnp.dot(y, fw3.T, precision=hp) + fb3


def init_params(key, num_classes=10):
    def uniform(k, shape, fan_in):
        bound = 1.0 / jnp.sqrt(jnp.float32(fan_in))
        return jax.random.uniform(k, shape, jnp.float32, -bound, bound)

    ks = jax.random.split(key, 10)
    w1 = uniform(ks[0], (6, 1, 5, 5), 1 * 5 * 5)
    b1 = uniform(ks[1], (6,), 1 * 5 * 5)
    w2 = uniform(ks[2], (16, 6, 5, 5), 6 * 5 * 5)
    b2 = uniform(ks[3], (16,), 6 * 5 * 5)
    fw1 = uniform(ks[4], (120, 400), 400)
    fb1 = uniform(ks[5], (120,), 400)
    fw2 = uniform(ks[6], (84, 120), 120)
    fb2 = uniform(ks[7], (84,), 120)
    fw3 = uniform(ks[8], (num_classes, 84), 84)
    fb3 = uniform(ks[9], (num_classes,), 84)          # fixed: was (84,)
    return (w1, b1, w2, b2, fw1, fb1, fw2, fb2, fw3, fb3)


if __name__ == "__main__":
    key = jax.random.PRNGKey(0)
    k_x, k_p = jax.random.split(key)
    # LeNet's fc1 (16*5*5) implies a 32x32 single-channel input; batch=2.
    x = jax.random.normal(k_x, (2, 1, 32, 32), dtype=jnp.float32)
    params = init_params(k_p, num_classes=10)
    prep = prepare_params(params, num_classes=10)      # hoisted, done once

    fwd = jax.jit(functools.partial(lenet_pallas, num_classes=10))
    out = jax.block_until_ready(fwd(x, prep))

    ref = lenet_ref(x, params)
    assert out.shape == (2, 10) and out.dtype == jnp.float32
    assert bool(jnp.allclose(out, ref, atol=2e-2, rtol=2e-2)), "mismatch vs reference"

    print("KERNEL_OK")
</pallas_src>

<mosaic_0001>
module attributes {stable_mosaic.version = 11 : i64} {
  func.func @_lenet_kernel(%arg0: i32, %arg1: memref<1x32x128xf32, #tpu.memory_space<vmem>>, %arg2: memref<640x256xf32, #tpu.memory_space<vmem>>, %arg3: memref<1x256xf32, #tpu.memory_space<vmem>>, %arg4: memref<1280x256xf32, #tpu.memory_space<vmem>>, %arg5: memref<1x256xf32, #tpu.memory_space<vmem>>, %arg6: memref<1280x128xf32, #tpu.memory_space<vmem>>, %arg7: memref<1x128xf32, #tpu.memory_space<vmem>>, %arg8: memref<128x128xf32, #tpu.memory_space<vmem>>, %arg9: memref<1x128xf32, #tpu.memory_space<vmem>>, %arg10: memref<128x128xf32, #tpu.memory_space<vmem>>, %arg11: memref<1x128xf32, #tpu.memory_space<vmem>>, %arg12: memref<1x1x128xf32, #tpu.memory_space<vmem>>) attributes {dimension_semantics = [#tpu.dimension_semantics<parallel>], iteration_bounds = array<i64: 2>, scalar_prefetch = 0 : i64, scratch_operands = 0 : i64, tpu.core_type = #tpu.core_type<tc>, window_params = [{transform_indices = @transform_0, window_bounds = array<i64: 1, 32, 128>}, {pipeline_mode = #tpu.pipeline_mode<synchronous>, transform_indices = @transform_1, window_bounds = array<i64: 640, 256>}, {pipeline_mode = #tpu.pipeline_mode<synchronous>, transform_indices = @transform_2, window_bounds = array<i64: 1, 256>}, {pipeline_mode = #tpu.pipeline_mode<synchronous>, transform_indices = @transform_3, window_bounds = array<i64: 1280, 256>}, {pipeline_mode = #tpu.pipeline_mode<synchronous>, transform_indices = @transform_4, window_bounds = array<i64: 1, 256>}, {pipeline_mode = #tpu.pipeline_mode<synchronous>, transform_indices = @transform_5, window_bounds = array<i64: 1280, 128>}, {pipeline_mode = #tpu.pipeline_mode<synchronous>, transform_indices = @transform_6, window_bounds = array<i64: 1, 128>}, {pipeline_mode = #tpu.pipeline_mode<synchronous>, transform_indices = @transform_7, window_bounds = array<i64: 128, 128>}, {pipeline_mode = #tpu.pipeline_mode<synchronous>, transform_indices = @transform_8, window_bounds = array<i64: 1, 128>}, {pipeline_mode = #tpu.pipeline_mode<synchronous>, transform_indices = @transform_9, window_bounds = array<i64: 128, 128>}, {pipeline_mode = #tpu.pipeline_mode<synchronous>, transform_indices = @transform_10, window_bounds = array<i64: 1, 128>}, {transform_indices = @transform_11, window_bounds = array<i64: 1, 1, 128>}]} {
    %c0 = arith.constant 0 : index
    %c0_0 = arith.constant 0 : index
    %c0_1 = arith.constant 0 : index
    %0 = vector.load %arg1[%c0, %c0_0, %c0_1] : memref<1x32x128xf32, #tpu.memory_space<vmem>>, vector<1x32x128xf32>
    %1 = vector.shape_cast %0 : vector<1x32x128xf32> to vector<32x128xf32>
    %2 = vector.extract_strided_slice %1 {offsets = [0, 0], sizes = [28, 128], strides = [1, 1]} : vector<32x128xf32> to vector<28x128xf32>
    %3 = vector.extract_strided_slice %1 {offsets = [1, 0], sizes = [28, 128], strides = [1, 1]} : vector<32x128xf32> to vector<28x128xf32>
    %4 = vector.extract_strided_slice %1 {offsets = [2, 0], sizes = [28, 128], strides = [1, 1]} : vector<32x128xf32> to vector<28x128xf32>
    %5 = vector.extract_strided_slice %1 {offsets = [3, 0], sizes = [28, 128], strides = [1, 1]} : vector<32x128xf32> to vector<28x128xf32>
    %6 = vector.extract_strided_slice %1 {offsets = [4, 0], sizes = [28, 128], strides = [1, 1]} : vector<32x128xf32> to vector<28x128xf32>
    %7 = tpu.concatenate %2, %3, %4, %5, %6 in 1 : vector<28x128xf32>, vector<28x128xf32>, vector<28x128xf32>, vector<28x128xf32>, vector<28x128xf32> -> vector<28x640xf32>
    %c0_2 = arith.constant 0 : index
    %c0_3 = arith.constant 0 : index
    %8 = vector.load %arg2[%c0_2, %c0_3] : memref<640x256xf32, #tpu.memory_space<vmem>>, vector<640x256xf32>
    %cst = arith.constant dense<0.000000e+00> : vector<28x256xf32>
    %9 = tpu.matmul %7, %8, %cst {dimension_numbers = #tpu.dot_dimension_numbers<[1], [0], [0], [1], [0, 0, 1, 1], [], []>} : vector<28x640xf32>, vector<640x256xf32>, vector<28x256xf32> -> vector<28x256xf32>
    %c0_4 = arith.constant 0 : index
    %c0_5 = arith.constant 0 : index
    %10 = vector.load %arg3[%c0_4, %c0_5] : memref<1x256xf32, #tpu.memory_space<vmem>>, vector<1x256xf32>
    %11 = vector.broadcast %10 : vector<1x256xf32> to vector<28x256xf32>
    %12 = arith.addf %9, %11 : vector<28x256xf32>
    %cst_6 = arith.constant 0.000000e+00 : f32
    %13 = vector.broadcast %cst_6 : f32 to vector<28x256xf32>
    %14 = arith.maximumf %12, %13 : vector<28x256xf32>
    %15 = vector.extract_strided_slice %14 {offsets = [0, 6], sizes = [28, 250], strides = [1, 1]} : vector<28x256xf32> to vector<28x250xf32>
    %16 = vector.extract_strided_slice %14 {offsets = [0, 0], sizes = [28, 6], strides = [1, 1]} : vector<28x256xf32> to vector<28x6xf32>
    %17 = tpu.concatenate %15, %16 in 1 : vector<28x250xf32>, vector<28x6xf32> -> vector<28x256xf32>
    %18 = arith.maximumf %14, %17 : vector<28x256xf32>
    %19 = vector.extract_strided_slice %18 {offsets = [1, 0], sizes = [27, 256], strides = [1, 1]} : vector<28x256xf32> to vector<27x256xf32>
    %20 = vector.extract_strided_slice %18 {offsets = [0, 0], sizes = [1, 256], strides = [1, 1]} : vector<28x256xf32> to vector<1x256xf32>
    %21 = tpu.concatenate %19, %20 in 0 : vector<27x256xf32>, vector<1x256xf32> -> vector<28x256xf32>
    %22 = arith.maximumf %18, %21 : vector<28x256xf32>
    %23 = vector.extract_strided_slice %22 {offsets = [0, 0], sizes = [20, 256], strides = [1, 1]} : vector<28x256xf32> to vector<20x256xf32>
    %24 = vector.extract_strided_slice %22 {offsets = [2, 0], sizes = [20, 256], strides = [1, 1]} : vector<28x256xf32> to vector<20x256xf32>
    %25 = vector.extract_strided_slice %22 {offsets = [4, 0], sizes = [20, 256], strides = [1, 1]} : vector<28x256xf32> to vector<20x256xf32>
    %26 = vector.extract_strided_slice %22 {offsets = [6, 0], sizes = [20, 256], strides = [1, 1]} : vector<28x256xf32> to vector<20x256xf32>
    %27 = vector.extract_strided_slice %22 {offsets = [8, 0], sizes = [20, 256], strides = [1, 1]} : vector<28x256xf32> to vector<20x256xf32>
    %28 = tpu.concatenate %23, %24, %25, %26, %27 in 1 : vector<20x256xf32>, vector<20x256xf32>, vector<20x256xf32>, vector<20x256xf32>, vector<20x256xf32> -> vector<20x1280xf32>
    %c0_7 = arith.constant 0 : index
    %c0_8 = arith.constant 0 : index
    %29 = vector.load %arg4[%c0_7, %c0_8] : memref<1280x256xf32, #tpu.memory_space<vmem>>, vector<1280x256xf32>
    %cst_9 = arith.constant dense<0.000000e+00> : vector<20x256xf32>
    %30 = tpu.matmul %28, %29, %cst_9 {dimension_numbers = #tpu.dot_dimension_numbers<[1], [0], [0], [1], [0, 0, 1, 1], [], []>} : vector<20x1280xf32>, vector<1280x256xf32>, vector<20x256xf32> -> vector<20x256xf32>
    %c0_10 = arith.constant 0 : index
    %c0_11 = arith.constant 0 : index
    %31 = vector.load %arg5[%c0_10, %c0_11] : memref<1x256xf32, #tpu.memory_space<vmem>>, vector<1x256xf32>
    %32 = vector.broadcast %31 : vector<1x256xf32> to vector<20x256xf32>
    %33 = arith.addf %30, %32 : vector<20x256xf32>
    %cst_12 = arith.constant 0.000000e+00 : f32
    %34 = vector.broadcast %cst_12 : f32 to vector<20x256xf32>
    %35 = arith.maximumf %33, %34 : vector<20x256xf32>
    %36 = vector.extract_strided_slice %35 {offsets = [0, 16], sizes = [20, 240], strides = [1, 1]} : vector<20x256xf32> to vector<20x240xf32>
    %37 = vector.extract_strided_slice %35 {offsets = [0, 0], sizes = [20, 16], strides = [1, 1]} : vector<20x256xf32> to vector<20x16xf32>
    %38 = tpu.concatenate %36, %37 in 1 : vector<20x240xf32>, vector<20x16xf32> -> vector<20x256xf32>
    %39 = arith.maximumf %35, %38 : vector<20x256xf32>
    %40 = vector.extract_strided_slice %39 {offsets = [2, 0], sizes = [18, 256], strides = [1, 1]} : vector<20x256xf32> to vector<18x256xf32>
    %41 = vector.extract_strided_slice %39 {offsets = [0, 0], sizes = [2, 256], strides = [1, 1]} : vector<20x256xf32> to vector<2x256xf32>
    %42 = tpu.concatenate %40, %41 in 0 : vector<18x256xf32>, vector<2x256xf32> -> vector<20x256xf32>
    %43 = arith.maximumf %39, %42 : vector<20x256xf32>
    %44 = vector.extract_strided_slice %43 {offsets = [0, 0], sizes = [1, 256], strides = [1, 1]} : vector<20x256xf32> to vector<1x256xf32>
    %45 = vector.extract_strided_slice %43 {offsets = [4, 0], sizes = [1, 256], strides = [1, 1]} : vector<20x256xf32> to vector<1x256xf32>
    %46 = vector.extract_strided_slice %43 {offsets = [8, 0], sizes = [1, 256], strides = [1, 1]} : vector<20x256xf32> to vector<1x256xf32>
    %47 = vector.extract_strided_slice %43 {offsets = [12, 0], sizes = [1, 256], strides = [1, 1]} : vector<20x256xf32> to vector<1x256xf32>
    %48 = vector.extract_strided_slice %43 {offsets = [16, 0], sizes = [1, 256], strides = [1, 1]} : vector<20x256xf32> to vector<1x256xf32>
    %49 = tpu.concatenate %44, %45, %46, %47, %48 in 1 : vector<1x256xf32>, vector<1x256xf32>, vector<1x256xf32>, vector<1x256xf32>, vector<1x256xf32> -> vector<1x1280xf32>
    %c0_13 = arith.constant 0 : index
    %c0_14 = arith.constant 0 : index
    %50 = vector.load %arg6[%c0_13, %c0_14] : memref<1280x128xf32, #tpu.memory_space<vmem>>, vector<1280x128xf32>
    %cst_15 = arith.constant dense<0.000000e+00> : vector<1x128xf32>
    %51 = tpu.matmul %49, %50, %cst_15 {dimension_numbers = #tpu.dot_dimension_numbers<[1], [0], [0], [1], [0, 0, 1, 1], [], []>} : vector<1x1280xf32>, vector<1280x128xf32>, vector<1x128xf32> -> vector<1x128xf32>
    %c0_16 = arith.constant 0 : index
    %c0_17 = arith.constant 0 : index
    %52 = vector.load %arg7[%c0_16, %c0_17] : memref<1x128xf32, #tpu.memory_space<vmem>>, vector<1x128xf32>
    %53 = arith.addf %51, %52 : vector<1x128xf32>
    %cst_18 = arith.constant 0.000000e+00 : f32
    %54 = vector.broadcast %cst_18 : f32 to vector<1x128xf32>
    %55 = arith.maximumf %53, %54 : vector<1x128xf32>
    %c0_19 = arith.constant 0 : index
    %c0_20 = arith.constant 0 : index
    %56 = vector.load %arg8[%c0_19, %c0_20] : memref<128x128xf32, #tpu.memory_space<vmem>>, vector<128x128xf32>
    %cst_21 = arith.constant dense<0.000000e+00> : vector<1x128xf32>
    %57 = tpu.matmul %55, %56, %cst_21 {dimension_numbers = #tpu.dot_dimension_numbers<[1], [0], [0], [1], [0, 0, 1, 1], [], []>} : vector<1x128xf32>, vector<128x128xf32>, vector<1x128xf32> -> vector<1x128xf32>
    %c0_22 = arith.constant 0 : index
    %c0_23 = arith.constant 0 : index
    %58 = vector.load %arg9[%c0_22, %c0_23] : memref<1x128xf32, #tpu.memory_space<vmem>>, vector<1x128xf32>
    %59 = arith.addf %57, %58 : vector<1x128xf32>
    %cst_24 = arith.constant 0.000000e+00 : f32
    %60 = vector.broadcast %cst_24 : f32 to vector<1x128xf32>
    %61 = arith.maximumf %59, %60 : vector<1x128xf32>
    %c0_25 = arith.constant 0 : index
    %c0_26 = arith.constant 0 : index
    %62 = vector.load %arg10[%c0_25, %c0_26] : memref<128x128xf32, #tpu.memory_space<vmem>>, vector<128x128xf32>
    %cst_27 = arith.constant dense<0.000000e+00> : vector<1x128xf32>
    %63 = tpu.matmul %61, %62, %cst_27 {dimension_numbers = #tpu.dot_dimension_numbers<[1], [0], [0], [1], [0, 0, 1, 1], [], []>} : vector<1x128xf32>, vector<128x128xf32>, vector<1x128xf32> -> vector<1x128xf32>
    %c0_28 = arith.constant 0 : index
    %c0_29 = arith.constant 0 : index
    %64 = vector.load %arg11[%c0_28, %c0_29] : memref<1x128xf32, #tpu.memory_space<vmem>>, vector<1x128xf32>
    %65 = arith.addf %63, %64 : vector<1x128xf32>
    %c0_30 = arith.constant 0 : index
    %c0_31 = arith.constant 0 : index
    %c0_32 = arith.constant 0 : index
    %66 = vector.load %arg12[%c0_30, %c0_31, %c0_32] : memref<1x1x128xf32, #tpu.memory_space<vmem>>, vector<1x1x128xf32>
    %67 = vector.shape_cast %66 : vector<1x1x128xf32> to vector<1x128xf32>
    %68 = vector.shape_cast %65 : vector<1x128xf32> to vector<1x1x128xf32>
    tpu.vector_store %arg12[%c0_30, %c0_31, %c0_32], %68 {strides = array<i32>} : memref<1x1x128xf32, #tpu.memory_space<vmem>>, vector<1x1x128xf32>,
    return
  }
  func.func @transform_0(%arg0: i32) -> (i32, i32, i32) {
    %c0_i32 = arith.constant 0 : i32
    %c0_i32_0 = arith.constant 0 : i32
    %c0_i32_1 = arith.constant 0 : i32
    return %arg0, %c0_i32, %c0_i32_0 : i32, i32, i32
  }
  func.func @transform_1(%arg0: i32) -> (i32, i32) {
    %c0_i32 = arith.constant 0 : i32
    %c0_i32_0 = arith.constant 0 : i32
    %c0_i32_1 = arith.constant 0 : i32
    return %c0_i32, %c0_i32_0 : i32, i32
  }
  func.func @transform_2(%arg0: i32) -> (i32, i32) {
    %c0_i32 = arith.constant 0 : i32
    %c0_i32_0 = arith.constant 0 : i32
    %c0_i32_1 = arith.constant 0 : i32
    return %c0_i32, %c0_i32_0 : i32, i32
  }
  func.func @transform_3(%arg0: i32) -> (i32, i32) {
    %c0_i32 = arith.constant 0 : i32
    %c0_i32_0 = arith.constant 0 : i32
    %c0_i32_1 = arith.constant 0 : i32
    return %c0_i32, %c0_i32_0 : i32, i32
  }
  func.func @transform_4(%arg0: i32) -> (i32, i32) {
    %c0_i32 = arith.constant 0 : i32
    %c0_i32_0 = arith.constant 0 : i32
    %c0_i32_1 = arith.constant 0 : i32
    return %c0_i32, %c0_i32_0 : i32, i32
  }
  func.func @transform_5(%arg0: i32) -> (i32, i32) {
    %c0_i32 = arith.constant 0 : i32
    %c0_i32_0 = arith.constant 0 : i32
    %c0_i32_1 = arith.constant 0 : i32
    return %c0_i32, %c0_i32_0 : i32, i32
  }
  func.func @transform_6(%arg0: i32) -> (i32, i32) {
    %c0_i32 = arith.constant 0 : i32
    %c0_i32_0 = arith.constant 0 : i32
    %c0_i32_1 = arith.constant 0 : i32
    return %c0_i32, %c0_i32_0 : i32, i32
  }
  func.func @transform_7(%arg0: i32) -> (i32, i32) {
    %c0_i32 = arith.constant 0 : i32
    %c0_i32_0 = arith.constant 0 : i32
    %c0_i32_1 = arith.constant 0 : i32
    return %c0_i32, %c0_i32_0 : i32, i32
  }
  func.func @transform_8(%arg0: i32) -> (i32, i32) {
    %c0_i32 = arith.constant 0 : i32
    %c0_i32_0 = arith.constant 0 : i32
    %c0_i32_1 = arith.constant 0 : i32
    return %c0_i32, %c0_i32_0 : i32, i32
  }
  func.func @transform_9(%arg0: i32) -> (i32, i32) {
    %c0_i32 = arith.constant 0 : i32
    %c0_i32_0 = arith.constant 0 : i32
    %c0_i32_1 = arith.constant 0 : i32
    return %c0_i32, %c0_i32_0 : i32, i32
  }
  func.func @transform_10(%arg0: i32) -> (i32, i32) {
    %c0_i32 = arith.constant 0 : i32
    %c0_i32_0 = arith.constant 0 : i32
    %c0_i32_1 = arith.constant 0 : i32
    return %c0_i32, %c0_i32_0 : i32, i32
  }
  func.func @transform_11(%arg0: i32) -> (i32, i32, i32) {
    %c0_i32 = arith.constant 0 : i32
    %c0_i32_0 = arith.constant 0 : i32
    %c0_i32_1 = arith.constant 0 : i32
    return %arg0, %c0_i32, %c0_i32_0 : i32, i32, i32
  }
}

</mosaic_0001>

<bundles_post_ra>
// kernel: lenet_pallas.1
= control target key start
LH: loop header
LB: loop body
LE: loop exit
PB: predicated region body
PF: predicated region fallthrough
CT: control target
= control target key end

     0   :  { %s5186_s0 = inlined_call_operand.vmem [shape: f32[2,32,128], index: 0, kind: input, shape index: {}]   ;;  %s5187_s1 = inlined_call_operand.hbm [shape: f32[640,256], index: 1, kind: input, shape index: {}]   ;;  %s5188_s2 = inlined_call_operand.hbm [shape: f32[1,256], index: 2, kind: input, shape index: {}]   ;;  %s5189_s3 = inlined_call_operand.hbm [shape: f32[1280,256], index: 3, kind: input, shape index: {}]   ;;  %s5190_s4 = inlined_call_operand.hbm [shape: f32[1,256], index: 4, kind: input, shape index: {}]   ;;  %s5191_s5 = inlined_call_operand.hbm [shape: f32[1280,128], index: 5, kind: input, shape index: {}]   ;;  %s5192_s6 = inlined_call_operand.hbm [shape: f32[1,128], index: 6, kind: input, shape index: {}]   ;;  %s5193_s7 = inlined_call_operand.hbm [shape: f32[128,128], index: 7, kind: input, shape index: {}]   ;;  %s5194_s8 = inlined_call_operand.hbm [shape: f32[1,128], index: 8, kind: input, shape index: {}]   ;;  %s5195_s9 = inlined_call_operand.hbm [shape: f32[128,128], index: 9, kind: input, shape index: {}]   ;;  %s5196_s10 = inlined_call_operand.hbm [shape: f32[1,128], index: 10, kind: input, shape index: {}]   ;;  %s5197_s11 = inlined_call_operand.hbm [shape: f32[2,1,128], index: 11, kind: output, shape index: {}]  }
   0x1   :  { %5206 = sst [smem:[#allocation32_spill]] %s5188_s2 }
   0x2   :  { %5207 = sst [smem:[#allocation33_spill]] %s5190_s4 }
   0x3   :  { %5208 = sst [smem:[#allocation34_spill]] %s5192_s6 }
   0x4   :  { %5209 = sst [smem:[#allocation35_spill]] %s5194_s8 }
   0x5   :  { %16 = vsyncpa [#allocation3], 0 }
   0x6   :  { %17 = vsyncpa [#allocation6], 0 }
   0x7   :  { %18 = vsyncpa [#allocation9], 0 }
   0x8   :  { %19 = vsyncpa [#allocation12], 0 }
   0x9   :  { %20 = vsyncpa [#allocation15], 0 }
   0xa   :  { %21 = vsyncpa [#allocation18], 0 }
   0xb   :  { %22 = vsyncpa [#allocation4], 0 }
   0xc   :  { %24 = vsyncpa [#allocation4 + $0x1], 0  ;;  %s4558_s17 = smov 0   ;;  %s4560_s18 = smov 0  }
   0xd   :  { %s4562_s19 = smov 0   ;;  %s4564_s20 = smov 0  }
   0xe LB: > { %5210 = sst [smem:[#allocation27_spill]] %s4464_s17  ;;  %s4579_s21 = sadd.s32 4294967295, %s4476_s20   ;;  %s4476_s20 = sphi %s4564_s20, %s5241_s20   ;;  %s4472_s19 = sphi %s4562_s19, %s5243_s19   ;;  %s4468_s18 = sphi %s4560_s18, %s5245_s18   ;;  %s4464_s17 = sphi %s4558_s17, %s5244_s17  }
   0xf   : > { %5211 = sst [smem:[#allocation28_spill]] %s4472_s19  ;;  %s2875_s22 = sadd.s32 4294967294, %s4476_s20  }
  0x10   : > { %s4583_s23 = sadd.s32 1, %s4476_s20   ;;  %s273_s24 = sadd.s32 1, %s4472_s19 }
  0x11   : > { %5212 = sst [smem:[#allocation29_spill]] %s4583_s23  ;;  %s270_s25 = ssub.s32 %s4476_s20, %s4583_s23 }
  0x12   : > { %p283_p0 = scmp.ne.s32.totalorder %s4472_s19, %s4468_s18  ;;  %p271_p1 = scmp.eq.s32.totalorder %s270_s25, 0 }
  0x13   : > { %p284_p2 = scmp.eq.s32.totalorder %s4579_s21, 1  ;;  %p289_p3 = scmp.ne.s32.totalorder %s4468_s18, %s4464_s17 }
  0x14   : > { %p290_p4 = scmp.eq.s32.totalorder %s2875_s22, 1  ;;  %p2876_p7 = scmp.ge.s32.totalorder %s4476_s20, 1 }
  0x15   : > { %s4594_s26 = scalar_select %p271_p1, %s4472_s19, %s273_s24  }
  0x16   : > { %p4596_p5 = por %p284_p2, %p283_p0  ;;  %p4600_p6 = por %p290_p4, %p289_p3 }
  0x17   : > { %5213 = sst [smem:[#allocation30_spill]] %s4594_s26  ;;  %p297_p8 = scmp.lt.s32.totalorder %s4476_s20, 3 }
  0x18   : > { %s5214_s27 = scalar_select %p4596_p5, 1, 0 }
  0x19   : > { %s5215_s28 = scalar_select %p4600_p6, 1, 0 }
  0x1a   : > { %p5201_p9 = scmp.eq.s32.totalorder %s4579_s21, 0  ;;  %p4607_p10 = pnand %p2876_p7, %p297_p8 }
  0x1b   : > { %5216 = sst [smem:[#allocation31_spill]] %s5215_s28  ;;  %s4478_s30 = smov [#allocation5]  }
  0x1c   : > { %s5217_s29 = scalar_select %p4607_p10, 1, 0 }
  0x1d   : > { %s323_s12 = sshll.u32 %s4478_s30, 4  ;;  %p3968_p11 = pneg %p4607_p10  ;;  %s324_s12 = int_to_ptr.vmem [resolvable:$true] %s323_s12 }
  0x1e   : > { %s4479_s13 = smov [#allocation8]   ;;  %s4480_s16 = smov [#allocation11]  }
  0x1f   : > { %s347_s14 = sshll.u32 %s4479_s13, 4  ;;  %p4615_p12 = pnand %p5201_p9, %p3968_p11  ;;  %s4619_s14 = int_to_ptr.vmem [resolvable:$true] %s347_s14 }
  0x20   : > { %s371_s22 = sshll.u32 %s4480_s16, 4  ;;  %s5219_s2 = sld [smem:[#allocation32_spill]]  ;;  %s4621_s22 = int_to_ptr.vmem [resolvable:$true] %s371_s22 }
  0x21   : > { %p4631_p0 = pneg %p4615_p12 }
  0x26   : > { %s4110_s30 = scalar_lea.hbm %s5219_s2, 32 }
  0x27   : > { %p4111_p13 = scmp.ne.s32.totalorder %s5219_s2, %s4110_s30  ;;  %p4117_p3 = scmp.lt.u32.totalorder %s4110_s30, %s5219_s2 }
  0x29   : > { %p4113_p1 = pnand %p4631_p0, %p4111_p13 }
  0x2b   : > { %p4114_p2 = pneg %p4113_p1 }
  0x2d   : > { %p4119_p4 = pnand %p4117_p3, %p4114_p2 }
  0x2f   : > { %4122 = shalt.err (!%p4119_p4)
}
  0x30   : > { %s4123_s24 = scalar_lea.vmem %s324_s12, 32  ;;  %p4131_p9 = scmp.lt.s32.totalorder %s324_s12, %s324_s12 }
  0x31   : > { %p4124_p7 = scmp.ne.s32.totalorder %s324_s12, %s4123_s24  ;;  %p4132_p6 = scmp.lt.s32.totalorder %s4123_s24, %s4123_s24 }
  0x33   : > { %p4126_p8 = pnand %p4124_p7, %p4631_p0  ;;  %p4133_p5 = por %p4132_p6, %p4131_p9 }
  0x35   : > { %p4127_p11 = pneg %p4126_p8 }
  0x37   : > { %p4134_p10 = pnand %p4133_p5, %p4127_p11 }
  0x39   : > { %4137 = shalt.err (!%p4134_p10)
}
  0x3a   : > { %3974 = dma.hbm_to_vmem [thread:$0]  (!%p4615_p12), %s5219_s2, 32, %s324_s12, [#allocation6]  }
  0x3b   : > { %s5221_s4 = sld [smem:[#allocation33_spill]] }
  0x41   : > { %s4138_s30 = scalar_lea.hbm %s5221_s4, 32 }
  0x42   : > { %p4139_p13 = scmp.ne.s32.totalorder %s5221_s4, %s4138_s30  ;;  %p4145_p5 = scmp.lt.u32.totalorder %s4138_s30, %s5221_s4 }
  0x44   : > { %p4141_p1 = pnand %p4139_p13, %p4631_p0 }
  0x46   : > { %p4142_p6 = pneg %p4141_p1 }
  0x48   : > { %p4147_p9 = pnand %p4145_p5, %p4142_p6 }
  0x4a   : > { %4150 = shalt.err (!%p4147_p9)
}
  0x4b   : > { %s4151_s12 = scalar_lea.vmem %s4619_s14, 32  ;;  %p4159_p4 = scmp.lt.s32.totalorder %s4619_s14, %s4619_s14 }
  0x4c   : > { %p4152_p10 = scmp.ne.s32.totalorder %s4619_s14, %s4151_s12  ;;  %p4160_p7 = scmp.lt.s32.totalorder %s4151_s12, %s4151_s12 }
  0x4e   : > { %p4154_p2 = pnand %p4152_p10, %p4631_p0  ;;  %p4161_p8 = por %p4160_p7, %p4159_p4 }
  0x50   : > { %p4155_p3 = pneg %p4154_p2 }
  0x52   : > { %p4162_p11 = pnand %p4161_p8, %p4155_p3 }
  0x54   : > { %4165 = shalt.err (!%p4162_p11)
}
  0x55   : > { %3980 = dma.hbm_to_vmem [thread:$0]  (!%p4615_p12), %s5221_s4, 32, %s4619_s14, [#allocation9]  }
  0x56   : > { %s5222_s6 = sld [smem:[#allocation34_spill]] }
  0x5c   : > { %s4166_s23 = scalar_lea.hbm %s5222_s6, 16 }
  0x5d   : > { %p4167_p13 = scmp.ne.s32.totalorder %s5222_s6, %s4166_s23  ;;  %p4173_p5 = scmp.lt.u32.totalorder %s4166_s23, %s5222_s6 }
  0x5f   : > { %p4169_p1 = pnand %p4167_p13, %p4631_p0 }
  0x61   : > { %p4170_p6 = pneg %p4169_p1 }
  0x63   : > { %p4175_p9 = pnand %p4173_p5, %p4170_p6 }
  0x65   : > { %4178 = shalt.err (!%p4175_p9)
}
  0x66   : > { %s4179_s14 = scalar_lea.vmem %s4621_s22, 16  ;;  %s4186_s12 = scalar_lea.vmem %s4621_s22, 32 }
  0x67   : > { %p4180_p10 = scmp.ne.s32.totalorder %s4621_s22, %s4179_s14  ;;  %p4187_p4 = scmp.lt.s32.totalorder %s4621_s22, %s4621_s22 }
  0x68   : > { %p4188_p7 = scmp.lt.s32.totalorder %s4186_s12, %s4179_s14 }
  0x69   : > { %p4182_p2 = pnand %p4180_p10, %p4631_p0 }
  0x6a   : > { %p4189_p8 = por %p4188_p7, %p4187_p4 }
  0x6b   : > { %p4183_p3 = pneg %p4182_p2 }
  0x6d   : > { %p4190_p11 = pnand %p4189_p8, %p4183_p3 }
  0x6f   : > { %4193 = shalt.err (!%p4190_p11)
}
  0x70   : > { %3986 = dma.hbm_to_vmem [thread:$0]  (!%p4615_p12), %s5222_s6, 16, %s4621_s22, [#allocation12]  }
  0x71   : > { %s4481_s19 = smov [#allocation14]   ;;  %s4482_s23 = smov [#allocation2]  }
  0x72   : > { %s395_s26 = sshll.u32 %s4481_s19, 4  ;;  %s309_s25 = sshll.u32 %s4482_s23, 4  ;;  %s396_s26 = int_to_ptr.vmem [resolvable:$true] %s395_s26  ;;  %s310_s25 = int_to_ptr.vmem [resolvable:$true] %s309_s25 }
  0x73   : > { %s5223_s8 = sld [smem:[#allocation35_spill]] }
  0x79   : > { %s4194_s24 = scalar_lea.hbm %s5223_s8, 16 }
  0x7a   : > { %p4195_p13 = scmp.ne.s32.totalorder %s5223_s8, %s4194_s24  ;;  %p4201_p5 = scmp.lt.u32.totalorder %s4194_s24, %s5223_s8 }
  0x7c   : > { %p4197_p1 = pnand %p4195_p13, %p4631_p0 }
  0x7e   : > { %p4198_p6 = pneg %p4197_p1 }
  0x80   : > { %p4203_p9 = pnand %p4201_p5, %p4198_p6 }
  0x82   : > { %4206 = shalt.err (!%p4203_p9)
}
  0x83   : > { %s4207_s22 = scalar_lea.vmem %s396_s26, 16  ;;  %s4214_s28 = scalar_lea.vmem %s396_s26, 32 }
  0x84   : > { %p4208_p10 = scmp.ne.s32.totalorder %s396_s26, %s4207_s22  ;;  %p4215_p4 = scmp.lt.s32.totalorder %s396_s26, %s396_s26 }
  0x85   : > { %p4216_p7 = scmp.lt.s32.totalorder %s4214_s28, %s4207_s22 }
  0x86   : > { %p4210_p2 = pnand %p4208_p10, %p4631_p0 }
  0x87   : > { %p4217_p8 = por %p4216_p7, %p4215_p4 }
  0x88   : > { %p4211_p3 = pneg %p4210_p2 }
  0x8a   : > { %p4218_p11 = pnand %p4217_p8, %p4211_p3 }
  0x8c   : > { %4221 = shalt.err (!%p4218_p11)
}
  0x8d   : > { %3992 = dma.hbm_to_vmem [thread:$0]  (!%p4615_p12), %s5223_s8, 16, %s396_s26, [#allocation15]  }
  0x8e   : > { %s4222_s16 = scalar_lea.hbm %s5187_s1, 20480 }
  0x8f   : > { %p4223_p13 = scmp.ne.s32.totalorder %s5187_s1, %s4222_s16  ;;  %p4229_p5 = scmp.lt.u32.totalorder %s4222_s16, %s5187_s1 }
  0x91   : > { %p4225_p1 = pnand %p4223_p13, %p4631_p0 }
  0x93   : > { %p4226_p6 = pneg %p4225_p1 }
  0x95   : > { %p4231_p9 = pnand %p4229_p5, %p4226_p6 }
  0x97   : > { %4234 = shalt.err (!%p4231_p9)
}
  0x98   : > { %s4235_s22 = scalar_lea.vmem %s310_s25, 20480  ;;  %p4243_p4 = scmp.lt.s32.totalorder %s310_s25, %s310_s25 }
  0x99   : > { %p4236_p10 = scmp.ne.s32.totalorder %s310_s25, %s4235_s22  ;;  %p4244_p7 = scmp.lt.s32.totalorder %s4235_s22, %s4235_s22 }
  0x9b   : > { %p4238_p2 = pnand %p4236_p10, %p4631_p0  ;;  %p4245_p8 = por %p4244_p7, %p4243_p4 }
  0x9d   : > { %p4239_p3 = pneg %p4238_p2 }
  0x9f   : > { %p4246_p11 = pnand %p4245_p8, %p4239_p3 }
  0xa1   : > { %4249 = shalt.err (!%p4246_p11)
}
  0xa2   : > { %s4483_s26 = smov 256   ;;  %s4484_s28 = smov 16  }
  0xa3   : > { %3971 = dma.hbm_to_vmem [thread:$0]  (!%p4615_p12), %s5187_s1, 20480, %s310_s25, [#allocation3], %s4483_s26, %s4483_s26, %s4484_s28  }
  0xa4   : > { %s4485_s2 = smov [#allocation7]   ;;  %s4486_s16 = smov [#allocation10]  }
  0xa5   : > { %s333_s30 = sshll.u32 %s4485_s2, 4  ;;  %s357_s24 = sshll.u32 %s4486_s16, 4  ;;  %s334_s30 = int_to_ptr.vmem [resolvable:$true] %s333_s30  ;;  %s358_s24 = int_to_ptr.vmem [resolvable:$true] %s357_s24 }
  0xa6   : > { %s4250_s17 = scalar_lea.hbm %s5189_s3, 40960 }
  0xa7   : > { %p4251_p13 = scmp.ne.s32.totalorder %s5189_s3, %s4250_s17  ;;  %p4257_p5 = scmp.lt.u32.totalorder %s4250_s17, %s5189_s3 }
  0xa9   : > { %p4253_p1 = pnand %p4251_p13, %p4631_p0 }
  0xab   : > { %p4254_p6 = pneg %p4253_p1 }
  0xad   : > { %p4259_p9 = pnand %p4257_p5, %p4254_p6 }
  0xaf   : > { %4262 = shalt.err (!%p4259_p9)
}
  0xb0   : > { %s4263_s25 = scalar_lea.vmem %s334_s30, 40960  ;;  %p4271_p4 = scmp.lt.s32.totalorder %s334_s30, %s334_s30 }
  0xb1   : > { %p4264_p10 = scmp.ne.s32.totalorder %s334_s30, %s4263_s25  ;;  %p4272_p7 = scmp.lt.s32.totalorder %s4263_s25, %s4263_s25 }
  0xb3   : > { %p4266_p2 = pnand %p4264_p10, %p4631_p0  ;;  %p4273_p8 = por %p4272_p7, %p4271_p4 }
  0xb5   : > { %p4267_p3 = pneg %p4266_p2 }
  0xb7   : > { %p4274_p11 = pnand %p4273_p8, %p4267_p3 }
  0xb9   : > { %4277 = shalt.err (!%p4274_p11)
}
  0xba   : > { %3977 = dma.hbm_to_vmem [thread:$0]  (!%p4615_p12), %s5189_s3, 40960, %s334_s30, [#allocation6], %s4483_s26, %s4483_s26, %s4484_s28  }
  0xbb   : > { %s4278_s23 = scalar_lea.hbm %s5191_s5, 20480 }
  0xbc   : > { %p4279_p13 = scmp.ne.s32.totalorder %s5191_s5, %s4278_s23  ;;  %p4285_p5 = scmp.lt.u32.totalorder %s4278_s23, %s5191_s5 }
  0xbe   : > { %p4281_p1 = pnand %p4279_p13, %p4631_p0 }
  0xc0   : > { %p4282_p6 = pneg %p4281_p1 }
  0xc2   : > { %p4287_p9 = pnand %p4285_p5, %p4282_p6 }
  0xc4   : > { %4290 = shalt.err (!%p4287_p9)
}
  0xc5   : > { %s4291_s17 = scalar_lea.vmem %s358_s24, 20480  ;;  %p4299_p4 = scmp.lt.s32.totalorder %s358_s24, %s358_s24 }
  0xc6   : > { %p4292_p10 = scmp.ne.s32.totalorder %s358_s24, %s4291_s17  ;;  %p4300_p7 = scmp.lt.s32.totalorder %s4291_s17, %s4291_s17 }
  0xc8   : > { %p4294_p2 = pnand %p4292_p10, %p4631_p0  ;;  %p4301_p8 = por %p4300_p7, %p4299_p4 }
  0xca   : > { %p4295_p3 = pneg %p4294_p2 }
  0xcc   : > { %p4302_p11 = pnand %p4301_p8, %p4295_p3 }
  0xce   : > { %4305 = shalt.err (!%p4302_p11)
}
  0xcf   : > { %s4487_s26 = smov 128   ;;  %s4488_s28 = smov 8  }
  0xd0   : > { %3983 = dma.hbm_to_vmem [thread:$0]  (!%p4615_p12), %s5191_s5, 20480, %s358_s24, [#allocation9], %s4487_s26, %s4487_s26, %s4488_s28  }
  0xd1   : > { %s4489_s25 = smov [#allocation13]   ;;  %s4490_s19 = smov [#allocation16]  }
  0xd2   : > { %s381_s4 = sshll.u32 %s4489_s25, 4  ;;  %s405_s6 = sshll.u32 %s4490_s19, 4  ;;  %s382_s4 = int_to_ptr.vmem [resolvable:$true] %s381_s4  ;;  %s406_s6 = int_to_ptr.vmem [resolvable:$true] %s405_s6 }
  0xd3   : > { %s4306_s2 = scalar_lea.hbm %s5193_s7, 2048 }
  0xd4   : > { %p4307_p13 = scmp.ne.s32.totalorder %s5193_s7, %s4306_s2  ;;  %p4313_p5 = scmp.lt.u32.totalorder %s4306_s2, %s5193_s7 }
  0xd6   : > { %p4309_p1 = pnand %p4307_p13, %p4631_p0 }
  0xd8   : > { %p4310_p6 = pneg %p4309_p1 }
  0xda   : > { %p4315_p9 = pnand %p4313_p5, %p4310_p6 }
  0xdc   : > { %4318 = shalt.err (!%p4315_p9)
}
  0xdd   : > { %s4319_s24 = scalar_lea.vmem %s382_s4, 2048  ;;  %p4327_p4 = scmp.lt.s32.totalorder %s382_s4, %s382_s4 }
  0xde   : > { %p4320_p10 = scmp.ne.s32.totalorder %s382_s4, %s4319_s24  ;;  %p4328_p7 = scmp.lt.s32.totalorder %s4319_s24, %s4319_s24 }
  0xe0   : > { %p4322_p2 = pnand %p4320_p10, %p4631_p0  ;;  %p4329_p8 = por %p4328_p7, %p4327_p4 }
  0xe2   : > { %p4323_p3 = pneg %p4322_p2 }
  0xe4   : > { %p4330_p11 = pnand %p4329_p8, %p4323_p3 }
  0xe6   : > { %4333 = shalt.err (!%p4330_p11)
}
  0xe7   : > { %3989 = dma.hbm_to_vmem [thread:$0]  (!%p4615_p12), %s5193_s7, 2048, %s382_s4, [#allocation12], %s4487_s26, %s4487_s26, %s4488_s28  }
  0xe8   : > { %s4334_s8 = scalar_lea.hbm %s5195_s9, 2048 }
  0xe9   : > { %p4335_p13 = scmp.ne.s32.totalorder %s5195_s9, %s4334_s8  ;;  %p4341_p5 = scmp.lt.u32.totalorder %s4334_s8, %s5195_s9 }
  0xeb   : > { %p4337_p1 = pnand %p4335_p13, %p4631_p0 }
  0xed   : > { %p4338_p6 = pneg %p4337_p1 }
  0xef   : > { %p4343_p9 = pnand %p4341_p5, %p4338_p6 }
  0xf1   : > { %4346 = shalt.err (!%p4343_p9)
}
  0xf2   : > { %s4347_s12 = scalar_lea.vmem %s406_s6, 2048  ;;  %p4355_p4 = scmp.lt.s32.totalorder %s406_s6, %s406_s6 }
  0xf3   : > { %p4348_p10 = scmp.ne.s32.totalorder %s406_s6, %s4347_s12  ;;  %p4356_p7 = scmp.lt.s32.totalorder %s4347_s12, %s4347_s12 }
  0xf5   : > { %p4350_p2 = pnand %p4348_p10, %p4631_p0  ;;  %p4357_p8 = por %p4356_p7, %p4355_p4 }
  0xf7   : > { %p4351_p3 = pneg %p4350_p2 }
  0xf9   : > { %p4358_p11 = pnand %p4357_p8, %p4351_p3 }
  0xfb   : > { %4361 = shalt.err (!%p4358_p11)
}
  0xfc   : > { %3995 = dma.hbm_to_vmem [thread:$0]  (!%p4615_p12), %s5195_s9, 2048, %s406_s6, [#allocation15], %s4487_s26, %s4487_s26, %s4488_s28  }
  0xfd   : > { %s4491_s24 = smov [#allocation17]   ;;  %s4362_s19 = scalar_lea.hbm %s5196_s10, 16 }
  0xfe   : > { %s419_s30 = sshll.u32 %s4491_s24, 4  ;;  %p4363_p13 = scmp.ne.s32.totalorder %s5196_s10, %s4362_s19  ;;  %s420_s30 = int_to_ptr.vmem [resolvable:$true] %s419_s30 }
  0xff   : > { %p4369_p5 = scmp.lt.u32.totalorder %s4362_s19, %s5196_s10 }
 0x100   : > { %p4365_p1 = pnand %p4363_p13, %p4631_p0 }
 0x102   : > { %p4366_p6 = pneg %p4365_p1 }
 0x104   : > { %p4371_p9 = pnand %p4369_p5, %p4366_p6 }
 0x106   : > { %4374 = shalt.err (!%p4371_p9)
}
 0x107   : > { %s4375_s26 = scalar_lea.vmem %s420_s30, 16  ;;  %s4382_s28 = scalar_lea.vmem %s420_s30, 32 }
 0x108   : > { %p4376_p10 = scmp.ne.s32.totalorder %s420_s30, %s4375_s26  ;;  %p4383_p4 = scmp.lt.s32.totalorder %s420_s30, %s420_s30 }
 0x109   : > { %p4384_p7 = scmp.lt.s32.totalorder %s4382_s28, %s4375_s26 }
 0x10a   : > { %p4378_p2 = pnand %p4376_p10, %p4631_p0 }
 0x10b   : > { %p4385_p8 = por %p4384_p7, %p4383_p4 }
 0x10c   : > { %p4379_p3 = pneg %p4378_p2 }
 0x10e   : > { %p4386_p11 = pnand %p4385_p8, %p4379_p3 }
 0x110   : > { %4389 = shalt.err (!%p4386_p11)
}
 0x111   : > { %3998 = dma.hbm_to_vmem [thread:$0]  (!%p4615_p12), %s5196_s10, 16, %s420_s30, [#allocation18]  }
 0x112   : > { %p5224_p13 = scmp.ne.s32.totalorder %s5217_s29, 0 }
 0x113   : > { %p5225_p1 = scmp.eq.s32.totalorder (!%p5224_p13), %s4579_s21, 0 }
 0x114   : > { %440 = sbr.rel (%p5224_p13) target bundleno = 2208 (0x8a0), region = 64 }
 0x11b   : > { %4435 = dma.done.wait (%p5225_p1), [#allocation3], 20480   ;;  %p5226_p0 = pmov %p5225_p1 }
 0x11d   : > { %4437 = vsyncadd (%p5226_p0), [#allocation3], 4294946816  ;;  %p5227_p6 = pmov %p5226_p0 }
 0x11e   : > { %p5228_p5 = pmov %p5226_p0 }
 0x11f   : > { %4439 = dma.done.wait (%p5227_p6), [#allocation6], 40992  }
 0x120   : > { %4441 = vsyncadd (%p5228_p5), [#allocation6], 4294926304  ;;  %p5229_p9 = pmov %p5226_p0 }
 0x121   : > { %p5230_p12 = pmov %p5226_p0 }
 0x122   : > { %4443 = dma.done.wait (%p5229_p9), [#allocation9], 20512  }
 0x123   : > { %4445 = vsyncadd (%p5230_p12), [#allocation9], 4294946784  ;;  %p5231_p10 = pmov %p5226_p0 }
 0x124   : > { %p5232_p2 = pmov %p5226_p0 }
 0x125   : > { %4447 = dma.done.wait (%p5231_p10), [#allocation12], 2064  }
 0x126   : > { %4449 = vsyncadd (%p5232_p2), [#allocation12], 4294965232  ;;  %p5233_p3 = pmov %p5226_p0 }
 0x127   : > { %p5234_p4 = pmov %p5226_p0 }
 0x128   : > { %4451 = dma.done.wait (%p5233_p3), [#allocation15], 2064  }
 0x129   : > { %4453 = vsyncadd (%p5234_p4), [#allocation15], 4294965232  ;;  %p5235_p7 = pmov %p5226_p0 }
 0x12a   : > { %p5236_p8 = pmov %p5226_p0 }
 0x12b   : > { %4455 = dma.done.wait (%p5235_p7), [#allocation18], 16  }
 0x12c   : > { %4457 = vsyncadd (%p5236_p8), [#allocation18], 4294967280  ;;  %v577_v0 = vld [vmem:[#allocation2 + $0x8] sm:$0xff]  ;;  %v579_v1 = vld [vmem:[#allocation2 + $0x18] sm:$0xff]  ;;  %p515_p11 = scmp.lt.s32.totalorder %s4579_s21, 1  ;;  %vm528_vm0 = vcmask 1046528  }
 0x12d   : > { %v576_v2 = vld [vmem:[#allocation2] sm:$0xff]  ;;  %v3184_v3 = vpack.c.bf16 %v579_v1, %v577_v0  ;;  %v578_v4 = vld [vmem:[#allocation2 + $0x10] sm:$0xff]  ;;  %v581_v5 = vld [vmem:[#allocation2 + $0x28] sm:$0xff]  ;;  %vm540_vm1 = vcmask 1045504   ;;  %vm564_vm2 = vcmask 1043456   ;;  %vm552_vm3 = vcmask 1044480  }
 0x12e   : > { %v583_v6 = vld [vmem:[#allocation2 + $0x38] sm:$0xff]  ;;  %v3186_v7 = vpack.c.bf16 %v578_v4, %v576_v2  ;;  %v580_v9 = vld [vmem:[#allocation2 + $0x20] sm:$0xff]  ;;  %v582_v10 = vld [vmem:[#allocation2 + $0x30] sm:$0xff]  ;;  %s516_s29 = scalar_select %p515_p11, %s4579_s21, 1  ;;  %vm1047_vm4 = vcmask 998400   ;;  %vm1110_vm5 = vcmask 1042432  }
 0x12f   : > { %v3188_v8 = vpack.c.bf16 %v583_v6, %v581_v5  ;;  %v585_v11 = vld [vmem:[#allocation2 + $0x48] sm:$0xff]  ;;  %3185 = vmatprep.subr.bf16.mxu0 %v3184_v3  ;;  %v587_v12 = vld [vmem:[#allocation2 + $0x58] sm:$0xff]  ;;  %v3190_v13 = vpack.c.bf16 %v582_v10, %v580_v9  ;;  %v584_v15 = vld [vmem:[#allocation2 + $0x40] sm:$0xff]  ;;  %s4493_s17 = smov 122   ;;  %vm1161_vm6 = vcmask 1041408   ;;  %s4494_s24 = smov 112  }
 0x130   : > { %3187 = vmatpush1.bf16.msra.mxu0 %v3186_v7  ;;  %v3192_v14 = vpack.c.bf16 %v587_v12, %v585_v11  ;;  %v586_v16 = vld [vmem:[#allocation2 + $0x50] sm:$0xff]  ;;  %v589_v17 = vld [vmem:[#allocation2 + $0x68] sm:$0xff]  ;;  %v591_v18 = vld [vmem:[#allocation2 + $0x78] sm:$0xff]  ;;  %s2904_s15 = sshll.u32 %s516_s29, 5  ;;  %vm1953_vm7 = vcmask 916480   ;;  %vm4496_vm8 = vmmov 0  }
 0x131   : > { %3189 = vmatprep.subr.bf16.mxu0 %v3188_v8  ;;  %v3194_v19 = vpack.c.bf16 %v586_v16, %v584_v15  ;;  %v3196_v20 = vpack.c.bf16 %v591_v18, %v589_v17  ;;  %v588_v21 = vld [vmem:[#allocation2 + $0x60] sm:$0xff]  ;;  %v590_v22 = vld [vmem:[#allocation2 + $0x70] sm:$0xff]  ;;  %v593_v23 = vld [vmem:[#allocation2 + $0x88] sm:$0xff]  ;;  %s4860_s4 = scalar_lea.vmem %s5186_s0, %s2904_s15  ;;  %s513_s30 = sand.u32 1, %s4468_s18  }
 0x132   : > { %v595_v24 = vld [vmem:[#allocation2 + $0x98] sm:$0xff]  ;;  %v3198_v25 = vpack.c.bf16 %v590_v22, %v588_v21  ;;  %v592_v27 = vld [vmem:[#allocation2 + $0x80] sm:$0xff]  ;;  %v594_v28 = vld [vmem:[#allocation2 + $0x90] sm:$0xff]  ;;  %s2901_s22 = sshll.u32 %s4579_s21, 4  ;;  %s514_s25 = scalar_lea.vmem [#allocation19], %s513_s30 }
 0x133   : > { %v3200_v26 = vpack.c.bf16 %v595_v24, %v593_v23  ;;  %v597_v29 = vld [vmem:[#allocation2 + $0xa8] sm:$0xff]  ;;  %v599_v30 = vld [vmem:[#allocation2 + $0xb8] sm:$0xff]  ;;  %v3202_v31 = vpack.c.bf16 %v594_v28, %v592_v27  ;;  %v596_v33 = vld [vmem:[#allocation2 + $0xa0] sm:$0xff]  ;;  %s2722_s19 = sshll.u32 %s514_s25, 4  ;;  %s5144_s2 = scalar_lea.hbm %s5197_s11, %s2901_s22  ;;  %s5146_s19 = int_to_ptr.vmem [resolvable:$true] %s2722_s19 }
 0x134   : > { %3191 = vmatpush1.bf16.msra.mxu0 %v3190_v13  ;;  %v3204_v32 = vpack.c.bf16 %v599_v30, %v597_v29  ;;  %v598_v34 = vld [vmem:[#allocation2 + $0xb0] sm:$0xff]  ;;  %v601_v35 = vld [vmem:[#allocation2 + $0xc8] sm:$0xff]  ;;  %v603_v36 = vld [vmem:[#allocation2 + $0xd8] sm:$0xff]  ;;  %s2710_s16 = scalar_lea.sflag [#allocation4], %s513_s30  ;;  %s4390_s26 = scalar_lea.vmem %s5146_s19, 16 }
 0x135   : > { %3193 = vmatprep.subr.bf16.mxu0 %v3192_v14  ;;  %v3206_v37 = vpack.c.bf16 %v598_v34, %v596_v33  ;;  %v600_v38 = vld [vmem:[#allocation2 + $0xc0] sm:$0xff]  ;;  %v3208_v39 = vpack.c.bf16 %v603_v36, %v601_v35  ;;  %v602_v40 = vld [vmem:[#allocation2 + $0xd0] sm:$0xff]  ;;  %v4866_v42 = vld [vmem:[%s4860_s4 + $0x8] sm:$0xff]  ;;  %p4391_p13 = scmp.ne.s32.totalorder %s5146_s19, %s4390_s26  ;;  %p5237_p1 = scmp.ne.s32.totalorder %s5214_s27, 0 }
 0x136   : > { %v4863_v41 = vld [vmem:[%s4860_s4] sm:$0xff]  ;;  %v605_v43 = vld [vmem:[#allocation2 + $0xe8] sm:$0xff]  ;;  %v607_v44 = vld [vmem:[#allocation2 + $0xf8] sm:$0xff]  ;;  %v530_v46 = vrot.slane %v4866_v42, 1  ;;  %v542_v48 = vrot.slane %v4866_v42, 2  ;;  %v3210_v49 = vpack.c.bf16 %v602_v40, %v600_v38  ;;  %v566_v4 = vrot.slane %v4866_v42, 4 }
 0x137   : > { %v529_v45 = vrot.slane %v4863_v41, 1  ;;  %v541_v47 = vrot.slane %v4863_v41, 2  ;;  %v3212_v51 = vpack.c.bf16 %v607_v44, %v605_v43  ;;  %v604_v52 = vld [vmem:[#allocation2 + $0xe0] sm:$0xff]  ;;  %v606_v53 = vld [vmem:[#allocation2 + $0xf0] sm:$0xff]  ;;  %v609_v55 = vld [vmem:[#allocation2 + $0x108] sm:$0xff]  ;;  %v565_v3 = vrot.slane %v4863_v41, 4  ;;  %p4392_p0 = pnand %p4391_p13, %p5237_p1 }
 0x138   : > { %3195 = vmatpush1.bf16.msra.mxu0 %v3194_v19  ;;  %v611_v56 = vld [vmem:[#allocation2 + $0x118] sm:$0xff]  ;;  %v3214_v57 = vpack.c.bf16 %v606_v53, %v604_v52  ;;  %v608_v59 = vld [vmem:[#allocation2 + $0x100] sm:$0xff]  ;;  %v610_v60 = vld [vmem:[#allocation2 + $0x110] sm:$0xff]  ;;  %s4497_s21 = smov [#allocation19]  }
 0x139   : > { %3197 = vmatprep.subr.bf16.mxu0 %v3196_v20  ;;  %v531_v50 = vsel %vm528_vm0, %v529_v45, %v530_v46  ;;  %v4876_v54 = vsel %vm540_vm1, %v541_v47, %v542_v48  ;;  %v3216_v58 = vpack.c.bf16 %v611_v56, %v609_v55  ;;  %v613_v61 = vld [vmem:[#allocation2 + $0x128] sm:$0xff]  ;;  %v615_v62 = vld [vmem:[#allocation2 + $0x138] sm:$0xff]  ;;  %v3218_v63 = vpack.c.bf16 %v610_v60, %v608_v59  ;;  %v612_v1 = vld [vmem:[#allocation2 + $0x120] sm:$0xff]  ;;  %p4393_p6 = pneg %p4392_p0  ;;  %s4394_s28 = sshll.u32 %s4497_s21, 4  ;;  %s4395_s28 = int_to_ptr.vmem [resolvable:$false] %s4394_s28 }
 0x13a   : > { %812 = vmatprep.mubr.f32.mxu0 %v531_v50  ;;  %v3220_v0 = vpack.c.bf16 %v615_v62, %v613_v61  ;;  %v614_v2 = vld [vmem:[#allocation2 + $0x130] sm:$0xff]  ;;  %v617_v5 = vld [vmem:[#allocation2 + $0x148] sm:$0xff]  ;;  %v619_v6 = vld [vmem:[#allocation2 + $0x158] sm:$0xff]  ;;  %v4881_v7 = vsel %vm564_vm2, %v565_v3, %v566_v4  ;;  %s4396_s6 = scalar_lea.vmem %s4395_s28, 32  ;;  %p4397_p5 = scmp.lt.s32.totalorder %s5146_s19, %s4395_s28 }
 0x13b   : > { %v3222_v8 = vpack.c.bf16 %v614_v2, %v612_v1  ;;  %v3224_v9 = vpack.c.bf16 %v619_v6, %v617_v5  ;;  %v616_v10 = vld [vmem:[#allocation2 + $0x140] sm:$0xff]  ;;  %v618_v11 = vld [vmem:[#allocation2 + $0x150] sm:$0xff]  ;;  %v621_v12 = vld [vmem:[#allocation2 + $0x168] sm:$0xff]  ;;  %p4398_p9 = scmp.lt.s32.totalorder %s4396_s6, %s4390_s26 }
 0x13c   : > { %3199 = vmatpush1.bf16.msra.mxu0 %v3198_v25  ;;  %v623_v13 = vld [vmem:[#allocation2 + $0x178] sm:$0xff]  ;;  %v4884_v14 = vld [vmem:[%s4860_s4 + $0x10] sm:$0xff]  ;;  %v3226_v15 = vpack.c.bf16 %v618_v11, %v616_v10  ;;  %v620_v18 = vld [vmem:[#allocation2 + $0x160] sm:$0xff] }
 0x13d   : > { %3201 = vmatprep.subr.bf16.mxu0 %v3200_v26  ;;  %v544_v16 = vrot.slane %v4884_v14, 2  ;;  %v3228_v17 = vpack.c.bf16 %v623_v13, %v621_v12  ;;  %v622_v19 = vld [vmem:[#allocation2 + $0x170] sm:$0xff]  ;;  %v568_v20 = vrot.slane %v4884_v14, 4  ;;  %v625_v21 = vld [vmem:[#allocation2 + $0x188] sm:$0xff]  ;;  %v627_v22 = vld [vmem:[#allocation2 + $0x198] sm:$0xff]  ;;  %v556_v24 = vrot.slane %v4884_v14, 3  ;;  %p4399_p12 = por %p4398_p9, %p4397_p5 }
 0x13e   : > { %v4889_v23 = vld [vmem:[%s4860_s4 + $0x18] sm:$0xff]  ;;  %v3230_v28 = vpack.c.bf16 %v622_v19, %v620_v18  ;;  %v3232_v30 = vpack.c.bf16 %v627_v22, %v625_v21  ;;  %v629_v36 = vld [vmem:[#allocation2 + $0x1a8] sm:$0xff]  ;;  %v628_v43 = vld [vmem:[#allocation2 + $0x1a0] sm:$0xff]  ;;  %v532_v1 = vrot.slane %v4884_v14, 1 }
 0x13f   : > { %v4893_v25 = vsel %vm540_vm1, %v542_v48, %v544_v16  ;;  %v558_v26 = vrot.slane %v4889_v23, 3  ;;  %v546_v27 = vrot.slane %v4889_v23, 2  ;;  %v4898_v29 = vsel %vm564_vm2, %v566_v4, %v568_v20  ;;  %v630_v44 = vld [vmem:[#allocation2 + $0x1b0] sm:$0xff]  ;;  %v633_v45 = vld [vmem:[#allocation2 + $0x1c8] sm:$0xff]  ;;  %v635_v47 = vld [vmem:[#allocation2 + $0x1d8] sm:$0xff]  ;;  %p4400_p10 = pnand %p4399_p12, %p4393_p6 }
 0x140   : > { %3203 = vmatpush1.bf16.msra.mxu0 %v3202_v31  ;;  %v624_v31 = vld [vmem:[#allocation2 + $0x180] sm:$0xff]  ;;  %v570_v35 = vrot.slane %v4889_v23, 4  ;;  %v3238_v48 = vpack.c.bf16 %v630_v44, %v628_v43  ;;  %v637_v52 = vld [vmem:[#allocation2 + $0x1e8] sm:$0xff]  ;;  %v639_v53 = vld [vmem:[#allocation2 + $0x1f8] sm:$0xff]  ;;  %v534_v10 = vrot.slane %v4889_v23, 1 }
 0x141   : > { %3205 = vmatprep.subr.bf16.mxu0 %v3204_v32  ;;  %v626_v32 = vld [vmem:[#allocation2 + $0x190] sm:$0xff]  ;;  %v4905_v33 = vsel %vm552_vm3, %v556_v24, %v558_v26  ;;  %v4910_v34 = vsel %vm540_vm1, %v544_v16, %v546_v27  ;;  %v632_v50 = vld [vmem:[#allocation2 + $0x1c0] sm:$0xff]  ;;  %v3244_v56 = vpack.c.bf16 %v639_v53, %v637_v52  ;;  %v641_v59 = vld [vmem:[#allocation2 + $0x208] sm:$0xff] }
 0x142   : > { %v4916_v38 = vsel %vm564_vm2, %v568_v20, %v570_v35  ;;  %v643_v60 = vld [vmem:[#allocation2 + $0x218] sm:$0xff]  ;;  %v645_v2 = vld [vmem:[#allocation2 + $0x228] sm:$0xff]  ;;  %v644_v6 = vld [vmem:[#allocation2 + $0x220] sm:$0xff]  ;;  %v535_v18 = vsel %vm528_vm0, %v532_v1, %v534_v10 }
 0x143   : > { %v3248_v62 = vpack.c.bf16 %v643_v60, %v641_v59  ;;  %v647_v3 = vld [vmem:[#allocation2 + $0x238] sm:$0xff]  ;;  %v649_v11 = vld [vmem:[#allocation2 + $0x248] sm:$0xff]  ;;  %v648_v16 = vld [vmem:[#allocation2 + $0x240] sm:$0xff] }
 0x144   : > { %3207 = vmatpush1.bf16.msra.mxu0 %v3206_v37  ;;  %v631_v37 = vld [vmem:[#allocation2 + $0x1b8] sm:$0xff]  ;;  %v3252_v5 = vpack.c.bf16 %v647_v3, %v645_v2  ;;  %v653_v19 = vld [vmem:[#allocation2 + $0x268] sm:$0xff]  ;;  %v652_v22 = vld [vmem:[#allocation2 + $0x260] sm:$0xff] }
 0x145   : > { %3209 = vmatprep.subr.bf16.mxu0 %v3208_v39  ;;  %v3234_v39 = vpack.c.bf16 %v626_v32, %v624_v31  ;;  %v3236_v40 = vpack.c.bf16 %v631_v37, %v629_v36  ;;  %v651_v12 = vld [vmem:[#allocation2 + $0x258] sm:$0xff]  ;;  %v554_v31 = vrot.slane %v4866_v42, 3  ;;  %v657_v32 = vld [vmem:[#allocation2 + $0x288] sm:$0xff]  ;;  %v658_v43 = vld [vmem:[#allocation2 + $0x290] sm:$0xff] }
 0x146   : > { %v655_v20 = vld [vmem:[#allocation2 + $0x278] sm:$0xff] }
 0x147   : > { %v3260_v21 = vpack.c.bf16 %v655_v20, %v653_v19  ;;  %v659_v36 = vld [vmem:[#allocation2 + $0x298] sm:$0xff]  ;;  %v682_v19 = vld [vmem:[#allocation2 + $0x350] sm:$0xff]  ;;  %v685_v20 = vld [vmem:[#allocation2 + $0x368] sm:$0xff] }
 0x148   : > { %3211 = vmatpush1.bf16.msra.mxu0 %v3210_v49  ;;  %v3240_v49 = vpack.c.bf16 %v635_v47, %v633_v45  ;;  %v661_v45 = vld [vmem:[#allocation2 + $0x2a8] sm:$0xff]  ;;  %v663_v47 = vld [vmem:[#allocation2 + $0x2b8] sm:$0xff] }
 0x149   : > { %3213 = vmatprep.subr.bf16.mxu0 %v3212_v51  ;;  %v634_v51 = vld [vmem:[#allocation2 + $0x1d0] sm:$0xff]  ;;  %v667_v52 = vld [vmem:[#allocation2 + $0x2d8] sm:$0xff] }
 0x14a   : > { %v3242_v55 = vpack.c.bf16 %v634_v51, %v632_v50  ;;  %v662_v50 = vld [vmem:[#allocation2 + $0x2b0] sm:$0xff]  ;;  %v665_v51 = vld [vmem:[#allocation2 + $0x2c8] sm:$0xff]  ;;  %v671_v59 = vld [vmem:[#allocation2 + $0x2f8] sm:$0xff] }
 0x14c   : > { %3215 = vmatpush1.bf16.msra.mxu0 %v3214_v57  ;;  %v636_v57 = vld [vmem:[#allocation2 + $0x1e0] sm:$0xff] }
 0x14d   : > { %3217 = vmatprep.subr.bf16.mxu0 %v3216_v58  ;;  %v638_v58 = vld [vmem:[#allocation2 + $0x1f0] sm:$0xff] }
 0x14e   : > { %v3246_v61 = vpack.c.bf16 %v638_v58, %v636_v57  ;;  %v666_v57 = vld [vmem:[#allocation2 + $0x2d0] sm:$0xff]  ;;  %v669_v58 = vld [vmem:[#allocation2 + $0x2e8] sm:$0xff] }
 0x150   : > { %3219 = vmatpush1.bf16.msra.mxu0 %v3218_v63  ;;  %v640_v63 = vld [vmem:[#allocation2 + $0x200] sm:$0xff] }
 0x151   : > { %3221 = vmatprep.subr.bf16.mxu0 %v3220_v0  ;;  %v642_v0 = vld [vmem:[#allocation2 + $0x210] sm:$0xff] }
 0x152   : > { %v3250_v4 = vpack.c.bf16 %v642_v0, %v640_v63  ;;  %v670_v63 = vld [vmem:[#allocation2 + $0x2f0] sm:$0xff]  ;;  %v673_v0 = vld [vmem:[#allocation2 + $0x308] sm:$0xff] }
 0x154   : > { %3223 = vmatpush1.bf16.msra.mxu0 %v3222_v8  ;;  %v646_v8 = vld [vmem:[#allocation2 + $0x230] sm:$0xff] }
 0x155   : > { %3225 = vmatprep.subr.bf16.mxu0 %v3224_v9  ;;  %v533_v9 = vsel %vm528_vm0, %v530_v46, %v532_v1  ;;  %v3254_v13 = vpack.c.bf16 %v646_v8, %v644_v6  ;;  %v675_v1 = vld [vmem:[#allocation2 + $0x318] sm:$0xff]  ;;  %v677_v6 = vld [vmem:[#allocation2 + $0x328] sm:$0xff] }
 0x156   : > { %v3280_v3 = vpack.c.bf16 %v675_v1, %v673_v0  ;;  %v679_v8 = vld [vmem:[#allocation2 + $0x338] sm:$0xff] }
 0x157   : > { %v707_v0 = vld [vmem:[#allocation2 + $0x418] sm:$0xff] }
 0x158   : > { %3227 = vmatpush1.bf16.msra.mxu0 %v3226_v15  ;;  %v3256_v15 = vpack.c.bf16 %v651_v12, %v649_v11  ;;  %v676_v11 = vld [vmem:[#allocation2 + $0x320] sm:$0xff]  ;;  %v678_v12 = vld [vmem:[#allocation2 + $0x330] sm:$0xff] }
 0x159   : > { %3229 = vmatprep.subr.bf16.mxu0 %v3228_v17  ;;  %v650_v17 = vld [vmem:[#allocation2 + $0x250] sm:$0xff] }
 0x15a   : > { %v3258_v46 = vpack.c.bf16 %v650_v17, %v648_v16  ;;  %v3286_v16 = vpack.c.bf16 %v678_v12, %v676_v11  ;;  %v710_v11 = vld [vmem:[#allocation2 + $0x430] sm:$0xff]  ;;  %v557_v12 = vsel %vm552_vm3, %v554_v31, %v556_v24  ;;  %v716_v24 = vld [vmem:[#allocation2 + $0x460] sm:$0xff] }
 0x15c   : > { %3231 = vmatpush1.bf16.msra.mxu0 %v3230_v28  ;;  %v654_v28 = vld [vmem:[#allocation2 + $0x270] sm:$0xff] }
 0x15d   : > { %3233 = vmatprep.subr.bf16.mxu0 %v3232_v30  ;;  %v553_v30 = vrot.slane %v4863_v41, 3  ;;  %v3262_v37 = vpack.c.bf16 %v654_v28, %v652_v22  ;;  %v684_v28 = vld [vmem:[#allocation2 + $0x360] sm:$0xff] }
 0x15f   : > { %v555_v44 = vsel %vm552_vm3, %v553_v30, %v554_v31  ;;  %v686_v30 = vld [vmem:[#allocation2 + $0x370] sm:$0xff] }
 0x160   : > { %3235 = vmatpush1.bf16.msra.mxu0 %v3234_v39  ;;  %v3264_v39 = vpack.c.bf16 %v659_v36, %v657_v32  ;;  %v689_v32 = vld [vmem:[#allocation2 + $0x388] sm:$0xff]  ;;  %v691_v36 = vld [vmem:[#allocation2 + $0x398] sm:$0xff]  ;;  %v718_v31 = vld [vmem:[#allocation2 + $0x470] sm:$0xff] }
 0x161   : > { %3237 = vmatprep.subr.bf16.mxu0 %v3236_v40  ;;  %v656_v40 = vld [vmem:[#allocation2 + $0x280] sm:$0xff] }
 0x164   : > { %3239 = vmatpush1.bf16.msra.mxu0 %v3238_v48  ;;  %v3268_v48 = vpack.c.bf16 %v663_v47, %v661_v45  ;;  %v695_v45 = vld [vmem:[#allocation2 + $0x3b8] sm:$0xff] }
 0x165   : > { %3241 = vmatprep.subr.bf16.mxu0 %v3240_v49  ;;  %v660_v49 = vld [vmem:[#allocation2 + $0x2a0] sm:$0xff] }
 0x166   : > { %v3270_v53 = vpack.c.bf16 %v662_v50, %v660_v49  ;;  %v694_v49 = vld [vmem:[#allocation2 + $0x3b0] sm:$0xff]  ;;  %v697_v50 = vld [vmem:[#allocation2 + $0x3c8] sm:$0xff] }
 0x168   : > { %3243 = vmatpush1.bf16.msra.mxu0 %v3242_v55  ;;  %v3272_v55 = vpack.c.bf16 %v667_v52, %v665_v51  ;;  %v699_v51 = vld [vmem:[#allocation2 + $0x3d8] sm:$0xff] }
 0x169   : > { %3245 = vmatprep.subr.bf16.mxu0 %v3244_v56  ;;  %v664_v56 = vld [vmem:[#allocation2 + $0x2c0] sm:$0xff] }
 0x16a   : > { %v3274_v60 = vpack.c.bf16 %v666_v57, %v664_v56  ;;  %v698_v56 = vld [vmem:[#allocation2 + $0x3d0] sm:$0xff]  ;;  %v701_v57 = vld [vmem:[#allocation2 + $0x3e8] sm:$0xff] }
 0x16c   : > { %3247 = vmatpush1.bf16.msra.mxu0 %v3246_v61  ;;  %v3276_v61 = vpack.c.bf16 %v671_v59, %v669_v58  ;;  %v703_v58 = vld [vmem:[#allocation2 + $0x3f8] sm:$0xff] }
 0x16d   : > { %3249 = vmatprep.subr.bf16.mxu0 %v3248_v62  ;;  %v668_v62 = vld [vmem:[#allocation2 + $0x2e0] sm:$0xff] }
 0x16e   : > { %v3278_v2 = vpack.c.bf16 %v670_v63, %v668_v62  ;;  %v702_v62 = vld [vmem:[#allocation2 + $0x3f0] sm:$0xff]  ;;  %v705_v63 = vld [vmem:[#allocation2 + $0x408] sm:$0xff] }
 0x16f   : > { %813 = vmatmul.mubr.f32.vlgmr.msra.gmra.mrb[0].mxu0 %v4863_v41  ;;  %v3266_v41 = vpack.c.bf16 %v658_v43, %v656_v40  ;;  %v688_v40 = vld [vmem:[#allocation2 + $0x380] sm:$0xff]  ;;  %v690_v43 = vld [vmem:[#allocation2 + $0x390] sm:$0xff] }
 0x170   : > { %3251 = vmatpush1.bf16.msra.mxu0 %v3250_v4  ;;  %818 = vmatprep.mubr.f32.mxu0 %v533_v9  ;;  %v672_v4 = vld [vmem:[#allocation2 + $0x300] sm:$0xff]  ;;  %v3298_v47 = vpack.c.bf16 %v690_v43, %v688_v40  ;;  %v726_v40 = vld [vmem:[#allocation2 + $0x4b0] sm:$0xff]  ;;  %v729_v43 = vld [vmem:[#allocation2 + $0x4c8] sm:$0xff] }
 0x171   : > { %3253 = vmatprep.subr.bf16.mxu0 %v3252_v5  ;;  %v674_v5 = vld [vmem:[#allocation2 + $0x310] sm:$0xff] }
 0x172   : > { %v3282_v9 = vpack.c.bf16 %v674_v5, %v672_v4  ;;  %v706_v4 = vld [vmem:[#allocation2 + $0x410] sm:$0xff]  ;;  %v709_v5 = vld [vmem:[#allocation2 + $0x428] sm:$0xff] }
 0x173   : > { %819 = vmatmul.mubr.f32.gmra.mrb[2].mxu0 %v4866_v42 }
 0x174   : > { %3255 = vmatpush1.bf16.msra.mxu0 %v3254_v13  ;;  %824 = vmatprep.mubr.f32.mxu0 %v535_v18  ;;  %v681_v13 = vld [vmem:[#allocation2 + $0x348] sm:$0xff]  ;;  %v680_v18 = vld [vmem:[#allocation2 + $0x340] sm:$0xff] }
 0x175   : > { %3257 = vmatprep.subr.bf16.mxu0 %v3256_v15  ;;  %v683_v15 = vld [vmem:[#allocation2 + $0x358] sm:$0xff] }
 0x176   : > { %v3288_v17 = vpack.c.bf16 %v683_v15, %v681_v13  ;;  %v713_v13 = vld [vmem:[#allocation2 + $0x448] sm:$0xff]  ;;  %v715_v15 = vld [vmem:[#allocation2 + $0x458] sm:$0xff] }
 0x177   : > { %825 = vmatmul.mubr.f32.gmra.mrb[4].mxu0 %v4884_v14 }
 0x178   : > { %3259 = vmatpush1.bf16.msra.mxu0 %v3258_v46  ;;  %830 = vmatprep.mubr.f32.mxu0 %v534_v10  ;;  %v3284_v10 = vpack.c.bf16 %v679_v8, %v677_v6  ;;  %v687_v46 = vld [vmem:[#allocation2 + $0x378] sm:$0xff] }
 0x179   : > { %3261 = vmatprep.subr.bf16.mxu0 %v3260_v21  ;;  %v3290_v21 = vpack.c.bf16 %v682_v19, %v680_v18  ;;  %v3292_v22 = vpack.c.bf16 %v687_v46, %v685_v20  ;;  %v711_v6 = vld [vmem:[#allocation2 + $0x438] sm:$0xff]  ;;  %v712_v18 = vld [vmem:[#allocation2 + $0x440] sm:$0xff]  ;;  %v714_v19 = vld [vmem:[#allocation2 + $0x450] sm:$0xff] }
 0x17a   : > { %v717_v20 = vld [vmem:[#allocation2 + $0x468] sm:$0xff]  ;;  %v719_v46 = vld [vmem:[#allocation2 + $0x478] sm:$0xff]  ;;  %v3322_v14 = vpack.c.bf16 %v714_v19, %v712_v18 }
 0x17b   : > { %831 = vmatmul.mubr.f32.gmra.mrb[6].mxu0 %v4889_v23  ;;  %v3324_v42 = vpack.c.bf16 %v719_v46, %v717_v20  ;;  %v1190_v23 = vld [vmem:[#allocation7 + $0x40] sm:$0xff]  ;;  %v1205_v18 = vld [vmem:[#allocation7 + $0xb8] sm:$0xff] }
 0x17c   : > { %3263 = vmatpush1.bf16.msra.mxu0 %v3262_v37  ;;  %901 = vmatprep.mubr.f32.mxu0 %v555_v44  ;;  %v3294_v37 = vpack.c.bf16 %v686_v30, %v684_v28  ;;  %v693_v44 = vld [vmem:[#allocation2 + $0x3a8] sm:$0xff]  ;;  %v722_v30 = vld [vmem:[#allocation2 + $0x490] sm:$0xff] }
 0x17d   : > { %3265 = vmatprep.subr.bf16.mxu0 %v3264_v39  ;;  %v3296_v39 = vpack.c.bf16 %v691_v36, %v689_v32  ;;  %v725_v32 = vld [vmem:[#allocation2 + $0x4a8] sm:$0xff]  ;;  %v727_v36 = vld [vmem:[#allocation2 + $0x4b8] sm:$0xff] }
 0x17e   : > { %v1202_v46 = vld [vmem:[#allocation7 + $0xa0] sm:$0xff] }
 0x180   : > { %3267 = vmatpush1.bf16.msra.mxu0 %v3266_v41  ;;  %v3300_v41 = vpack.c.bf16 %v695_v45, %v693_v44 }
 0x181   : > { %3269 = vmatprep.subr.bf16.mxu0 %v3268_v48  ;;  %v692_v48 = vld [vmem:[#allocation2 + $0x3a0] sm:$0xff] }
 0x182   : > { %v3302_v52 = vpack.c.bf16 %v694_v49, %v692_v48  ;;  %v733_v48 = vld [vmem:[#allocation2 + $0x4e8] sm:$0xff]  ;;  %v735_v49 = vld [vmem:[#allocation2 + $0x4f8] sm:$0xff] }
 0x184   : > { %3271 = vmatpush1.bf16.msra.mxu0 %v3270_v53  ;;  %v3304_v53 = vpack.c.bf16 %v699_v51, %v697_v50  ;;  %v3340_v50 = vpack.c.bf16 %v735_v49, %v733_v48  ;;  %v732_v51 = vld [vmem:[#allocation2 + $0x4e0] sm:$0xff] }
 0x185   : > { %3273 = vmatprep.subr.bf16.mxu0 %v3272_v55  ;;  %v696_v55 = vld [vmem:[#allocation2 + $0x3c0] sm:$0xff] }
 0x186   : > { %v3306_v59 = vpack.c.bf16 %v698_v56, %v696_v55  ;;  %v1183_v55 = vld [vmem:[#allocation7 + $0x8] sm:$0xff]  ;;  %v1185_v56 = vld [vmem:[#allocation7 + $0x18] sm:$0xff]  ;;  %v1218_v49 = vld [vmem:[#allocation7 + $0x120] sm:$0xff] }
 0x188   : > { %3275 = vmatpush1.bf16.msra.mxu0 %v3274_v60  ;;  %v3308_v60 = vpack.c.bf16 %v703_v58, %v701_v57  ;;  %v1182_v57 = vld [vmem:[#allocation7] sm:$0xff]  ;;  %v3344_v58 = vpack.c.bf16 %v1185_v56, %v1183_v55  ;;  %v1224_v56 = vld [vmem:[#allocation7 + $0x150] sm:$0xff] }
 0x189   : > { %3277 = vmatprep.subr.bf16.mxu0 %v3276_v61  ;;  %v700_v61 = vld [vmem:[#allocation2 + $0x3e0] sm:$0xff] }
 0x18a   : > { %v3310_v1 = vpack.c.bf16 %v702_v62, %v700_v61  ;;  %3345 = vmatprep.subr.bf16.mxu1 %v3344_v58  ;;  %v1222_v55 = vld [vmem:[#allocation7 + $0x140] sm:$0xff]  ;;  %v1229_v58 = vld [vmem:[#allocation7 + $0x178] sm:$0xff] }
 0x18c   : > { %3279 = vmatpush1.bf16.msra.mxu0 %v3278_v2  ;;  %v3312_v2 = vpack.c.bf16 %v707_v0, %v705_v63  ;;  %v1186_v63 = vld [vmem:[#allocation7 + $0x20] sm:$0xff]  ;;  %v1191_v0 = vld [vmem:[#allocation7 + $0x48] sm:$0xff] }
 0x18d   : > { %3281 = vmatprep.subr.bf16.mxu0 %v3280_v3  ;;  %v704_v3 = vld [vmem:[#allocation2 + $0x400] sm:$0xff] }
 0x18e   : > { %v3314_v8 = vpack.c.bf16 %v706_v4, %v704_v3  ;;  %v1195_v3 = vld [vmem:[#allocation7 + $0x68] sm:$0xff]  ;;  %v1197_v4 = vld [vmem:[#allocation7 + $0x78] sm:$0xff] }
 0x190   : > { %3283 = vmatpush1.bf16.msra.mxu0 %v3282_v9  ;;  %v3316_v9 = vpack.c.bf16 %v711_v6, %v709_v5  ;;  %v3356_v6 = vpack.c.bf16 %v1197_v4, %v1195_v3  ;;  %v736_v4 = vld [vmem:[#allocation5] sm:$0x3] }
 0x191   : > { %3285 = vmatprep.subr.bf16.mxu0 %v3284_v10  ;;  %v708_v10 = vld [vmem:[#allocation2 + $0x420] sm:$0xff] }
 0x194   : > { %3287 = vmatpush1.bf16.msra.mxu0 %v3286_v16  ;;  %v3318_v16 = vpack.c.bf16 %v710_v11, %v708_v10  ;;  %v1199_v10 = vld [vmem:[#allocation7 + $0x88] sm:$0xff]  ;;  %v1201_v11 = vld [vmem:[#allocation7 + $0x98] sm:$0xff] }
 0x195   : > { %3289 = vmatprep.subr.bf16.mxu0 %v3288_v17  ;;  %v3320_v17 = vpack.c.bf16 %v715_v15, %v713_v13  ;;  %v3360_v13 = vpack.c.bf16 %v1201_v11, %v1199_v10  ;;  %v1198_v15 = vld [vmem:[#allocation7 + $0x80] sm:$0xff]  ;;  %v1236_v11 = vld [vmem:[#allocation7 + $0x1b0] sm:$0xff] }
 0x196   : > { %v1234_v10 = vld [vmem:[#allocation7 + $0x1a0] sm:$0xff] }
 0x198   : > { %3291 = vmatpush1.bf16.msra.mxu0 %v3290_v21  ;;  %v723_v21 = vld [vmem:[#allocation2 + $0x498] sm:$0xff] }
 0x199   : > { %3293 = vmatprep.subr.bf16.mxu0 %v3292_v22  ;;  %v3326_v22 = vpack.c.bf16 %v718_v31, %v716_v24  ;;  %v1209_v24 = vld [vmem:[#allocation7 + $0xd8] sm:$0xff] }
 0x19c   : > { %3295 = vmatpush1.bf16.msra.mxu0 %v3294_v37  ;;  %v4492_v37 = vmov 0.0  }
 0x19d   : > { %3297 = vmatprep.subr.bf16.mxu0 %v3296_v39  ;;  %v724_v39 = vld [vmem:[#allocation2 + $0x4a0] sm:$0xff] }
 0x19e   : > { %v3334_v44 = vpack.c.bf16 %v726_v40, %v724_v39  ;;  %v1217_v39 = vld [vmem:[#allocation7 + $0x118] sm:$0xff] }
 0x1a0   : > { %3299 = vmatpush1.bf16.msra.mxu0 %v3298_v47  ;;  %v728_v47 = vld [vmem:[#allocation2 + $0x4c0] sm:$0xff] }
 0x1a1   : > { %3301 = vmatprep.subr.bf16.mxu0 %v3300_v41  ;;  %v730_v41 = vld [vmem:[#allocation2 + $0x4d0] sm:$0xff] }
 0x1a4   : > { %3303 = vmatpush1.bf16.msra.mxu0 %v3302_v52  ;;  %v734_v52 = vld [vmem:[#allocation2 + $0x4f0] sm:$0xff] }
 0x1a5   : > { %3305 = vmatprep.subr.bf16.mxu0 %v3304_v53  ;;  %v3342_v53 = vpack.c.bf16 %v734_v52, %v732_v51  ;;  %v1225_v51 = vld [vmem:[#allocation7 + $0x158] sm:$0xff] }
 0x1a8   : > { %3307 = vmatpush1.bf16.msra.mxu0 %v3306_v59  ;;  %v1184_v59 = vld [vmem:[#allocation7 + $0x10] sm:$0xff] }
 0x1a9   : > { %3309 = vmatprep.subr.bf16.mxu0 %v3308_v60  ;;  %v1187_v60 = vld [vmem:[#allocation7 + $0x28] sm:$0xff]  ;;  %v3346_v61 = vpack.c.bf16 %v1184_v59, %v1182_v57  ;;  %v3386_v59 = vpack.c.bf16 %v1224_v56, %v1222_v55 }
 0x1aa   : > { %v1227_v57 = vld [vmem:[#allocation7 + $0x168] sm:$0xff] }
 0x1ab   : > { %3347 = vmatpush1.bf16.msra.mxu1 %v3346_v61  ;;  %v1228_v61 = vld [vmem:[#allocation7 + $0x170] sm:$0xff] }
 0x1ac   : > { %3311 = vmatpush1.bf16.msra.mxu0 %v3310_v1  ;;  %v1193_v1 = vld [vmem:[#allocation7 + $0x58] sm:$0xff] }
 0x1ad   : > { %3313 = vmatprep.subr.bf16.mxu0 %v3312_v2  ;;  %v3352_v2 = vpack.c.bf16 %v1193_v1, %v1191_v0  ;;  %v1230_v1 = vld [vmem:[#allocation7 + $0x180] sm:$0xff] }
 0x1af   : > { %902 = vmatmul.mubr.f32.vlgmr.msra.gmra.mrb[0].mxu0 %v4876_v54  ;;  %v721_v54 = vld [vmem:[#allocation2 + $0x488] sm:$0xff] }
 0x1b0   : > { %3315 = vmatpush1.bf16.msra.mxu0 %v3314_v8  ;;  %907 = vmatprep.mubr.f32.mxu0 %v557_v12  ;;  %v3328_v28 = vpack.c.bf16 %v723_v21, %v721_v54  ;;  %v1194_v8 = vld [vmem:[#allocation7 + $0x60] sm:$0xff] }
 0x1b1   : > { %3317 = vmatprep.subr.bf16.mxu0 %v3316_v9  ;;  %v1196_v9 = vld [vmem:[#allocation7 + $0x70] sm:$0xff]  ;;  %v1206_v21 = vld [vmem:[#allocation7 + $0xc0] sm:$0xff] }
 0x1b2   : > { %v3358_v12 = vpack.c.bf16 %v1196_v9, %v1194_v8  ;;  %v1237_v8 = vld [vmem:[#allocation7 + $0x1b8] sm:$0xff] }
 0x1b3   : > { %908 = vmatmul.mubr.f32.gmra.mrb[2].mxu0 %v4893_v25  ;;  %v720_v25 = vld [vmem:[#allocation2 + $0x480] sm:$0xff] }
 0x1b4   : > { %3319 = vmatpush1.bf16.msra.mxu0 %v3318_v16  ;;  %913 = vmatprep.mubr.f32.mxu0 %v4905_v33  ;;  %v3330_v33 = vpack.c.bf16 %v722_v30, %v720_v25  ;;  %v1200_v16 = vld [vmem:[#allocation7 + $0x90] sm:$0xff]  ;;  %v1213_v25 = vld [vmem:[#allocation7 + $0xf8] sm:$0xff] }
 0x1b5   : > { %3321 = vmatprep.subr.bf16.mxu0 %v3320_v17  ;;  %v1203_v17 = vld [vmem:[#allocation7 + $0xa8] sm:$0xff]  ;;  %v3362_v19 = vpack.c.bf16 %v1200_v16, %v1198_v15 }
 0x1b6   : > { %v3364_v20 = vpack.c.bf16 %v1205_v18, %v1203_v17  ;;  %v1239_v16 = vld [vmem:[#allocation7 + $0x1c8] sm:$0xff]  ;;  %v1241_v17 = vld [vmem:[#allocation7 + $0x1d8] sm:$0xff] }
 0x1b7   : > { %914 = vmatmul.mubr.f32.gmra.mrb[4].mxu0 %v4910_v34  ;;  %v3332_v34 = vpack.c.bf16 %v727_v36, %v725_v32  ;;  %v1210_v36 = vld [vmem:[#allocation7 + $0xe0] sm:$0xff]  ;;  %v3400_v18 = vpack.c.bf16 %v1241_v17, %v1239_v16 }
 0x1b8   : > { %3323 = vmatpush1.bf16.msra.mxu0 %v3322_v14  ;;  %919 = vmatprep.mubr.f32.mxu0 %v558_v26  ;;  %v731_v26 = vld [vmem:[#allocation2 + $0x4d8] sm:$0xff] }
 0x1b9   : > { %3325 = vmatprep.subr.bf16.mxu0 %v3324_v42  ;;  %v3336_v45 = vpack.c.bf16 %v731_v26, %v729_v43  ;;  %v1204_v14 = vld [vmem:[#allocation7 + $0xb0] sm:$0xff]  ;;  %v1207_v42 = vld [vmem:[#allocation7 + $0xc8] sm:$0xff]  ;;  %v1214_v26 = vld [vmem:[#allocation7 + $0x100] sm:$0xff] }
 0x1ba   : > { %v3366_v31 = vpack.c.bf16 %v1204_v14, %v1202_v46  ;;  %v3368_v54 = vpack.c.bf16 %v1209_v24, %v1207_v42 }
 0x1bb   : > { %920 = vmatmul.mubr.f32.gmra.mrb[6].mxu0 %v546_v27  ;;  %v3338_v27 = vpack.c.bf16 %v730_v41, %v728_v47  ;;  %v1221_v47 = vld [vmem:[#allocation7 + $0x138] sm:$0xff] }
 0x1bc   : > { %3327 = vmatpush1.bf16.msra.mxu0 %v3326_v22  ;;  %990 = vmatprep.mubr.f32.mxu0 %v4492_v37  ;;  %v1208_v22 = vld [vmem:[#allocation7 + $0xd0] sm:$0xff] }
 0x1bd   : > { %3329 = vmatprep.subr.bf16.mxu0 %v3328_v28  ;;  %v1211_v28 = vld [vmem:[#allocation7 + $0xe8] sm:$0xff]  ;;  %v3370_v30 = vpack.c.bf16 %v1208_v22, %v1206_v21  ;;  %v1245_v21 = vld [vmem:[#allocation7 + $0x1f8] sm:$0xff] }
 0x1be   : > { %v3372_v32 = vpack.c.bf16 %v1213_v25, %v1211_v28  ;;  %v1242_v25 = vld [vmem:[#allocation7 + $0x1e0] sm:$0xff] }
 0x1c0   : > { %3331 = vmatpush1.bf16.msra.mxu0 %v3330_v33  ;;  %v1212_v33 = vld [vmem:[#allocation7 + $0xf0] sm:$0xff] }
 0x1c1   : > { %3333 = vmatprep.subr.bf16.mxu0 %v3332_v34  ;;  %v1215_v34 = vld [vmem:[#allocation7 + $0x108] sm:$0xff]  ;;  %v3374_v40 = vpack.c.bf16 %v1212_v33, %v1210_v36 }
 0x1c2   : > { %v3376_v43 = vpack.c.bf16 %v1217_v39, %v1215_v34 }
 0x1c4   : > { %3335 = vmatpush1.bf16.msra.mxu0 %v3334_v44  ;;  %v1216_v44 = vld [vmem:[#allocation7 + $0x110] sm:$0xff] }
 0x1c5   : > { %3337 = vmatprep.subr.bf16.mxu0 %v3336_v45  ;;  %v1219_v45 = vld [vmem:[#allocation7 + $0x128] sm:$0xff]  ;;  %v3378_v41 = vpack.c.bf16 %v1216_v44, %v1214_v26  ;;  %v1249_v44 = vld [vmem:[#allocation7 + $0x218] sm:$0xff] }
 0x1c6   : > { %v3380_v48 = vpack.c.bf16 %v1221_v47, %v1219_v45  ;;  %v1247_v26 = vld [vmem:[#allocation7 + $0x208] sm:$0xff] }
 0x1c7   : > { %v3408_v47 = vpack.c.bf16 %v1249_v44, %v1247_v26  ;;  %v1250_v26 = vld [vmem:[#allocation7 + $0x220] sm:$0xff]  ;;  %v1252_v44 = vld [vmem:[#allocation7 + $0x230] sm:$0xff] }
 0x1c8   : > { %3339 = vmatpush1.bf16.msra.mxu0 %v3338_v27  ;;  %v1220_v27 = vld [vmem:[#allocation7 + $0x130] sm:$0xff] }
 0x1c9   : > { %3341 = vmatprep.subr.bf16.mxu0 %v3340_v50  ;;  %v1223_v50 = vld [vmem:[#allocation7 + $0x148] sm:$0xff]  ;;  %v3382_v52 = vpack.c.bf16 %v1220_v27, %v1218_v49 }
 0x1cc   : > { %3343 = vmatpush1.bf16.msra.mxu0 %v3342_v53  ;;  %v3384_v53 = vpack.c.bf16 %v1225_v51, %v1223_v50 }
 0x1cf   : > { %991 = vmatmul.mubr.f32.vlgmr.msra.gmra.mrb[0].mxu0 %v4881_v7  ;;  %v1189_v7 = vld [vmem:[#allocation7 + $0x38] sm:$0xff] }
 0x1d0   : > { %996 = vmatprep.mubr.f32.mxu0 %v4492_v37  ;;  %v3348_v62 = vpack.c.bf16 %v1189_v7, %v1187_v60  ;;  %v3388_v60 = vpack.c.bf16 %v1229_v58, %v1227_v57  ;;  %v1226_v7 = vld [vmem:[#allocation7 + $0x160] sm:$0xff] }
 0x1d2   : > { %3349 = vmatprep.subr.bf16.mxu1 %v3348_v62  ;;  %v1231_v62 = vld [vmem:[#allocation7 + $0x188] sm:$0xff] }
 0x1d3   : > { %997 = vmatmul.mubr.f32.gmra.mrb[2].mxu0 %v4898_v29  ;;  %v1188_v29 = vld [vmem:[#allocation7 + $0x30] sm:$0xff] }
 0x1d4   : > { %1002 = vmatprep.mubr.f32.mxu0 %v4492_v37 }
 0x1d7   : > { %1003 = vmatmul.mubr.f32.gmra.mrb[4].mxu0 %v4916_v38  ;;  %v3350_v38 = vpack.c.bf16 %v1188_v29, %v1186_v63  ;;  %v1233_v63 = vld [vmem:[#allocation7 + $0x198] sm:$0xff]  ;;  %v3390_v29 = vpack.c.bf16 %v1228_v61, %v1226_v7 }
 0x1d8   : > { %1008 = vmatprep.mubr.f32.mxu0 %v4492_v37  ;;  %v3392_v0 = vpack.c.bf16 %v1233_v63, %v1231_v62 }
 0x1d9   : > { %3351 = vmatpush1.bf16.msra.mxu1 %v3350_v38  ;;  %v1232_v38 = vld [vmem:[#allocation7 + $0x190] sm:$0xff] }
 0x1da   : > { %3353 = vmatprep.subr.bf16.mxu1 %v3352_v2  ;;  %v3394_v2 = vpack.c.bf16 %v1232_v38, %v1230_v1 }
 0x1db   : > { %1009 = vmatmul.mubr.f32.gmra.mrb[6].mxu0 %v570_v35  ;;  %v1192_v35 = vld [vmem:[#allocation7 + $0x50] sm:$0xff] }
 0x1dc   : > { %v3354_v5 = vpack.c.bf16 %v1192_v35, %v1190_v23  ;;  %v738_v23 = vlaneseq }
 0x1de   : > { %3355 = vmatpush1.bf16.msra.mxu1 %v3354_v5  ;;  %v4955_v35 = vshrl.u32 %v738_v23, 7 }
 0x1df   : > { %3357 = vmatprep.subr.bf16.mxu1 %v3356_v6  ;;  %v1235_v6 = vld [vmem:[#allocation7 + $0x1a8] sm:$0xff] }
 0x1e0   : > { %v740_v3 = vsub.s32 0, %v4955_v35  ;;  %v744_v5 = vsub.s32 1, %v4955_v35  ;;  %v3396_v9 = vpack.c.bf16 %v1237_v8, %v1235_v6 }
 0x1e2   : > { %3359 = vmatpush1.bf16.msra.mxu1 %v3358_v12  ;;  %v3398_v12 = vpack.c.bf16 %v1236_v11, %v1234_v10  ;;  %v745_v15 = vrot.slane %v736_v4, %v744_v5 }
 0x1e3   : > { %3361 = vmatprep.subr.bf16.mxu1 %v3360_v13  ;;  %v741_v13 = vrot.slane %v736_v4, %v740_v3 }
 0x1e6   : > { %3363 = vmatpush1.bf16.msra.mxu1 %v3362_v19  ;;  %v1238_v19 = vld [vmem:[#allocation7 + $0x1c0] sm:$0xff] }
 0x1e7   : > { %3365 = vmatprep.subr.bf16.mxu1 %v3364_v20  ;;  %v1240_v20 = vld [vmem:[#allocation7 + $0x1d0] sm:$0xff] }
 0x1e8   : > { %v3402_v14 = vpack.c.bf16 %v1240_v20, %v1238_v19 }
 0x1ea   : > { %3367 = vmatpush1.bf16.msra.mxu1 %v3366_v31 }
 0x1eb   : > { %3369 = vmatprep.subr.bf16.mxu1 %v3368_v54  ;;  %v1243_v54 = vld [vmem:[#allocation7 + $0x1e8] sm:$0xff] }
 0x1ec   : > { %v3404_v28 = vpack.c.bf16 %v1245_v21, %v1243_v54  ;;  %v1253_v54 = vld [vmem:[#allocation7 + $0x238] sm:$0xff] }
 0x1ee   : > { %3371 = vmatpush1.bf16.msra.mxu1 %v3370_v30  ;;  %v1244_v30 = vld [vmem:[#allocation7 + $0x1f0] sm:$0xff] }
 0x1ef   : > { %3373 = vmatprep.subr.bf16.mxu1 %v3372_v32  ;;  %v3406_v33 = vpack.c.bf16 %v1244_v30, %v1242_v25 }
 0x1f2   : > { %3375 = vmatpush1.bf16.msra.mxu1 %v3374_v40 }
 0x1f3   : > { %3377 = vmatprep.subr.bf16.mxu1 %v3376_v43 }
 0x1f6   : > { %3379 = vmatpush1.bf16.msra.mxu1 %v3378_v41 }
 0x1f7   : > { %3381 = vmatprep.subr.bf16.mxu1 %v3380_v48 }
 0x1fa   : > { %3383 = vmatpush1.bf16.msra.mxu1 %v3382_v52 }
 0x1fb   : > { %3385 = vmatprep.subr.bf16.mxu1 %v3384_v53 }
 0x1fe   : > { %3387 = vmatpush1.bf16.msra.mxu1 %v3386_v59 }
 0x1ff   : > { %3389 = vmatprep.subr.bf16.mxu1 %v3388_v60 }
 0x202   : > { %3391 = vmatpush1.bf16.msra.mxu1 %v3390_v29 }
 0x203   : > { %3393 = vmatprep.subr.bf16.mxu1 %v3392_v0 }
 0x206   : > { %3395 = vmatpush1.bf16.msra.mxu1 %v3394_v2 }
 0x207   : > { %3397 = vmatprep.subr.bf16.mxu1 %v3396_v9 }
 0x20a   : > { %3399 = vmatpush1.bf16.msra.mxu1 %v3398_v12 }
 0x20b   : > { %3401 = vmatprep.subr.bf16.mxu1 %v3400_v18 }
 0x20e   : > { %3403 = vmatpush1.bf16.msra.mxu1 %v3402_v14 }
 0x20f   : > { %3405 = vmatprep.subr.bf16.mxu1 %v3404_v28 }
 0x212   : > { %3407 = vmatpush1.bf16.msra.mxu1 %v3406_v33 }
 0x213   : > { %3409 = vmatprep.subr.bf16.mxu1 %v3408_v47 }
 0x2a2   : > { %v992_v46 = vpop.f32.mrb[0].mxu0 }
 0x2a3   : > { %v3872_v42 = vadd.f32 %v992_v46, %v741_v13  ;;  %v994_v24 = vpop.f32.mrb[1].mxu0 }
 0x2a4   : > { %v3873_v31 = vadd.f32 %v994_v24, %v745_v15 }
 0x2a5   : > { %v1015_v22 = vmax.f32 %v3872_v42, 0.0 }
 0x2a6   : > { %v1016_v32 = vmax.f32 %v3873_v31, 0.0  ;;  %v998_v36 = vpop.f32.mrb[2].mxu0  ;;  %v1251_v31 = vld [vmem:[#allocation7 + $0x228] sm:$0xff] }
 0x2a7   : > { %v3874_v34 = vadd.f32 %v998_v36, %v741_v13  ;;  %v1000_v39 = vpop.f32.mrb[3].mxu0 }
 0x2a8   : > { %v3875_v40 = vadd.f32 %v1000_v39, %v745_v15  ;;  %v4075_v43 = vpack.i.bf16 %v1016_v32, %v1015_v22 }
 0x2a9   : > { %v1017_v45 = vmax.f32 %v3874_v34, 0.0 }
 0x2aa   : > { %v1018_v41 = vmax.f32 %v3875_v40, 0.0  ;;  %v1004_v48 = vpop.f32.mrb[4].mxu0  ;;  %4076 = vrot.lane.b32.xlu0 %v4075_v43, %s4493_s17  ;;  %v3412_v43 = vpack.c.bf16 %v1253_v54, %v1251_v31 }
 0x2ab   : > { %v3876_v49 = vadd.f32 %v1004_v48, %v741_v13  ;;  %v1006_v27 = vpop.f32.mrb[5].mxu0  ;;  %v1257_v48 = vld [vmem:[#allocation7 + $0x258] sm:$0xff] }
 0x2ac   : > { %v4080_v50 = vpack.i.bf16 %v1018_v41, %v1017_v45  ;;  %v3877_v51 = vadd.f32 %v1006_v27, %v745_v15 }
 0x2ad   : > { %v1019_v52 = vmax.f32 %v3876_v49, 0.0 }
 0x2ae   : > { %v1020_v53 = vmax.f32 %v3877_v51, 0.0  ;;  %v1010_v55 = vpop.f32.mrb[6].mxu0  ;;  %4081 = vrot.lane.b32.xlu0 %v4080_v50, %s4493_s17 }
 0x2af   : > { %v3878_v56 = vadd.f32 %v1010_v55, %v741_v13  ;;  %v1012_v57 = vpop.f32.mrb[7].mxu0  ;;  %v1246_v13 = vld [vmem:[#allocation7 + $0x200] sm:$0xff]  ;;  %v3414_v55 = vpack.c.bf16 %v1252_v44, %v1250_v26 }
 0x2b0   : > { %v3879_v58 = vadd.f32 %v1012_v57, %v745_v15  ;;  %v4085_v59 = vpack.i.bf16 %v1020_v53, %v1019_v52  ;;  %v1248_v15 = vld [vmem:[#allocation7 + $0x210] sm:$0xff]  ;;  %v1274_v44 = vld [vmem:[#allocation7 + $0x2e0] sm:$0xff] }
 0x2b1   : > { %v1021_v60 = vmax.f32 %v3878_v56, 0.0  ;;  %v3410_v24 = vpack.c.bf16 %v1248_v15, %v1246_v13 }
 0x2b2   : > { %v1022_v7 = vmax.f32 %v3879_v58, 0.0  ;;  %4086 = vrot.lane.b32.xlu1 %v4085_v59, %s4493_s17  ;;  %v1254_v59 = vld [vmem:[#allocation7 + $0x240] sm:$0xff] }
 0x2b4   : > { %v4090_v61 = vpack.i.bf16 %v1022_v7, %v1021_v60 }
 0x2b6   : > { %4091 = vrot.lane.b32.xlu1 %v4090_v61, %s4493_s17  ;;  %v1256_v61 = vld [vmem:[#allocation7 + $0x250] sm:$0xff] }
 0x31c   : > { %v4077_v62 = vpop.permute.xlu0 %4076 }
 0x31d   : > { %v4079_v63 = vunpack.i.h.bf16 %v4077_v62  ;;  %v4078_v29 = vunpack.i.l.bf16 %v4077_v62 }
 0x31f   : > { %v1048_v0 = vsel %vm1047_vm4, %v4078_v29, %v4079_v63  ;;  %v1064_v1 = vsel %vm1047_vm4, %v4079_v63, %v4078_v29 }
 0x320   : > { %v4082_v38 = vpop.permute.xlu0 %4081  ;;  %v4965_v4 = vmax.f32 %v1015_v22, %v1048_v0  ;;  %v4967_v6 = vmax.f32 %v1016_v32, %v1064_v1 }
 0x321   : > { %v4084_v2 = vunpack.i.h.bf16 %v4082_v38  ;;  %v4083_v23 = vunpack.i.l.bf16 %v4082_v38  ;;  %v3418_v38 = vpack.c.bf16 %v1256_v61, %v1254_v59  ;;  %v1284_v59 = vld [vmem:[#allocation7 + $0x330] sm:$0xff]  ;;  %v1287_v61 = vld [vmem:[#allocation7 + $0x348] sm:$0xff] }
 0x322   : > { %v1084_v18 = vrot.slane %v4965_v4, 1  ;;  %v1087_v19 = vrot.slane %v4967_v6, 1  ;;  %v1106_v13 = vrot.slane %v4965_v4, 5  ;;  %v1107_v15 = vrot.slane %v4967_v6, 5 }
 0x323   : > { %v1049_v8 = vsel %vm1047_vm4, %v4083_v23, %v4084_v2  ;;  %v1065_v9 = vsel %vm1047_vm4, %v4084_v2, %v4083_v23 }
 0x324   : > { %v1070_v10 = vmax.f32 %v1017_v45, %v1049_v8  ;;  %v1071_v11 = vmax.f32 %v1018_v41, %v1065_v9  ;;  %v4087_v12 = vpop.permute.xlu1 %4086  ;;  %v1255_v41 = vld [vmem:[#allocation7 + $0x248] sm:$0xff]  ;;  %v1258_v8 = vld [vmem:[#allocation7 + $0x260] sm:$0xff]  ;;  %v1260_v9 = vld [vmem:[#allocation7 + $0x270] sm:$0xff] }
 0x325   : > { %v4089_v16 = vunpack.i.h.bf16 %v4087_v12  ;;  %v4088_v17 = vunpack.i.l.bf16 %v4087_v12  ;;  %v3416_v58 = vpack.c.bf16 %v1257_v48, %v1255_v41  ;;  %v1281_v41 = vld [vmem:[#allocation7 + $0x318] sm:$0xff] }
 0x326   : > { %v1085_v20 = vrot.slane %v1070_v10, 1  ;;  %v1088_v46 = vrot.slane %v1071_v11, 1 }
 0x327   : > { %v1050_v14 = vsel %vm1047_vm4, %v4088_v17, %v4089_v16  ;;  %v1066_v42 = vsel %vm1047_vm4, %v4089_v16, %v4088_v17  ;;  %v3422_v16 = vpack.c.bf16 %v1260_v9, %v1258_v8 }
 0x328   : > { %v1072_v21 = vmax.f32 %v1019_v52, %v1050_v14  ;;  %v1073_v22 = vmax.f32 %v1020_v53, %v1066_v42  ;;  %v4092_v28 = vpop.permute.xlu1 %4091  ;;  %v1089_v25 = vsel %vm528_vm0, %v1087_v19, %v1088_v46  ;;  %v1086_v30 = vsel %vm528_vm0, %v1084_v18, %v1085_v20  ;;  %v1262_v18 = vld [vmem:[#allocation7 + $0x280] sm:$0xff]  ;;  %v1264_v19 = vld [vmem:[#allocation7 + $0x290] sm:$0xff] }
 0x329   : > { %v4094_v32 = vunpack.i.h.bf16 %v4092_v28  ;;  %v4093_v36 = vunpack.i.l.bf16 %v4092_v28  ;;  %v4978_v33 = vmax.f32 %v4967_v6, %v1089_v25  ;;  %v4981_v34 = vmax.f32 %v4965_v4, %v1086_v30  ;;  %v1266_v6 = vld [vmem:[#allocation7 + $0x2a0] sm:$0xff]  ;;  %v1273_v28 = vld [vmem:[#allocation7 + $0x2d8] sm:$0xff] }
 0x32a   : > { %v1090_v39 = vrot.slane %v1072_v21, 1  ;;  %v1092_v40 = vrot.slane %v1073_v22, 1  ;;  %v3426_v54 = vpack.c.bf16 %v1264_v19, %v1262_v18  ;;  %v1296_v18 = vld [vmem:[#allocation7 + $0x390] sm:$0xff]  ;;  %v1299_v19 = vld [vmem:[#allocation7 + $0x3a8] sm:$0xff] }
 0x32b   : > { %v1051_v45 = vsel %vm1047_vm4, %v4093_v36, %v4094_v32  ;;  %v1067_v47 = vsel %vm1047_vm4, %v4094_v32, %v4093_v36  ;;  %1578 = vmatprep.mubr.f32.mxu1 %v4978_v33  ;;  %v1130_v2 = vrot.slane %v4978_v33, 2  ;;  %v1270_v32 = vld [vmem:[#allocation7 + $0x2c0] sm:$0xff]  ;;  %v1272_v36 = vld [vmem:[#allocation7 + $0x2d0] sm:$0xff] }
 0x32c   : > { %v1074_v49 = vmax.f32 %v1021_v60, %v1051_v45  ;;  %v1075_v27 = vmax.f32 %v1022_v7, %v1067_v47  ;;  %1579 = vmatmul.mubr.f32.vlgmr.msra.gmra.mrb[0].mxu1 %v4981_v34  ;;  %v1093_v50 = vsel %vm528_vm0, %v1088_v46, %v1092_v40  ;;  %v1091_v51 = vsel %vm528_vm0, %v1085_v20, %v1090_v39  ;;  %v1259_v60 = vld [vmem:[#allocation7 + $0x268] sm:$0xff]  ;;  %v1261_v7 = vld [vmem:[#allocation7 + $0x278] sm:$0xff]  ;;  %v1276_v45 = vld [vmem:[#allocation7 + $0x2f0] sm:$0xff] }
 0x32d   : > { %3411 = vmatpush1.bf16.msra.mxu1 %v3410_v24  ;;  %v4989_v52 = vmax.f32 %v1071_v11, %v1093_v50  ;;  %v4991_v53 = vmax.f32 %v1070_v10, %v1091_v51  ;;  %v3420_v23 = vpack.c.bf16 %v1261_v7, %v1259_v60  ;;  %v1263_v10 = vld [vmem:[#allocation7 + $0x288] sm:$0xff]  ;;  %v1265_v11 = vld [vmem:[#allocation7 + $0x298] sm:$0xff]  ;;  %v3438_v48 = vpack.c.bf16 %v1276_v45, %v1274_v44  ;;  %v1280_v50 = vld [vmem:[#allocation7 + $0x310] sm:$0xff] }
 0x32e   : > { %v1094_v56 = vrot.slane %v1074_v49, 1  ;;  %v1096_v57 = vrot.slane %v1075_v27, 1  ;;  %3413 = vmatprep.subr.bf16.mxu1 %v3412_v43  ;;  %v3424_v17 = vpack.c.bf16 %v1265_v11, %v1263_v10  ;;  %v1267_v20 = vld [vmem:[#allocation7 + $0x2a8] sm:$0xff]  ;;  %v1269_v46 = vld [vmem:[#allocation7 + $0x2b8] sm:$0xff]  ;;  %v3434_v43 = vpack.c.bf16 %v1272_v36, %v1270_v32  ;;  %v1290_v10 = vld [vmem:[#allocation7 + $0x360] sm:$0xff] }
 0x32f   : > { %1584 = vmatprep.mubr.f32.mxu1 %v4989_v52  ;;  %v1131_v29 = vrot.slane %v4989_v52, 2  ;;  %v3428_v4 = vpack.c.bf16 %v1269_v46, %v1267_v20  ;;  %v1279_v47 = vld [vmem:[#allocation7 + $0x308] sm:$0xff]  ;;  %v1289_v60 = vld [vmem:[#allocation7 + $0x358] sm:$0xff]  ;;  %v1292_v11 = vld [vmem:[#allocation7 + $0x370] sm:$0xff] }
 0x330   : > { %1585 = vmatmul.mubr.f32.gmra.mrb[2].mxu1 %v4991_v53  ;;  %v1097_v62 = vsel %vm528_vm0, %v1092_v40, %v1096_v57  ;;  %v1095_v63 = vsel %vm528_vm0, %v1090_v39, %v1094_v56  ;;  %v1112_v14 = vsel %vm1110_vm5, %v1096_v57, %v1107_v15  ;;  %v1111_v42 = vsel %vm1110_vm5, %v1094_v56, %v1106_v13  ;;  %v1275_v39 = vld [vmem:[#allocation7 + $0x2e8] sm:$0xff]  ;;  %v1277_v40 = vld [vmem:[#allocation7 + $0x2f8] sm:$0xff] }
 0x331   : > { %3415 = vmatpush1.bf16.msra.mxu1 %v3414_v55  ;;  %v4998_v0 = vmax.f32 %v1073_v22, %v1097_v62  ;;  %v5000_v1 = vmax.f32 %v1072_v21, %v1095_v63  ;;  %v1132_v12 = vsel %vm540_vm1, %v1130_v2, %v1131_v29  ;;  %v5010_v24 = vmax.f32 %v1075_v27, %v1112_v14  ;;  %v1268_v21 = vld [vmem:[#allocation7 + $0x2b0] sm:$0xff]  ;;  %v1271_v22 = vld [vmem:[#allocation7 + $0x2c8] sm:$0xff]  ;;  %v1278_v27 = vld [vmem:[#allocation7 + $0x300] sm:$0xff] }
 0x332   : > { %3417 = vmatprep.subr.bf16.mxu1 %v3416_v58  ;;  %v5012_v31 = vmax.f32 %v1074_v49, %v1111_v42  ;;  %v3430_v25 = vpack.c.bf16 %v1268_v21, %v1266_v6  ;;  %v3432_v30 = vpack.c.bf16 %v1273_v28, %v1271_v22  ;;  %v3436_v26 = vpack.c.bf16 %v1277_v40, %v1275_v39  ;;  %v1283_v51 = vld [vmem:[#allocation7 + $0x328] sm:$0xff]  ;;  %v1285_v55 = vld [vmem:[#allocation7 + $0x338] sm:$0xff]  ;;  %v1282_v58 = vld [vmem:[#allocation7 + $0x320] sm:$0xff] }
 0x333   : > { %1590 = vmatprep.mubr.f32.mxu1 %v4998_v0  ;;  %v3440_v49 = vpack.c.bf16 %v1281_v41, %v1279_v47  ;;  %v3442_v56 = vpack.c.bf16 %v1280_v50, %v1278_v27  ;;  %v3444_v57 = vpack.c.bf16 %v1285_v55, %v1283_v51  ;;  %v3446_v7 = vpack.c.bf16 %v1284_v59, %v1282_v58  ;;  %v1286_v63 = vld [vmem:[#allocation7 + $0x340] sm:$0xff]  ;;  %v1291_v2 = vld [vmem:[#allocation7 + $0x368] sm:$0xff]  ;;  %v1297_v13 = vld [vmem:[#allocation7 + $0x398] sm:$0xff] }
 0x334   : > { %1591 = vmatmul.mubr.f32.gmra.mrb[4].mxu1 %v5000_v1  ;;  %v3448_v62 = vpack.c.bf16 %v1289_v60, %v1287_v61  ;;  %v3454_v15 = vpack.c.bf16 %v1292_v11, %v1290_v10  ;;  %v1301_v20 = vld [vmem:[#allocation7 + $0x3b8] sm:$0xff]  ;;  %v1298_v42 = vld [vmem:[#allocation7 + $0x3a0] sm:$0xff]  ;;  %v1315_v27 = vld [vmem:[#allocation7 + $0x428] sm:$0xff]  ;;  %v1135_v51 = vrot.slane %v4998_v0, 2  ;;  %v1127_v55 = vrot.slane %v4981_v34, 2 }
 0x335   : > { %3419 = vmatpush1.bf16.msra.mxu1 %v3418_v38  ;;  %1661 = vmatprep.mubr.f32.mxu1 %v1132_v12  ;;  %v1288_v38 = vld [vmem:[#allocation7 + $0x350] sm:$0xff]  ;;  %v1295_v12 = vld [vmem:[#allocation7 + $0x388] sm:$0xff]  ;;  %v3460_v14 = vpack.c.bf16 %v1301_v20, %v1299_v19  ;;  %v1305_v6 = vld [vmem:[#allocation7 + $0x3d8] sm:$0xff]  ;;  %v1133_v60 = vrot.slane %v5000_v1, 2 }
 0x336   : > { %3421 = vmatprep.subr.bf16.mxu1 %v3420_v23  ;;  %v1293_v23 = vld [vmem:[#allocation7 + $0x378] sm:$0xff]  ;;  %v3450_v8 = vpack.c.bf16 %v1288_v38, %v1286_v63  ;;  %v1302_v28 = vld [vmem:[#allocation7 + $0x3c0] sm:$0xff]  ;;  %v1316_v59 = vld [vmem:[#allocation7 + $0x430] sm:$0xff]  ;;  %v1136_v63 = vsel %vm540_vm1, %v1131_v29, %v1135_v51  ;;  %v1146_v29 = vrot.slane %v4978_v33, 4 }
 0x337   : > { %v3452_v9 = vpack.c.bf16 %v1293_v23, %v1291_v2  ;;  %v1309_v32 = vld [vmem:[#allocation7 + $0x3f8] sm:$0xff]  ;;  %v1306_v40 = vld [vmem:[#allocation7 + $0x3e0] sm:$0xff]  ;;  %v1323_v10 = vld [vmem:[#allocation7 + $0x468] sm:$0xff] }
 0x338   : > { %v1313_v44 = vld [vmem:[#allocation7 + $0x418] sm:$0xff]  ;;  %v1310_v41 = vld [vmem:[#allocation7 + $0x400] sm:$0xff] }
 0x339   : > { %3423 = vmatpush1.bf16.msra.mxu1 %v3422_v16  ;;  %v3456_v16 = vpack.c.bf16 %v1297_v13, %v1295_v12  ;;  %v1317_v50 = vld [vmem:[#allocation7 + $0x438] sm:$0xff]  ;;  %v1314_v58 = vld [vmem:[#allocation7 + $0x420] sm:$0xff]  ;;  %v1147_v12 = vrot.slane %v4989_v52, 4 }
 0x33a   : > { %3425 = vmatprep.subr.bf16.mxu1 %v3424_v17  ;;  %v1294_v17 = vld [vmem:[#allocation7 + $0x380] sm:$0xff]  ;;  %v3478_v38 = vpack.c.bf16 %v1316_v59, %v1314_v58  ;;  %v1325_v11 = vld [vmem:[#allocation7 + $0x478] sm:$0xff] }
 0x33b   : > { %v3458_v46 = vpack.c.bf16 %v1296_v18, %v1294_v17  ;;  %v1318_v23 = vld [vmem:[#allocation7 + $0x440] sm:$0xff]  ;;  %v1324_v17 = vld [vmem:[#allocation7 + $0x470] sm:$0xff]  ;;  %v1327_v18 = vld [vmem:[#allocation7 + $0x488] sm:$0xff]  ;;  %v1148_v20 = vsel %vm564_vm2, %v1146_v29, %v1147_v12 }
 0x33c   : > { %v1329_v19 = vld [vmem:[#allocation7 + $0x498] sm:$0xff]  ;;  %v1354_v29 = vld [vmem:[#allocation7 + $0x560] sm:$0xff] }
 0x33d   : > { %3427 = vmatpush1.bf16.msra.mxu1 %v3426_v54  ;;  %v1300_v54 = vld [vmem:[#allocation7 + $0x3b0] sm:$0xff]  ;;  %v1349_v58 = vld [vmem:[#allocation7 + $0x538] sm:$0xff] }
 0x33e   : > { %3429 = vmatprep.subr.bf16.mxu1 %v3428_v4  ;;  %v1303_v4 = vld [vmem:[#allocation7 + $0x3c8] sm:$0xff]  ;;  %v3462_v21 = vpack.c.bf16 %v1300_v54, %v1298_v42  ;;  %v1326_v42 = vld [vmem:[#allocation7 + $0x480] sm:$0xff]  ;;  %v1328_v54 = vld [vmem:[#allocation7 + $0x490] sm:$0xff] }
 0x33f   : > { %v3464_v22 = vpack.c.bf16 %v1305_v6, %v1303_v4  ;;  %v1331_v4 = vld [vmem:[#allocation7 + $0x4a8] sm:$0xff]  ;;  %v1333_v6 = vld [vmem:[#allocation7 + $0x4b8] sm:$0xff] }
 0x341   : > { %3431 = vmatpush1.bf16.msra.mxu1 %v3430_v25  ;;  %v1304_v25 = vld [vmem:[#allocation7 + $0x3d0] sm:$0xff] }
 0x342   : > { %3433 = vmatprep.subr.bf16.mxu1 %v3432_v30  ;;  %v1307_v30 = vld [vmem:[#allocation7 + $0x3e8] sm:$0xff]  ;;  %v3466_v36 = vpack.c.bf16 %v1304_v25, %v1302_v28  ;;  %v1330_v28 = vld [vmem:[#allocation7 + $0x4a0] sm:$0xff]  ;;  %v1332_v25 = vld [vmem:[#allocation7 + $0x4b0] sm:$0xff] }
 0x343   : > { %v3468_v39 = vpack.c.bf16 %v1309_v32, %v1307_v30  ;;  %v1335_v30 = vld [vmem:[#allocation7 + $0x4c8] sm:$0xff]  ;;  %v1337_v32 = vld [vmem:[#allocation7 + $0x4d8] sm:$0xff] }
 0x345   : > { %3435 = vmatpush1.bf16.msra.mxu1 %v3434_v43  ;;  %v1308_v43 = vld [vmem:[#allocation7 + $0x3f0] sm:$0xff] }
 0x346   : > { %3437 = vmatprep.subr.bf16.mxu1 %v3436_v26  ;;  %v1311_v26 = vld [vmem:[#allocation7 + $0x408] sm:$0xff]  ;;  %v3470_v45 = vpack.c.bf16 %v1308_v43, %v1306_v40  ;;  %v1334_v40 = vld [vmem:[#allocation7 + $0x4c0] sm:$0xff]  ;;  %v1336_v43 = vld [vmem:[#allocation7 + $0x4d0] sm:$0xff] }
 0x347   : > { %v3472_v47 = vpack.c.bf16 %v1313_v44, %v1311_v26  ;;  %v1339_v26 = vld [vmem:[#allocation7 + $0x4e8] sm:$0xff]  ;;  %v1341_v44 = vld [vmem:[#allocation7 + $0x4f8] sm:$0xff] }
 0x349   : > { %3439 = vmatpush1.bf16.msra.mxu1 %v3438_v48  ;;  %v1312_v48 = vld [vmem:[#allocation7 + $0x410] sm:$0xff] }
 0x34a   : > { %3441 = vmatprep.subr.bf16.mxu1 %v3440_v49  ;;  %v1128_v49 = vrot.slane %v4991_v53, 2 }
 0x34c   : > { %v1129_v61 = vsel %vm540_vm1, %v1127_v55, %v1128_v49  ;;  %v1342_v55 = vld [vmem:[#allocation7 + $0x500] sm:$0xff] }
 0x34d   : > { %3443 = vmatpush1.bf16.msra.mxu1 %v3442_v56  ;;  %v3474_v56 = vpack.c.bf16 %v1312_v48, %v1310_v41  ;;  %v1338_v41 = vld [vmem:[#allocation7 + $0x4e0] sm:$0xff]  ;;  %v1340_v48 = vld [vmem:[#allocation7 + $0x4f0] sm:$0xff] }
 0x34e   : > { %3445 = vmatprep.subr.bf16.mxu1 %v3444_v57  ;;  %v3476_v57 = vpack.c.bf16 %v1317_v50, %v1315_v27  ;;  %v1345_v27 = vld [vmem:[#allocation7 + $0x518] sm:$0xff]  ;;  %v3502_v50 = vpack.c.bf16 %v1340_v48, %v1338_v41 }
 0x34f   : > { %v1377_v41 = vld [vmem:[#allocation7 + $0x618] sm:$0xff] }
 0x351   : > { %3447 = vmatpush1.bf16.msra.mxu1 %v3446_v7  ;;  %v1319_v7 = vld [vmem:[#allocation7 + $0x448] sm:$0xff] }
 0x352   : > { %3449 = vmatprep.subr.bf16.mxu1 %v3448_v62  ;;  %v1321_v62 = vld [vmem:[#allocation7 + $0x458] sm:$0xff] }
 0x353   : > { %v3480_v2 = vpack.c.bf16 %v1321_v62, %v1319_v7  ;;  %v1348_v7 = vld [vmem:[#allocation7 + $0x530] sm:$0xff]  ;;  %v1351_v62 = vld [vmem:[#allocation7 + $0x548] sm:$0xff] }
 0x355   : > { %3451 = vmatpush1.bf16.msra.mxu1 %v3450_v8  ;;  %v1320_v8 = vld [vmem:[#allocation7 + $0x450] sm:$0xff] }
 0x356   : > { %3453 = vmatprep.subr.bf16.mxu1 %v3452_v9  ;;  %v1134_v9 = vsel %vm540_vm1, %v1128_v49, %v1133_v60  ;;  %v3482_v13 = vpack.c.bf16 %v1320_v8, %v1318_v23  ;;  %v1343_v49 = vld [vmem:[#allocation7 + $0x508] sm:$0xff]  ;;  %v1350_v23 = vld [vmem:[#allocation7 + $0x540] sm:$0xff]  ;;  %v1352_v8 = vld [vmem:[#allocation7 + $0x550] sm:$0xff] }
 0x359   : > { %3455 = vmatpush1.bf16.msra.mxu1 %v3454_v15  ;;  %v3484_v15 = vpack.c.bf16 %v1325_v11, %v1323_v10  ;;  %v1357_v10 = vld [vmem:[#allocation7 + $0x578] sm:$0xff]  ;;  %v3514_v11 = vpack.c.bf16 %v1352_v8, %v1350_v23 }
 0x35a   : > { %3457 = vmatprep.subr.bf16.mxu1 %v3456_v16  ;;  %v1322_v16 = vld [vmem:[#allocation7 + $0x460] sm:$0xff] }
 0x35d   : > { %3459 = vmatpush1.bf16.msra.mxu1 %v3458_v46  ;;  %v3486_v46 = vpack.c.bf16 %v1324_v17, %v1322_v16  ;;  %v1359_v16 = vld [vmem:[#allocation7 + $0x588] sm:$0xff]  ;;  %v1361_v17 = vld [vmem:[#allocation7 + $0x598] sm:$0xff] }
 0x35e   : > { %3461 = vmatprep.subr.bf16.mxu1 %v3460_v14  ;;  %v3488_v14 = vpack.c.bf16 %v1329_v19, %v1327_v18  ;;  %v3520_v19 = vpack.c.bf16 %v1361_v17, %v1359_v16  ;;  %v1166_v16 = vrot.slane %v4989_v52, 6 }
 0x361   : > { %3463 = vmatpush1.bf16.msra.mxu1 %v3462_v21  ;;  %v3490_v21 = vpack.c.bf16 %v1328_v54, %v1326_v42  ;;  %v1365_v42 = vld [vmem:[#allocation7 + $0x5b8] sm:$0xff] }
 0x362   : > { %3465 = vmatprep.subr.bf16.mxu1 %v3464_v22  ;;  %v3492_v22 = vpack.c.bf16 %v1333_v6, %v1331_v4  ;;  %v1362_v6 = vld [vmem:[#allocation7 + $0x5a0] sm:$0xff] }
 0x365   : > { %3467 = vmatpush1.bf16.msra.mxu1 %v3466_v36  ;;  %v3494_v36 = vpack.c.bf16 %v1332_v25, %v1330_v28  ;;  %v1369_v28 = vld [vmem:[#allocation7 + $0x5d8] sm:$0xff] }
 0x366   : > { %3469 = vmatprep.subr.bf16.mxu1 %v3468_v39  ;;  %v3496_v39 = vpack.c.bf16 %v1337_v32, %v1335_v30  ;;  %v1366_v32 = vld [vmem:[#allocation7 + $0x5c0] sm:$0xff] }
 0x369   : > { %3471 = vmatpush1.bf16.msra.mxu1 %v3470_v45  ;;  %v3498_v45 = vpack.c.bf16 %v1336_v43, %v1334_v40  ;;  %v1373_v40 = vld [vmem:[#allocation7 + $0x5f8] sm:$0xff] }
 0x36a   : > { %3473 = vmatprep.subr.bf16.mxu1 %v3472_v47  ;;  %v3500_v47 = vpack.c.bf16 %v1341_v44, %v1339_v26  ;;  %v1370_v44 = vld [vmem:[#allocation7 + $0x5e0] sm:$0xff] }
 0x36c   : > { %1662 = vmatmul.mubr.f32.vlgmr.msra.gmra.mrb[0].mxu1 %v1129_v61 }
 0x36d   : > { %1667 = vmatprep.mubr.f32.mxu1 %v1136_v63  ;;  %3475 = vmatpush1.bf16.msra.mxu1 %v3474_v56  ;;  %v1344_v56 = vld [vmem:[#allocation7 + $0x510] sm:$0xff]  ;;  %v1353_v63 = vld [vmem:[#allocation7 + $0x558] sm:$0xff] }
 0x36e   : > { %3477 = vmatprep.subr.bf16.mxu1 %v3476_v57  ;;  %v1347_v57 = vld [vmem:[#allocation7 + $0x528] sm:$0xff]  ;;  %v3506_v59 = vpack.c.bf16 %v1344_v56, %v1342_v55  ;;  %v1381_v56 = vld [vmem:[#allocation7 + $0x638] sm:$0xff] }
 0x36f   : > { %v3508_v61 = vpack.c.bf16 %v1349_v58, %v1347_v57  ;;  %v1379_v55 = vld [vmem:[#allocation7 + $0x628] sm:$0xff]  ;;  %v1151_v57 = vrot.slane %v4998_v0, 4  ;;  %v1143_v58 = vrot.slane %v4981_v34, 4 }
 0x370   : > { %1668 = vmatmul.mubr.f32.gmra.mrb[2].mxu1 %v1134_v9  ;;  %v1355_v9 = vld [vmem:[#allocation7 + $0x568] sm:$0xff] }
 0x371   : > { %1673 = vmatprep.mubr.f32.mxu1 %v1135_v51  ;;  %3479 = vmatpush1.bf16.msra.mxu1 %v3478_v38  ;;  %v3504_v51 = vpack.c.bf16 %v1345_v27, %v1343_v49  ;;  %v1374_v27 = vld [vmem:[#allocation7 + $0x600] sm:$0xff]  ;;  %v1152_v23 = vsel %vm564_vm2, %v1147_v12, %v1151_v57  ;;  %v1165_v12 = vrot.slane %v4978_v33, 6 }
 0x372   : > { %3481 = vmatprep.subr.bf16.mxu1 %v3480_v2  ;;  %v3512_v2 = vpack.c.bf16 %v1353_v63, %v1351_v62  ;;  %v1149_v63 = vrot.slane %v5000_v1, 4 }
 0x374   : > { %1674 = vmatmul.mubr.f32.gmra.mrb[4].mxu1 %v1133_v60  ;;  %v1346_v60 = vld [vmem:[#allocation7 + $0x520] sm:$0xff] }
 0x375   : > { %3483 = vmatpush1.bf16.msra.mxu1 %v3482_v13  ;;  %1744 = vmatprep.mubr.f32.mxu1 %v1148_v20  ;;  %v3510_v38 = vpack.c.bf16 %v1348_v7, %v1346_v60  ;;  %v3516_v13 = vpack.c.bf16 %v1357_v10, %v1355_v9  ;;  %v1358_v20 = vld [vmem:[#allocation7 + $0x580] sm:$0xff]  ;;  %v1380_v7 = vld [vmem:[#allocation7 + $0x630] sm:$0xff] }
 0x376   : > { %3485 = vmatprep.subr.bf16.mxu1 %v3484_v15  ;;  %v1356_v15 = vld [vmem:[#allocation7 + $0x570] sm:$0xff]  ;;  %v1378_v60 = vld [vmem:[#allocation7 + $0x620] sm:$0xff] }
 0x377   : > { %v3518_v18 = vpack.c.bf16 %v1356_v15, %v1354_v29  ;;  %v3542_v8 = vpack.c.bf16 %v1380_v7, %v1378_v60  ;;  %v1382_v10 = vld [vmem:[#allocation7 + $0x640] sm:$0xff]  ;;  %v1387_v29 = vld [vmem:[#allocation7 + $0x668] sm:$0xff]  ;;  %v1389_v15 = vld [vmem:[#allocation7 + $0x678] sm:$0xff] }
 0x379   : > { %3487 = vmatpush1.bf16.msra.mxu1 %v3486_v46  ;;  %v1360_v46 = vld [vmem:[#allocation7 + $0x590] sm:$0xff] }
 0x37a   : > { %3489 = vmatprep.subr.bf16.mxu1 %v3488_v14  ;;  %v1363_v14 = vld [vmem:[#allocation7 + $0x5a8] sm:$0xff]  ;;  %v3522_v54 = vpack.c.bf16 %v1360_v46, %v1358_v20  ;;  %v1388_v20 = vld [vmem:[#allocation7 + $0x670] sm:$0xff] }
 0x37b   : > { %v3524_v4 = vpack.c.bf16 %v1365_v42, %v1363_v14  ;;  %v1391_v46 = vld [vmem:[#allocation7 + $0x688] sm:$0xff]  ;;  %v1393_v14 = vld [vmem:[#allocation7 + $0x698] sm:$0xff]  ;;  %v1167_v42 = vsel %vm1161_vm6, %v1165_v12, %v1166_v16  ;;  %v1420_v12 = vld [vmem:[#allocation7 + $0x770] sm:$0xff] }
 0x37d   : > { %3491 = vmatpush1.bf16.msra.mxu1 %v3490_v21  ;;  %v1364_v21 = vld [vmem:[#allocation7 + $0x5b0] sm:$0xff] }
 0x37e   : > { %3493 = vmatprep.subr.bf16.mxu1 %v3492_v22  ;;  %v1367_v22 = vld [vmem:[#allocation7 + $0x5c8] sm:$0xff]  ;;  %v3526_v25 = vpack.c.bf16 %v1364_v21, %v1362_v6  ;;  %v1390_v6 = vld [vmem:[#allocation7 + $0x680] sm:$0xff]  ;;  %v1392_v21 = vld [vmem:[#allocation7 + $0x690] sm:$0xff] }
 0x37f   : > { %v3528_v30 = vpack.c.bf16 %v1369_v28, %v1367_v22  ;;  %v1395_v22 = vld [vmem:[#allocation7 + $0x6a8] sm:$0xff]  ;;  %v1397_v28 = vld [vmem:[#allocation7 + $0x6b8] sm:$0xff]  ;;  %v3554_v33 = vpack.c.bf16 %v1392_v21, %v1390_v6 }
 0x381   : > { %3495 = vmatpush1.bf16.msra.mxu1 %v3494_v36  ;;  %v1368_v36 = vld [vmem:[#allocation7 + $0x5d0] sm:$0xff] }
 0x382   : > { %3497 = vmatprep.subr.bf16.mxu1 %v3496_v39  ;;  %v1371_v39 = vld [vmem:[#allocation7 + $0x5e8] sm:$0xff]  ;;  %v3530_v43 = vpack.c.bf16 %v1368_v36, %v1366_v32  ;;  %v1396_v32 = vld [vmem:[#allocation7 + $0x6b0] sm:$0xff] }
 0x383   : > { %v3532_v26 = vpack.c.bf16 %v1373_v40, %v1371_v39  ;;  %v1399_v36 = vld [vmem:[#allocation7 + $0x6c8] sm:$0xff]  ;;  %v1401_v39 = vld [vmem:[#allocation7 + $0x6d8] sm:$0xff] }
 0x385   : > { %3499 = vmatpush1.bf16.msra.mxu1 %v3498_v45  ;;  %v1372_v45 = vld [vmem:[#allocation7 + $0x5f0] sm:$0xff] }
 0x386   : > { %3501 = vmatprep.subr.bf16.mxu1 %v3500_v47  ;;  %v1375_v47 = vld [vmem:[#allocation7 + $0x608] sm:$0xff]  ;;  %v3534_v48 = vpack.c.bf16 %v1372_v45, %v1370_v44  ;;  %v1400_v44 = vld [vmem:[#allocation7 + $0x6d0] sm:$0xff] }
 0x387   : > { %v3536_v49 = vpack.c.bf16 %v1377_v41, %v1375_v47  ;;  %v1403_v45 = vld [vmem:[#allocation7 + $0x6e8] sm:$0xff]  ;;  %v1405_v47 = vld [vmem:[#allocation7 + $0x6f8] sm:$0xff] }
 0x389   : > { %3503 = vmatpush1.bf16.msra.mxu1 %v3502_v50  ;;  %v1376_v50 = vld [vmem:[#allocation7 + $0x610] sm:$0xff] }
 0x38a   : > { %3505 = vmatprep.subr.bf16.mxu1 %v3504_v51  ;;  %v1144_v51 = vrot.slane %v4991_v53, 4 }
 0x38c   : > { %v1145_v62 = vsel %vm564_vm2, %v1143_v58, %v1144_v51  ;;  %v1408_v58 = vld [vmem:[#allocation7 + $0x710] sm:$0xff] }
 0x38d   : > { %3507 = vmatpush1.bf16.msra.mxu1 %v3506_v59  ;;  %v3538_v59 = vpack.c.bf16 %v1376_v50, %v1374_v27  ;;  %v1404_v27 = vld [vmem:[#allocation7 + $0x6f0] sm:$0xff]  ;;  %v1407_v50 = vld [vmem:[#allocation7 + $0x708] sm:$0xff] }
 0x38e   : > { %3509 = vmatprep.subr.bf16.mxu1 %v3508_v61  ;;  %v3540_v61 = vpack.c.bf16 %v1381_v56, %v1379_v55 }
 0x391   : > { %3511 = vmatpush1.bf16.msra.mxu1 %v3510_v38  ;;  %v1383_v38 = vld [vmem:[#allocation7 + $0x648] sm:$0xff] }
 0x392   : > { %3513 = vmatprep.subr.bf16.mxu1 %v3512_v2  ;;  %v1385_v2 = vld [vmem:[#allocation7 + $0x658] sm:$0xff] }
 0x393   : > { %v3544_v9 = vpack.c.bf16 %v1385_v2, %v1383_v38  ;;  %v1415_v38 = vld [vmem:[#allocation7 + $0x748] sm:$0xff]  ;;  %v1417_v2 = vld [vmem:[#allocation7 + $0x758] sm:$0xff] }
 0x395   : > { %3515 = vmatpush1.bf16.msra.mxu1 %v3514_v11  ;;  %v1384_v11 = vld [vmem:[#allocation7 + $0x650] sm:$0xff] }
 0x396   : > { %3517 = vmatprep.subr.bf16.mxu1 %v3516_v13  ;;  %v1150_v13 = vsel %vm564_vm2, %v1144_v51, %v1149_v63  ;;  %v3546_v17 = vpack.c.bf16 %v1384_v11, %v1382_v10  ;;  %v1409_v51 = vld [vmem:[#allocation7 + $0x718] sm:$0xff]  ;;  %v1416_v10 = vld [vmem:[#allocation7 + $0x750] sm:$0xff]  ;;  %v1419_v11 = vld [vmem:[#allocation7 + $0x768] sm:$0xff] }
 0x397   : > { %v3568_v56 = vpack.c.bf16 %v1409_v51, %v1407_v50  ;;  %v1438_v50 = vld [vmem:[#allocation7 + $0x800] sm:$0xff]  ;;  %v1440_v51 = vld [vmem:[#allocation7 + $0x810] sm:$0xff] }
 0x399   : > { %3519 = vmatpush1.bf16.msra.mxu1 %v3518_v18  ;;  %v3548_v18 = vpack.c.bf16 %v1389_v15, %v1387_v29 }
 0x39a   : > { %3521 = vmatprep.subr.bf16.mxu1 %v3520_v19  ;;  %v1386_v19 = vld [vmem:[#allocation7 + $0x660] sm:$0xff] }
 0x39d   : > { %3523 = vmatpush1.bf16.msra.mxu1 %v3522_v54  ;;  %v3550_v54 = vpack.c.bf16 %v1388_v20, %v1386_v19  ;;  %v1425_v19 = vld [vmem:[#allocation7 + $0x798] sm:$0xff] }
 0x39e   : > { %3525 = vmatprep.subr.bf16.mxu1 %v3524_v4  ;;  %v3552_v4 = vpack.c.bf16 %v1393_v14, %v1391_v46  ;;  %v1422_v14 = vld [vmem:[#allocation7 + $0x780] sm:$0xff] }
 0x3a1   : > { %3527 = vmatpush1.bf16.msra.mxu1 %v3526_v25  ;;  %v3556_v25 = vpack.c.bf16 %v1397_v28, %v1395_v22  ;;  %v1426_v22 = vld [vmem:[#allocation7 + $0x7a0] sm:$0xff]  ;;  %v1428_v28 = vld [vmem:[#allocation7 + $0x7b0] sm:$0xff] }
 0x3a2   : > { %3529 = vmatprep.subr.bf16.mxu1 %v3528_v30  ;;  %v1394_v30 = vld [vmem:[#allocation7 + $0x6a0] sm:$0xff] }
 0x3a3   : > { %v3558_v40 = vpack.c.bf16 %v1396_v32, %v1394_v30  ;;  %v3590_v30 = vpack.c.bf16 %v1428_v28, %v1426_v22  ;;  %v1456_v22 = vld [vmem:[#allocation7 + $0x890] sm:$0xff]  ;;  %v1459_v28 = vld [vmem:[#allocation7 + $0x8a8] sm:$0xff] }
 0x3a5   : > { %3531 = vmatpush1.bf16.msra.mxu1 %v3530_v43  ;;  %v3560_v43 = vpack.c.bf16 %v1401_v39, %v1399_v36  ;;  %v1430_v36 = vld [vmem:[#allocation7 + $0x7c0] sm:$0xff]  ;;  %v1432_v39 = vld [vmem:[#allocation7 + $0x7d0] sm:$0xff] }
 0x3a6   : > { %3533 = vmatprep.subr.bf16.mxu1 %v3532_v26  ;;  %v1398_v26 = vld [vmem:[#allocation7 + $0x6c0] sm:$0xff] }
 0x3a7   : > { %v3562_v41 = vpack.c.bf16 %v1400_v44, %v1398_v26  ;;  %v3594_v26 = vpack.c.bf16 %v1432_v39, %v1430_v36  ;;  %v1460_v36 = vld [vmem:[#allocation7 + $0x8b0] sm:$0xff]  ;;  %v1463_v39 = vld [vmem:[#allocation7 + $0x8c8] sm:$0xff] }
 0x3a9   : > { %3535 = vmatpush1.bf16.msra.mxu1 %v3534_v48  ;;  %v3564_v48 = vpack.c.bf16 %v1405_v47, %v1403_v45  ;;  %v1434_v45 = vld [vmem:[#allocation7 + $0x7e0] sm:$0xff]  ;;  %v1436_v47 = vld [vmem:[#allocation7 + $0x7f0] sm:$0xff] }
 0x3aa   : > { %3537 = vmatprep.subr.bf16.mxu1 %v3536_v49  ;;  %v1402_v49 = vld [vmem:[#allocation7 + $0x6e0] sm:$0xff] }
 0x3ab   : > { %v3566_v55 = vpack.c.bf16 %v1404_v27, %v1402_v49  ;;  %v3598_v49 = vpack.c.bf16 %v1436_v47, %v1434_v45  ;;  %v1467_v45 = vld [vmem:[#allocation7 + $0x8e8] sm:$0xff]  ;;  %v1469_v47 = vld [vmem:[#allocation7 + $0x8f8] sm:$0xff] }
 0x3ac   : > { %1745 = vmatmul.mubr.f32.vlgmr.msra.gmra.mrb[0].mxu1 %v1145_v62  ;;  %v1410_v62 = vld [vmem:[#allocation7 + $0x720] sm:$0xff] }
 0x3ad   : > { %1750 = vmatprep.mubr.f32.mxu1 %v1152_v23  ;;  %3539 = vmatpush1.bf16.msra.mxu1 %v3538_v59  ;;  %v1411_v59 = vld [vmem:[#allocation7 + $0x728] sm:$0xff] }
 0x3ae   : > { %3541 = vmatprep.subr.bf16.mxu1 %v3540_v61  ;;  %v1413_v61 = vld [vmem:[#allocation7 + $0x738] sm:$0xff] }
 0x3af   : > { %v3572_v7 = vpack.c.bf16 %v1413_v61, %v1411_v59  ;;  %v1162_v59 = vrot.slane %v4981_v34, 6  ;;  %v3602_v61 = vpack.c.bf16 %v1440_v51, %v1438_v50  ;;  %v1471_v50 = vld [vmem:[#allocation7 + $0x908] sm:$0xff]  ;;  %v1473_v51 = vld [vmem:[#allocation7 + $0x918] sm:$0xff] }
 0x3b0   : > { %1751 = vmatmul.mubr.f32.gmra.mrb[2].mxu1 %v1150_v13  ;;  %v1421_v13 = vld [vmem:[#allocation7 + $0x778] sm:$0xff] }
 0x3b1   : > { %1756 = vmatprep.mubr.f32.mxu1 %v1151_v57  ;;  %3543 = vmatpush1.bf16.msra.mxu1 %v3542_v8  ;;  %v1406_v57 = vld [vmem:[#allocation7 + $0x700] sm:$0xff]  ;;  %v3576_v8 = vpack.c.bf16 %v1417_v2, %v1415_v38  ;;  %v3580_v15 = vpack.c.bf16 %v1421_v13, %v1419_v11  ;;  %v1168_v38 = vrot.slane %v5000_v1, 6  ;;  %v1447_v2 = vld [vmem:[#allocation7 + $0x848] sm:$0xff]  ;;  %v1448_v13 = vld [vmem:[#allocation7 + $0x850] sm:$0xff] }
 0x3b2   : > { %3545 = vmatprep.subr.bf16.mxu1 %v3544_v9  ;;  %v3570_v60 = vpack.c.bf16 %v1408_v58, %v1406_v57  ;;  %v1414_v9 = vld [vmem:[#allocation7 + $0x740] sm:$0xff]  ;;  %v1445_v57 = vld [vmem:[#allocation7 + $0x838] sm:$0xff]  ;;  %v1170_v58 = vrot.slane %v4998_v0, 6 }
 0x3b3   : > { %v3578_v29 = vpack.c.bf16 %v1416_v10, %v1414_v9  ;;  %v1174_v9 = vrot.slane %v5010_v24, 6  ;;  %v1446_v11 = vld [vmem:[#allocation7 + $0x840] sm:$0xff] }
 0x3b4   : > { %1757 = vmatmul.mubr.f32.gmra.mrb[4].mxu1 %v1149_v63  ;;  %v1412_v63 = vld [vmem:[#allocation7 + $0x730] sm:$0xff] }
 0x3b5   : > { %3547 = vmatpush1.bf16.msra.mxu1 %v3546_v17  ;;  %1827 = vmatprep.mubr.f32.mxu1 %v1167_v42  ;;  %v3574_v23 = vpack.c.bf16 %v1412_v63, %v1410_v62  ;;  %v1418_v17 = vld [vmem:[#allocation7 + $0x760] sm:$0xff]  ;;  %v1424_v42 = vld [vmem:[#allocation7 + $0x790] sm:$0xff] }
 0x3b6   : > { %3549 = vmatprep.subr.bf16.mxu1 %v3548_v18  ;;  %v1423_v18 = vld [vmem:[#allocation7 + $0x788] sm:$0xff]  ;;  %v3582_v20 = vpack.c.bf16 %v1420_v12, %v1418_v17  ;;  %v3586_v6 = vpack.c.bf16 %v1424_v42, %v1422_v14  ;;  %v1444_v62 = vld [vmem:[#allocation7 + $0x830] sm:$0xff]  ;;  %v1453_v12 = vld [vmem:[#allocation7 + $0x878] sm:$0xff] }
 0x3b7   : > { %v3584_v46 = vpack.c.bf16 %v1425_v19, %v1423_v18  ;;  %v1451_v17 = vld [vmem:[#allocation7 + $0x868] sm:$0xff]  ;;  %v1175_v18 = vsel %vm1161_vm6, %v1170_v58, %v1174_v9  ;;  %v1478_v9 = vld [vmem:[#allocation7 + $0x940] sm:$0xff] }
 0x3b8   : > { %v3612_v19 = vpack.c.bf16 %v1453_v12, %v1451_v17  ;;  %v1455_v42 = vld [vmem:[#allocation7 + $0x888] sm:$0xff]  ;;  %v1484_v17 = vld [vmem:[#allocation7 + $0x970] sm:$0xff] }
 0x3b9   : > { %3551 = vmatpush1.bf16.msra.mxu1 %v3550_v54  ;;  %v1427_v54 = vld [vmem:[#allocation7 + $0x7a8] sm:$0xff] }
 0x3ba   : > { %3553 = vmatprep.subr.bf16.mxu1 %v3552_v4  ;;  %v1429_v4 = vld [vmem:[#allocation7 + $0x7b8] sm:$0xff]  ;;  %v1487_v12 = vld [vmem:[#allocation7 + $0x988] sm:$0xff] }
 0x3bb   : > { %v3588_v21 = vpack.c.bf16 %v1429_v4, %v1427_v54  ;;  %v1457_v54 = vld [vmem:[#allocation7 + $0x898] sm:$0xff] }
 0x3bd   : > { %3555 = vmatpush1.bf16.msra.mxu1 %v3554_v33  ;;  %v1431_v33 = vld [vmem:[#allocation7 + $0x7c8] sm:$0xff] }
 0x3be   : > { %3557 = vmatprep.subr.bf16.mxu1 %v3556_v25  ;;  %v1433_v25 = vld [vmem:[#allocation7 + $0x7d8] sm:$0xff] }
 0x3bf   : > { %v3592_v32 = vpack.c.bf16 %v1433_v25, %v1431_v33  ;;  %v1461_v33 = vld [vmem:[#allocation7 + $0x8b8] sm:$0xff] }
 0x3c1   : > { %3559 = vmatpush1.bf16.msra.mxu1 %v3558_v40  ;;  %v1435_v40 = vld [vmem:[#allocation7 + $0x7e8] sm:$0xff] }
 0x3c2   : > { %3561 = vmatprep.subr.bf16.mxu1 %v3560_v43  ;;  %v1437_v43 = vld [vmem:[#allocation7 + $0x7f8] sm:$0xff] }
 0x3c3   : > { %v3596_v44 = vpack.c.bf16 %v1437_v43, %v1435_v40  ;;  %v1465_v40 = vld [vmem:[#allocation7 + $0x8d8] sm:$0xff] }
 0x3c5   : > { %3563 = vmatpush1.bf16.msra.mxu1 %v3562_v41  ;;  %v1439_v41 = vld [vmem:[#allocation7 + $0x808] sm:$0xff] }
 0x3c6   : > { %3565 = vmatprep.subr.bf16.mxu1 %v3564_v48  ;;  %v1441_v48 = vld [vmem:[#allocation7 + $0x818] sm:$0xff] }
 0x3c7   : > { %v3600_v27 = vpack.c.bf16 %v1441_v48, %v1439_v41  ;;  %v3628_v48 = vpack.c.bf16 %v1469_v47, %v1467_v45  ;;  %v2037_v45 = vld [vmem:[#allocation10 + $0x80] sm:$0xff]  ;;  %v2038_v47 = vld [vmem:[#allocation10 + $0x88] sm:$0xff] }
 0x3c9   : > { %3567 = vmatpush1.bf16.msra.mxu1 %v3566_v55  ;;  %v1163_v55 = vrot.slane %v4991_v53, 6 }
 0x3ca   : > { %3569 = vmatprep.subr.bf16.mxu1 %v3568_v56  ;;  %v1443_v56 = vld [vmem:[#allocation7 + $0x828] sm:$0xff] }
 0x3cb   : > { %v1164_v63 = vsel %vm1161_vm6, %v1162_v59, %v1163_v55  ;;  %v1475_v59 = vld [vmem:[#allocation7 + $0x928] sm:$0xff] }
 0x3cd   : > { %3571 = vmatpush1.bf16.msra.mxu1 %v3570_v60  ;;  %v3604_v60 = vpack.c.bf16 %v1445_v57, %v1443_v56  ;;  %v3632_v56 = vpack.c.bf16 %v1473_v51, %v1471_v50  ;;  %v1470_v57 = vld [vmem:[#allocation7 + $0x900] sm:$0xff] }
 0x3ce   : > { %3573 = vmatprep.subr.bf16.mxu1 %v3572_v7  ;;  %v1442_v7 = vld [vmem:[#allocation7 + $0x820] sm:$0xff] }
 0x3cf   : > { %v3606_v34 = vpack.c.bf16 %v1444_v62, %v1442_v7  ;;  %v1474_v62 = vld [vmem:[#allocation7 + $0x920] sm:$0xff] }
 0x3d0   : > { %v2040_v50 = vld [vmem:[#allocation10 + $0x98] sm:$0xff] }
 0x3d1   : > { %3575 = vmatpush1.bf16.msra.mxu1 %v3574_v23  ;;  %v1449_v23 = vld [vmem:[#allocation7 + $0x858] sm:$0xff] }
 0x3d2   : > { %3577 = vmatprep.subr.bf16.mxu1 %v3576_v8  ;;  %v1171_v8 = vsel %vm1161_vm6, %v1166_v16, %v1170_v58  ;;  %v3608_v10 = vpack.c.bf16 %v1449_v23, %v1447_v2  ;;  %v3610_v16 = vpack.c.bf16 %v1448_v13, %v1446_v11  ;;  %v1472_v58 = vld [vmem:[#allocation7 + $0x910] sm:$0xff]  ;;  %v1481_v2 = vld [vmem:[#allocation7 + $0x958] sm:$0xff] }
 0x3d3   : > { %v1485_v11 = vld [vmem:[#allocation7 + $0x978] sm:$0xff] }
 0x3d5   : > { %3579 = vmatpush1.bf16.msra.mxu1 %v3578_v29  ;;  %v1169_v29 = vsel %vm1161_vm6, %v1163_v55, %v1168_v38 }
 0x3d6   : > { %3581 = vmatprep.subr.bf16.mxu1 %v3580_v15  ;;  %v1172_v15 = vrot.slane %v5012_v31, 6 }
 0x3d8   : > { %v1173_v14 = vsel %vm1161_vm6, %v1168_v38, %v1172_v15  ;;  %v1479_v38 = vld [vmem:[#allocation7 + $0x948] sm:$0xff]  ;;  %v1482_v15 = vld [vmem:[#allocation7 + $0x960] sm:$0xff] }
 0x3d9   : > { %3583 = vmatpush1.bf16.msra.mxu1 %v3582_v20  ;;  %v1450_v20 = vld [vmem:[#allocation7 + $0x860] sm:$0xff] }
 0x3da   : > { %3585 = vmatprep.subr.bf16.mxu1 %v3584_v46  ;;  %v1452_v46 = vld [vmem:[#allocation7 + $0x870] sm:$0xff] }
 0x3db   : > { %v3614_v4 = vpack.c.bf16 %v1452_v46, %v1450_v20  ;;  %v1486_v20 = vld [vmem:[#allocation7 + $0x980] sm:$0xff]  ;;  %v1488_v46 = vld [vmem:[#allocation7 + $0x990] sm:$0xff] }
 0x3dd   : > { %3587 = vmatpush1.bf16.msra.mxu1 %v3586_v6  ;;  %v3616_v6 = vpack.c.bf16 %v1457_v54, %v1455_v42  ;;  %v1493_v42 = vld [vmem:[#allocation7 + $0x9b8] sm:$0xff]  ;;  %v3650_v54 = vpack.c.bf16 %v1488_v46, %v1486_v20 }
 0x3de   : > { %3589 = vmatprep.subr.bf16.mxu1 %v3588_v21  ;;  %v1454_v21 = vld [vmem:[#allocation7 + $0x880] sm:$0xff] }
 0x3df   : > { %v3618_v25 = vpack.c.bf16 %v1456_v22, %v1454_v21  ;;  %v1492_v21 = vld [vmem:[#allocation7 + $0x9b0] sm:$0xff]  ;;  %v1495_v22 = vld [vmem:[#allocation7 + $0x9c8] sm:$0xff]  ;;  %v2032_v46 = vld [vmem:[#allocation10 + $0x58] sm:$0xff] }
 0x3e1   : > { %3591 = vmatpush1.bf16.msra.mxu1 %v3590_v30  ;;  %v3620_v30 = vpack.c.bf16 %v1461_v33, %v1459_v28  ;;  %v1497_v28 = vld [vmem:[#allocation7 + $0x9d8] sm:$0xff] }
 0x3e2   : > { %3593 = vmatprep.subr.bf16.mxu1 %v3592_v32  ;;  %v1458_v32 = vld [vmem:[#allocation7 + $0x8a0] sm:$0xff] }
 0x3e3   : > { %v3622_v43 = vpack.c.bf16 %v1460_v36, %v1458_v32  ;;  %v1496_v32 = vld [vmem:[#allocation7 + $0x9d0] sm:$0xff]  ;;  %v1499_v36 = vld [vmem:[#allocation7 + $0x9e8] sm:$0xff] }
 0x3e5   : > { %3595 = vmatpush1.bf16.msra.mxu1 %v3594_v26  ;;  %v3624_v26 = vpack.c.bf16 %v1465_v40, %v1463_v39  ;;  %v1501_v39 = vld [vmem:[#allocation7 + $0x9f8] sm:$0xff] }
 0x3e6   : > { %3597 = vmatprep.subr.bf16.mxu1 %v3596_v44  ;;  %v1464_v44 = vld [vmem:[#allocation7 + $0x8d0] sm:$0xff] }
 0x3e9   : > { %3599 = vmatpush1.bf16.msra.mxu1 %v3598_v49  ;;  %v1466_v49 = vld [vmem:[#allocation7 + $0x8e0] sm:$0xff] }
 0x3ea   : > { %3601 = vmatprep.subr.bf16.mxu1 %v3600_v27  ;;  %v1468_v27 = vld [vmem:[#allocation7 + $0x8f0] sm:$0xff] }
 0x3eb   : > { %v3630_v55 = vpack.c.bf16 %v1468_v27, %v1466_v49  ;;  %v2022_v49 = vld [vmem:[#allocation10 + $0x8] sm:$0xff]  ;;  %v2039_v27 = vld [vmem:[#allocation10 + $0x90] sm:$0xff] }
 0x3ec   : > { %1828 = vmatmul.mubr.f32.vlgmr.msra.gmra.mrb[0].mxu1 %v1164_v63  ;;  %v1476_v63 = vld [vmem:[#allocation7 + $0x930] sm:$0xff] }
 0x3ed   : > { %1833 = vmatprep.mubr.f32.mxu1 %v1171_v8  ;;  %3603 = vmatpush1.bf16.msra.mxu1 %v3602_v61  ;;  %v1477_v61 = vld [vmem:[#allocation7 + $0x938] sm:$0xff]  ;;  %v3638_v23 = vpack.c.bf16 %v1476_v63, %v1474_v62  ;;  %v3640_v8 = vpack.c.bf16 %v1481_v2, %v1479_v38  ;;  %v2045_v38 = vld [vmem:[#allocation10 + $0xc0] sm:$0xff]  ;;  %v2046_v2 = vld [vmem:[#allocation10 + $0xc8] sm:$0xff] }
 0x3ee   : > { %3605 = vmatprep.subr.bf16.mxu1 %v3604_v60  ;;  %v3634_v60 = vpack.c.bf16 %v1472_v58, %v1470_v57  ;;  %v3636_v7 = vpack.c.bf16 %v1477_v61, %v1475_v59  ;;  %v2024_v57 = vld [vmem:[#allocation10 + $0x18] sm:$0xff]  ;;  %v2025_v58 = vld [vmem:[#allocation10 + $0x20] sm:$0xff]  ;;  %v2043_v59 = vld [vmem:[#allocation10 + $0xb0] sm:$0xff] }
 0x3ef   : > { %v2044_v61 = vld [vmem:[#allocation10 + $0xb8] sm:$0xff]  ;;  %v2027_v62 = vld [vmem:[#allocation10 + $0x30] sm:$0xff] }
 0x3f0   : > { %1834 = vmatmul.mubr.f32.gmra.mrb[2].mxu1 %v1169_v29  ;;  %v2028_v63 = vld [vmem:[#allocation10 + $0x38] sm:$0xff] }
 0x3f1   : > { %1839 = vmatprep.mubr.f32.mxu1 %v1175_v18  ;;  %3607 = vmatpush1.bf16.msra.mxu1 %v3606_v34  ;;  %v1480_v34 = vld [vmem:[#allocation7 + $0x950] sm:$0xff]  ;;  %v1489_v18 = vld [vmem:[#allocation7 + $0x998] sm:$0xff] }
 0x3f2   : > { %3609 = vmatprep.subr.bf16.mxu1 %v3608_v10  ;;  %v1483_v10 = vld [vmem:[#allocation7 + $0x968] sm:$0xff]  ;;  %v3642_v13 = vpack.c.bf16 %v1480_v34, %v1478_v9 }
 0x3f3   : > { %v3644_v29 = vpack.c.bf16 %v1485_v11, %v1483_v10  ;;  %v2029_v9 = vld [vmem:[#allocation10 + $0x40] sm:$0xff]  ;;  %v2030_v34 = vld [vmem:[#allocation10 + $0x48] sm:$0xff]  ;;  %v1502_v11 = vld [vmem:[#allocation8] sm:$0x3] }
 0x3f4   : > { %1840 = vmatmul.mubr.f32.gmra.mrb[4].mxu1 %v1173_v14  ;;  %v1491_v14 = vld [vmem:[#allocation7 + $0x9a8] sm:$0xff]  ;;  %v3682_v10 = vpack.c.bf16 %v2030_v34, %v2029_v9 }
 0x3f5   : > { %3611 = vmatpush1.bf16.msra.mxu1 %v3610_v16  ;;  %1910 = vmatprep.mubr.f32.mxu1 %v4989_v52  ;;  %v1462_v52 = vld [vmem:[#allocation7 + $0x8c0] sm:$0xff]  ;;  %v3646_v16 = vpack.c.bf16 %v1484_v17, %v1482_v15  ;;  %v2047_v17 = vld [vmem:[#allocation10 + $0xd0] sm:$0xff] }
 0x3f6   : > { %3613 = vmatprep.subr.bf16.mxu1 %v3612_v19  ;;  %v3626_v41 = vpack.c.bf16 %v1464_v44, %v1462_v52  ;;  %v3648_v19 = vpack.c.bf16 %v1489_v18, %v1487_v12  ;;  %v1500_v52 = vld [vmem:[#allocation7 + $0x9f0] sm:$0xff]  ;;  %v2048_v12 = vld [vmem:[#allocation10 + $0xd8] sm:$0xff] }
 0x3f7   : > { %v2031_v18 = vld [vmem:[#allocation10 + $0x50] sm:$0xff]  ;;  %v3684_v20 = vpack.c.bf16 %v2048_v12, %v2047_v17 }
 0x3f8   : > { %v2071_v12 = vld [vmem:[#allocation10 + $0x190] sm:$0xff] }
 0x3f9   : > { %3615 = vmatpush1.bf16.msra.mxu1 %v3614_v4  ;;  %v3652_v4 = vpack.c.bf16 %v1493_v42, %v1491_v14  ;;  %v3686_v42 = vpack.c.bf16 %v2032_v46, %v2031_v18  ;;  %v2072_v18 = vld [vmem:[#allocation10 + $0x198] sm:$0xff] }
 0x3fa   : > { %3617 = vmatprep.subr.bf16.mxu1 %v3616_v6  ;;  %v1490_v6 = vld [vmem:[#allocation7 + $0x9a0] sm:$0xff] }
 0x3fb   : > { %v3654_v33 = vpack.c.bf16 %v1492_v21, %v1490_v6 }
 0x3fd   : > { %3619 = vmatpush1.bf16.msra.mxu1 %v3618_v25  ;;  %v3656_v25 = vpack.c.bf16 %v1497_v28, %v1495_v22  ;;  %v2050_v28 = vld [vmem:[#allocation10 + $0xe8] sm:$0xff] }
 0x3fe   : > { %3621 = vmatprep.subr.bf16.mxu1 %v3620_v30  ;;  %v1494_v30 = vld [vmem:[#allocation7 + $0x9c0] sm:$0xff] }
 0x3ff   : > { %v3658_v40 = vpack.c.bf16 %v1496_v32, %v1494_v30  ;;  %v2034_v32 = vld [vmem:[#allocation10 + $0x68] sm:$0xff] }
 0x401   : > { %3623 = vmatpush1.bf16.msra.mxu1 %v3622_v43  ;;  %v3660_v43 = vpack.c.bf16 %v1501_v39, %v1499_v36 }
 0x402   : > { %3625 = vmatprep.subr.bf16.mxu1 %v3624_v26  ;;  %v1498_v26 = vld [vmem:[#allocation7 + $0x9e0] sm:$0xff] }
 0x403   : > { %v3662_v44 = vpack.c.bf16 %v1500_v52, %v1498_v26  ;;  %v2052_v26 = vld [vmem:[#allocation10 + $0xf8] sm:$0xff]  ;;  %v2035_v52 = vld [vmem:[#allocation10 + $0x70] sm:$0xff] }
 0x405   : > { %3627 = vmatpush1.bf16.msra.mxu1 %v3626_v41  ;;  %v2021_v41 = vld [vmem:[#allocation10] sm:$0xff] }
 0x406   : > { %3629 = vmatprep.subr.bf16.mxu1 %v3628_v48  ;;  %v3664_v48 = vpack.c.bf16 %v2038_v47, %v2037_v45  ;;  %v3666_v51 = vpack.c.bf16 %v2022_v49, %v2021_v41  ;;  %v2036_v41 = vld [vmem:[#allocation10 + $0x78] sm:$0xff]  ;;  %v2070_v49 = vld [vmem:[#allocation10 + $0x188] sm:$0xff] }
 0x408   : > { %3665 = vmatprep.subr.bf16.mxu0 %v3664_v48  ;;  %v2069_v48 = vld [vmem:[#allocation10 + $0x180] sm:$0xff] }
 0x409   : > { %3631 = vmatpush1.bf16.msra.mxu1 %v3630_v55  ;;  %v3668_v55 = vpack.c.bf16 %v2040_v50, %v2039_v27  ;;  %3667 = vmatpush3.bf16.msra.mxu0 %v3666_v51  ;;  %v3694_v51 = vpack.c.bf16 %v2036_v41, %v2035_v52 }
 0x40a   : > { %3633 = vmatprep.subr.bf16.mxu1 %v3632_v56  ;;  %v2023_v56 = vld [vmem:[#allocation10 + $0x10] sm:$0xff] }
 0x40b   : > { %3669 = vmatprep.subr.bf16.mxu0 %v3668_v55 }
 0x40d   : > { %3635 = vmatpush1.bf16.msra.mxu1 %v3634_v60 }
 0x40e   : > { %3637 = vmatprep.subr.bf16.mxu1 %v3636_v7  ;;  %v3676_v7 = vpack.c.bf16 %v2044_v61, %v2043_v59 }
 0x411   : > { %3639 = vmatpush1.bf16.msra.mxu1 %v3638_v23  ;;  %v3678_v23 = vpack.c.bf16 %v2028_v63, %v2027_v62 }
 0x412   : > { %3641 = vmatprep.subr.bf16.mxu1 %v3640_v8  ;;  %v3680_v8 = vpack.c.bf16 %v2046_v2, %v2045_v38 }
 0x415   : > { %3643 = vmatpush1.bf16.msra.mxu1 %v3642_v13  ;;  %v1507_v13 = vrot.slane %v1502_v11, %v740_v3 }
 0x416   : > { %3645 = vmatprep.subr.bf16.mxu1 %v3644_v29  ;;  %v1511_v29 = vrot.slane %v1502_v11, %v744_v5  ;;  %v2049_v5 = vld [vmem:[#allocation10 + $0xe0] sm:$0xff]  ;;  %v2054_v11 = vld [vmem:[#allocation10 + $0x108] sm:$0xff] }
 0x417   : > { %v3688_v30 = vpack.c.bf16 %v2050_v28, %v2049_v5  ;;  %v2055_v5 = vld [vmem:[#allocation10 + $0x110] sm:$0xff]  ;;  %v2056_v28 = vld [vmem:[#allocation10 + $0x118] sm:$0xff] }
 0x419   : > { %3647 = vmatpush1.bf16.msra.mxu1 %v3646_v16 }
 0x41a   : > { %3649 = vmatprep.subr.bf16.mxu1 %v3648_v19 }
 0x41d   : > { %3651 = vmatpush1.bf16.msra.mxu1 %v3650_v54 }
 0x41e   : > { %3653 = vmatprep.subr.bf16.mxu1 %v3652_v4 }
 0x421   : > { %3655 = vmatpush1.bf16.msra.mxu1 %v3654_v33  ;;  %v2033_v33 = vld [vmem:[#allocation10 + $0x60] sm:$0xff] }
 0x422   : > { %3657 = vmatprep.subr.bf16.mxu1 %v3656_v25 }
 0x425   : > { %3659 = vmatpush1.bf16.msra.mxu1 %v3658_v40  ;;  %v3690_v40 = vpack.c.bf16 %v2034_v32, %v2033_v33  ;;  %v2074_v32 = vld [vmem:[#allocation10 + $0x1a8] sm:$0xff] }
 0x426   : > { %3661 = vmatprep.subr.bf16.mxu1 %v3660_v43  ;;  %v2051_v43 = vld [vmem:[#allocation10 + $0xf0] sm:$0xff] }
 0x427   : > { %v3692_v47 = vpack.c.bf16 %v2052_v26, %v2051_v43  ;;  %v3702_v43 = vpack.c.bf16 %v2056_v28, %v2055_v5  ;;  %v2087_v28 = vld [vmem:[#allocation10 + $0x210] sm:$0xff] }
 0x429   : > { %3663 = vmatpush1.bf16.msra.mxu1 %v3662_v44 }
 0x42c   : > { %1911 = vmatmul.mubr.f32.vlgmr.msra.gmra.mrb[0].mxu1 %v4991_v53  ;;  %v2041_v53 = vld [vmem:[#allocation10 + $0xa0] sm:$0xff] }
 0x42d   : > { %1916 = vmatprep.mubr.f32.mxu1 %v4998_v0  ;;  %v2042_v0 = vld [vmem:[#allocation10 + $0xa8] sm:$0xff] }
 0x430   : > { %1917 = vmatmul.mubr.f32.gmra.mrb[2].mxu1 %v5000_v1  ;;  %v3670_v1 = vpack.c.bf16 %v2024_v57, %v2023_v56  ;;  %v3696_v56 = vpack.c.bf16 %v2070_v49, %v2069_v48  ;;  %v2075_v48 = vld [vmem:[#allocation10 + $0x1b0] sm:$0xff]  ;;  %v2076_v49 = vld [vmem:[#allocation10 + $0x1b8] sm:$0xff] }
 0x431   : > { %1922 = vmatprep.mubr.f32.mxu1 %v5010_v24  ;;  %v3672_v24 = vpack.c.bf16 %v2042_v0, %v2041_v53 }
 0x432   : > { %3671 = vmatpush3.bf16.msra.mxu0 %v3670_v1 }
 0x433   : > { %3673 = vmatprep.subr.bf16.mxu0 %v3672_v24 }
 0x434   : > { %1923 = vmatmul.mubr.f32.gmra.mrb[4].mxu1 %v5012_v31  ;;  %v2026_v31 = vld [vmem:[#allocation10 + $0x28] sm:$0xff] }
 0x435   : > { %v3674_v60 = vpack.c.bf16 %v2026_v31, %v2025_v58  ;;  %3181 = vmatprep.mubr.msk.f32.mxu1 %vm4496_vm8, %v4492_v37 }
 0x437   : > { %3675 = vmatpush3.bf16.msra.mxu0 %v3674_v60 }
 0x438   : > { %3677 = vmatprep.subr.bf16.mxu0 %v3676_v7 }
 0x43b   : > { %3679 = vmatpush3.bf16.msra.mxu0 %v3678_v23 }
 0x43c   : > { %3681 = vmatprep.subr.bf16.mxu0 %v3680_v8 }
 0x43f   : > { %3683 = vmatpush3.bf16.msra.mxu0 %v3682_v10  ;;  %v2053_v10 = vld [vmem:[#allocation10 + $0x100] sm:$0xff] }
 0x440   : > { %3685 = vmatprep.subr.bf16.mxu0 %v3684_v20 }
 0x443   : > { %3687 = vmatpush3.bf16.msra.mxu0 %v3686_v42 }
 0x444   : > { %3689 = vmatprep.subr.bf16.mxu0 %v3688_v30  ;;  %v2073_v30 = vld [vmem:[#allocation10 + $0x1a0] sm:$0xff] }
 0x447   : > { %3691 = vmatpush3.bf16.msra.mxu0 %v3690_v40 }
 0x448   : > { %3693 = vmatprep.subr.bf16.mxu0 %v3692_v47  ;;  %v2058_v47 = vld [vmem:[#allocation10 + $0x128] sm:$0xff] }
 0x44b   : > { %3695 = vmatpush3.bf16.msra.mxu0 %v3694_v51  ;;  %v2059_v51 = vld [vmem:[#allocation10 + $0x130] sm:$0xff] }
 0x44c   : > { %3697 = vmatprep.subr.bf16.mxu0 %v3696_v56  ;;  %v2077_v56 = vld [vmem:[#allocation10 + $0x1c0] sm:$0xff] }
 0x4ff   : > { %v1912_v15 = vpop.f32.mrb[0].mxu1 }
 0x500   : > { %v3880_v16 = vadd.f32 %v1912_v15, %v1507_v13  ;;  %v1914_v19 = vpop.f32.mrb[1].mxu1 }
 0x501   : > { %v3881_v14 = vadd.f32 %v1914_v19, %v1511_v29 }
 0x502   : > { %v1929_v54 = vmax.f32 %v3880_v16, 0.0 }
 0x503   : > { %v1930_v4 = vmax.f32 %v3881_v14, 0.0  ;;  %v1918_v6 = vpop.f32.mrb[2].mxu1 }
 0x504   : > { %v3882_v21 = vadd.f32 %v1918_v6, %v1507_v13  ;;  %v1920_v3 = vpop.f32.mrb[3].mxu1  ;;  %v3698_v6 = vpack.c.bf16 %v2054_v11, %v2053_v10  ;;  %v2084_v10 = vld [vmem:[#allocation10 + $0x1f8] sm:$0xff] }
 0x505   : > { %v4095_v22 = vpack.i.bf16 %v1930_v4, %v1929_v54  ;;  %v3883_v35 = vadd.f32 %v1920_v3, %v1511_v29 }
 0x506   : > { %v1931_v25 = vmax.f32 %v3882_v21, 0.0  ;;  %v3700_v21 = vpack.c.bf16 %v2072_v18, %v2071_v12  ;;  %v2101_v12 = vld [vmem:[#allocation10 + $0x280] sm:$0xff]  ;;  %v2102_v18 = vld [vmem:[#allocation10 + $0x288] sm:$0xff] }
 0x507   : > { %v1932_v36 = vmax.f32 %v3883_v35, 0.0  ;;  %v1924_v39 = vpop.f32.mrb[4].mxu1  ;;  %4096 = vrot.lane.b32.xlu0 %v4095_v22, %s4494_s24 }
 0x508   : > { %v3884_v44 = vadd.f32 %v1924_v39, %v1507_v13  ;;  %v1926_v45 = vpop.f32.mrb[5].mxu1 }
 0x509   : > { %v4100_v27 = vpack.i.bf16 %v1932_v36, %v1931_v25  ;;  %v3885_v50 = vadd.f32 %v1926_v45, %v1511_v29  ;;  %v2057_v45 = vld [vmem:[#allocation10 + $0x120] sm:$0xff] }
 0x50a   : > { %v1933_v55 = vmax.f32 %v3884_v44, 0.0  ;;  %v3704_v44 = vpack.c.bf16 %v2074_v32, %v2073_v30  ;;  %v2105_v30 = vld [vmem:[#allocation10 + $0x2a0] sm:$0xff]  ;;  %v2106_v32 = vld [vmem:[#allocation10 + $0x2a8] sm:$0xff] }
 0x50b   : > { %v1934_v57 = vmax.f32 %v3885_v50, 0.0  ;;  %4101 = vrot.lane.b32.xlu1 %v4100_v27, %s4494_s24  ;;  %v3706_v27 = vpack.c.bf16 %v2058_v47, %v2057_v45  ;;  %v3708_v50 = vpack.c.bf16 %v2076_v49, %v2075_v48  ;;  %v2091_v48 = vld [vmem:[#allocation10 + $0x230] sm:$0xff]  ;;  %v2109_v49 = vld [vmem:[#allocation10 + $0x2c0] sm:$0xff] }
 0x50d   : > { %v4105_v53 = vpack.i.bf16 %v1934_v57, %v1933_v55 }
 0x50f   : > { %4106 = vrot.lane.b32.xlu0 %v4105_v53, %s4494_s24 }
 0x579   : > { %v4097_v0 = vpop.permute.xlu0 %4096 }
 0x57a   : > { %v4099_v1 = vunpack.i.h.bf16 %v4097_v0  ;;  %v4098_v24 = vunpack.i.l.bf16 %v4097_v0 }
 0x57c   : > { %v1954_v58 = vsel %vm1953_vm7, %v4098_v24, %v4099_v1  ;;  %v1966_v31 = vsel %vm1953_vm7, %v4099_v1, %v4098_v24  ;;  %v2061_v1 = vld [vmem:[#allocation10 + $0x140] sm:$0xff]  ;;  %v2062_v24 = vld [vmem:[#allocation10 + $0x148] sm:$0xff] }
 0x57d   : > { %v4102_v59 = vpop.permute.xlu1 %4101  ;;  %v1969_v7 = vmax.f32 %v1929_v54, %v1954_v58  ;;  %v1970_v62 = vmax.f32 %v1930_v4, %v1966_v31  ;;  %v2079_v58 = vld [vmem:[#allocation10 + $0x1d0] sm:$0xff]  ;;  %v2080_v31 = vld [vmem:[#allocation10 + $0x1d8] sm:$0xff] }
 0x57e   : > { %v4104_v61 = vunpack.i.h.bf16 %v4102_v59  ;;  %v4103_v60 = vunpack.i.l.bf16 %v4102_v59  ;;  %v3714_v59 = vpack.c.bf16 %v2062_v24, %v2061_v1  ;;  %v2095_v24 = vld [vmem:[#allocation10 + $0x250] sm:$0xff] }
 0x57f   : > { %v1981_v13 = vrot.slane %v1969_v7, 2  ;;  %v1984_v17 = vrot.slane %v1970_v62, 2  ;;  %v1997_v3 = vrot.slane %v1969_v7, 6  ;;  %v1998_v33 = vrot.slane %v1970_v62, 6 }
 0x580   : > { %v1955_v63 = vsel %vm1953_vm7, %v4103_v60, %v4104_v61  ;;  %v1967_v38 = vsel %vm1953_vm7, %v4104_v61, %v4103_v60  ;;  %v3716_v61 = vpack.c.bf16 %v2080_v31, %v2079_v58  ;;  %v2063_v60 = vld [vmem:[#allocation10 + $0x150] sm:$0xff]  ;;  %v2096_v58 = vld [vmem:[#allocation10 + $0x258] sm:$0xff]  ;;  %v2113_v31 = vld [vmem:[#allocation10 + $0x2e0] sm:$0xff] }
 0x581   : > { %v1971_v2 = vmax.f32 %v1931_v25, %v1955_v63  ;;  %v5069_v23 = vmax.f32 %v1932_v36, %v1967_v38  ;;  %v4107_v8 = vpop.permute.xlu0 %4106  ;;  %v2082_v63 = vld [vmem:[#allocation10 + $0x1e8] sm:$0xff] }
 0x582   : > { %v4109_v9 = vunpack.i.h.bf16 %v4107_v8  ;;  %v4108_v34 = vunpack.i.l.bf16 %v4107_v8  ;;  %v2065_v8 = vld [vmem:[#allocation10 + $0x160] sm:$0xff] }
 0x583   : > { %v1982_v29 = vrot.slane %v1971_v2, 2  ;;  %v1985_v15 = vrot.slane %v5069_v23, 2 }
 0x584   : > { %v1956_v16 = vsel %vm1953_vm7, %v4108_v34, %v4109_v9  ;;  %v1968_v19 = vsel %vm1953_vm7, %v4109_v9, %v4108_v34  ;;  %v2066_v9 = vld [vmem:[#allocation10 + $0x168] sm:$0xff]  ;;  %v2083_v34 = vld [vmem:[#allocation10 + $0x1f0] sm:$0xff] }
 0x585   : > { %v1983_v20 = vsel %vm540_vm1, %v1981_v13, %v1982_v29  ;;  %v5075_v46 = vmax.f32 %v1933_v55, %v1956_v16  ;;  %v5077_v14 = vmax.f32 %v1934_v57, %v1968_v19  ;;  %v1986_v42 = vsel %vm540_vm1, %v1984_v17, %v1985_v15  ;;  %v2060_v55 = vld [vmem:[#allocation10 + $0x138] sm:$0xff]  ;;  %v2078_v57 = vld [vmem:[#allocation10 + $0x1c8] sm:$0xff] }
 0x586   : > { %v2004_v54 = vmax.f32 %v1970_v62, %v1986_v42  ;;  %v5082_v4 = vmax.f32 %v1969_v7, %v1983_v20  ;;  %v3710_v53 = vpack.c.bf16 %v2060_v55, %v2059_v51  ;;  %v3712_v0 = vpack.c.bf16 %v2078_v57, %v2077_v56  ;;  %v2064_v7 = vld [vmem:[#allocation10 + $0x158] sm:$0xff]  ;;  %v2081_v62 = vld [vmem:[#allocation10 + $0x1e0] sm:$0xff]  ;;  %v2086_v42 = vld [vmem:[#allocation10 + $0x208] sm:$0xff] }
 0x587   : > { %v1987_v22 = vrot.slane %v5075_v46, 2  ;;  %v1989_v35 = vrot.slane %v5077_v14, 2  ;;  %v3718_v38 = vpack.c.bf16 %v2064_v7, %v2063_v60  ;;  %v3722_v11 = vpack.c.bf16 %v2066_v9, %v2065_v8  ;;  %v2068_v17 = vld [vmem:[#allocation10 + $0x178] sm:$0xff]  ;;  %v2085_v20 = vld [vmem:[#allocation10 + $0x200] sm:$0xff]  ;;  %v2094_v56 = vld [vmem:[#allocation10 + $0x248] sm:$0xff] }
 0x588   : > { %2246 = vmatprep.mubr.f32.mxu0 %v2004_v54  ;;  %v2012_v25 = vrot.slane %v2004_v54, 4  ;;  %v3724_v13 = vpack.c.bf16 %v2084_v10, %v2083_v34  ;;  %v3728_v19 = vpack.c.bf16 %v2102_v18, %v2101_v12  ;;  %v2103_v54 = vld [vmem:[#allocation10 + $0x290] sm:$0xff]  ;;  %v2093_v55 = vld [vmem:[#allocation10 + $0x240] sm:$0xff]  ;;  %v2100_v34 = vld [vmem:[#allocation10 + $0x278] sm:$0xff] }
 0x589   : > { %2247 = vmatmul.mubr.f32.vlgmr.msra.gmra.mrb[8].mxu0 %v5082_v4  ;;  %v1988_v36 = vsel %vm540_vm1, %v1982_v29, %v1987_v22  ;;  %v5091_v39 = vsel %vm1161_vm6, %v1989_v35, %v1998_v33  ;;  %v5094_v40 = vsel %vm1161_vm6, %v1987_v22, %v1997_v3  ;;  %v2067_v29 = vld [vmem:[#allocation10 + $0x170] sm:$0xff]  ;;  %v3730_v3 = vpack.c.bf16 %v2086_v42, %v2085_v20  ;;  %v2088_v33 = vld [vmem:[#allocation10 + $0x218] sm:$0xff]  ;;  %v2097_v7 = vld [vmem:[#allocation10 + $0x260] sm:$0xff] }
 0x58a   : > { %3699 = vmatpush3.bf16.msra.mxu0 %v3698_v6  ;;  %2316 = vmatprep.mubr.f32.mxu0 %v2012_v25  ;;  %v5096_v26 = vmax.f32 %v1971_v2, %v1988_v36  ;;  %v2008_v52 = vmax.f32 %v5077_v14, %v5091_v39  ;;  %v2007_v41 = vmax.f32 %v5075_v46, %v5094_v40  ;;  %v2104_v6 = vld [vmem:[#allocation10 + $0x298] sm:$0xff]  ;;  %v2011_v22 = vrot.slane %v5082_v4, 4  ;;  %v2111_v57 = vld [vmem:[#allocation10 + $0x2d0] sm:$0xff]  ;;  %v2133_v10 = vld [vmem:[#allocation10 + $0x380] sm:$0xff] }
 0x58b   : > { %3701 = vmatprep.subr.bf16.mxu0 %v3700_v21  ;;  %v3720_v2 = vpack.c.bf16 %v2082_v63, %v2081_v62  ;;  %v3726_v16 = vpack.c.bf16 %v2068_v17, %v2067_v29  ;;  %v1990_v21 = vsel %vm540_vm1, %v1985_v15, %v1989_v35  ;;  %v3732_v5 = vpack.c.bf16 %v2104_v6, %v2103_v54  ;;  %v2089_v35 = vld [vmem:[#allocation10 + $0x220] sm:$0xff]  ;;  %v2108_v4 = vld [vmem:[#allocation10 + $0x2b8] sm:$0xff]  ;;  %v2098_v62 = vld [vmem:[#allocation10 + $0x268] sm:$0xff] }
 0x58c   : > { %v5109_v25 = vmax.f32 %v5069_v23, %v1990_v21  ;;  %v3734_v36 = vpack.c.bf16 %v2088_v33, %v2087_v28  ;;  %v3736_v15 = vpack.c.bf16 %v2106_v32, %v2105_v30  ;;  %v2092_v23 = vld [vmem:[#allocation10 + $0x238] sm:$0xff]  ;;  %v2115_v63 = vld [vmem:[#allocation10 + $0x2f0] sm:$0xff]  ;;  %v2117_v17 = vld [vmem:[#allocation10 + $0x300] sm:$0xff] }
 0x58d   : > { %v2099_v9 = vld [vmem:[#allocation10 + $0x270] sm:$0xff]  ;;  %v2118_v12 = vld [vmem:[#allocation10 + $0x308] sm:$0xff]  ;;  %v2120_v54 = vld [vmem:[#allocation10 + $0x318] sm:$0xff] }
 0x58e   : > { %3703 = vmatpush3.bf16.msra.mxu0 %v3702_v43  ;;  %v2090_v43 = vld [vmem:[#allocation10 + $0x228] sm:$0xff]  ;;  %v2135_v18 = vld [vmem:[#allocation10 + $0x390] sm:$0xff]  ;;  %v2018_v6 = vrot.slane %v5109_v25, 4  ;;  %v2137_v21 = vld [vmem:[#allocation10 + $0x3a0] sm:$0xff] }
 0x58f   : > { %3705 = vmatprep.subr.bf16.mxu0 %v3704_v44  ;;  %v2107_v44 = vld [vmem:[#allocation10 + $0x2b0] sm:$0xff]  ;;  %v3738_v45 = vpack.c.bf16 %v2090_v43, %v2089_v35  ;;  %v2121_v28 = vld [vmem:[#allocation10 + $0x320] sm:$0xff]  ;;  %v2122_v33 = vld [vmem:[#allocation10 + $0x328] sm:$0xff] }
 0x590   : > { %v3740_v47 = vpack.c.bf16 %v2108_v4, %v2107_v44  ;;  %v2119_v42 = vld [vmem:[#allocation10 + $0x310] sm:$0xff]  ;;  %v2140_v32 = vld [vmem:[#allocation10 + $0x3b8] sm:$0xff]  ;;  %v2142_v44 = vld [vmem:[#allocation10 + $0x3c8] sm:$0xff] }
 0x591   : > { %v2139_v30 = vld [vmem:[#allocation10 + $0x3b0] sm:$0xff]  ;;  %v2124_v43 = vld [vmem:[#allocation10 + $0x338] sm:$0xff]  ;;  %v2157_v39 = vld [vmem:[#allocation10 + $0x440] sm:$0xff] }
 0x592   : > { %3707 = vmatpush3.bf16.msra.mxu0 %v3706_v27  ;;  %v2110_v27 = vld [vmem:[#allocation10 + $0x2c8] sm:$0xff]  ;;  %v2123_v35 = vld [vmem:[#allocation10 + $0x330] sm:$0xff]  ;;  %v2540_v40 = vld [vmem:[#allocation13 + $0x38] sm:$0xff] }
 0x593   : > { %3709 = vmatprep.subr.bf16.mxu0 %v3708_v50  ;;  %v3742_v50 = vpack.c.bf16 %v2092_v23, %v2091_v48  ;;  %v3744_v51 = vpack.c.bf16 %v2110_v27, %v2109_v49  ;;  %v3774_v4 = vpack.c.bf16 %v2124_v43, %v2123_v35  ;;  %v2126_v48 = vld [vmem:[#allocation10 + $0x348] sm:$0xff]  ;;  %v2143_v23 = vld [vmem:[#allocation10 + $0x3d0] sm:$0xff]  ;;  %v2144_v49 = vld [vmem:[#allocation10 + $0x3d8] sm:$0xff] }
 0x594   : > { %v2159_v43 = vld [vmem:[#allocation10 + $0x450] sm:$0xff] }
 0x595   : > { %v2539_v46 = vld [vmem:[#allocation13 + $0x30] sm:$0xff] }
 0x596   : > { %3711 = vmatpush3.bf16.msra.mxu0 %v3710_v53  ;;  %v2112_v53 = vld [vmem:[#allocation10 + $0x2d8] sm:$0xff] }
 0x597   : > { %3713 = vmatprep.subr.bf16.mxu0 %v3712_v0  ;;  %v3746_v0 = vpack.c.bf16 %v2094_v56, %v2093_v55  ;;  %v3748_v1 = vpack.c.bf16 %v2112_v53, %v2111_v57  ;;  %v2128_v55 = vld [vmem:[#allocation10 + $0x358] sm:$0xff]  ;;  %v2145_v56 = vld [vmem:[#allocation10 + $0x3e0] sm:$0xff]  ;;  %v2146_v57 = vld [vmem:[#allocation10 + $0x3e8] sm:$0xff] }
 0x59a   : > { %3715 = vmatpush3.bf16.msra.mxu0 %v3714_v59  ;;  %v2114_v59 = vld [vmem:[#allocation10 + $0x2e8] sm:$0xff] }
 0x59b   : > { %3717 = vmatprep.subr.bf16.mxu0 %v3716_v61  ;;  %v3750_v61 = vpack.c.bf16 %v2096_v58, %v2095_v24  ;;  %v3752_v60 = vpack.c.bf16 %v2114_v59, %v2113_v31  ;;  %v2130_v24 = vld [vmem:[#allocation10 + $0x368] sm:$0xff]  ;;  %v2147_v58 = vld [vmem:[#allocation10 + $0x3f0] sm:$0xff]  ;;  %v2148_v31 = vld [vmem:[#allocation10 + $0x3f8] sm:$0xff] }
 0x59e   : > { %3719 = vmatpush3.bf16.msra.mxu0 %v3718_v38  ;;  %v2116_v38 = vld [vmem:[#allocation10 + $0x2f8] sm:$0xff] }
 0x59f   : > { %3721 = vmatprep.subr.bf16.mxu0 %v3720_v2  ;;  %v3754_v2 = vpack.c.bf16 %v2098_v62, %v2097_v7  ;;  %v3756_v8 = vpack.c.bf16 %v2116_v38, %v2115_v63  ;;  %v2132_v7 = vld [vmem:[#allocation10 + $0x378] sm:$0xff]  ;;  %v2165_v62 = vld [vmem:[#allocation10 + $0x480] sm:$0xff]  ;;  %v2166_v63 = vld [vmem:[#allocation10 + $0x488] sm:$0xff] }
 0x5a2   : > { %3723 = vmatpush3.bf16.msra.mxu0 %v3722_v11  ;;  %v2134_v11 = vld [vmem:[#allocation10 + $0x388] sm:$0xff] }
 0x5a3   : > { %3725 = vmatprep.subr.bf16.mxu0 %v3724_v13  ;;  %v3758_v13 = vpack.c.bf16 %v2100_v34, %v2099_v9  ;;  %v3760_v29 = vpack.c.bf16 %v2134_v11, %v2133_v10  ;;  %v2150_v9 = vld [vmem:[#allocation10 + $0x408] sm:$0xff]  ;;  %v2167_v34 = vld [vmem:[#allocation10 + $0x490] sm:$0xff]  ;;  %v2168_v10 = vld [vmem:[#allocation10 + $0x498] sm:$0xff] }
 0x5a6   : > { %3727 = vmatpush3.bf16.msra.mxu0 %v3726_v16  ;;  %v2136_v16 = vld [vmem:[#allocation10 + $0x398] sm:$0xff] }
 0x5a7   : > { %3729 = vmatprep.subr.bf16.mxu0 %v3728_v19  ;;  %v3762_v19 = vpack.c.bf16 %v2118_v12, %v2117_v17  ;;  %v3764_v20 = vpack.c.bf16 %v2136_v16, %v2135_v18  ;;  %v2151_v17 = vld [vmem:[#allocation10 + $0x410] sm:$0xff]  ;;  %v2152_v12 = vld [vmem:[#allocation10 + $0x418] sm:$0xff]  ;;  %v2169_v18 = vld [vmem:[#allocation10 + $0x4a0] sm:$0xff] }
 0x5a8   : > { %v2170_v16 = vld [vmem:[#allocation10 + $0x4a8] sm:$0xff] }
 0x5a9   : > { %2317 = vmatmul.mubr.f32.vlgmr.msra.gmra.mrb[10].mxu0 %v2011_v22  ;;  %v3766_v22 = vpack.c.bf16 %v2120_v54, %v2119_v42  ;;  %v2153_v42 = vld [vmem:[#allocation10 + $0x420] sm:$0xff]  ;;  %v2154_v54 = vld [vmem:[#allocation10 + $0x428] sm:$0xff] }
 0x5aa   : > { %3731 = vmatpush3.bf16.msra.mxu0 %v3730_v3  ;;  %2386 = vmatprep.mubr.f32.mxu0 %v5109_v25  ;;  %v2138_v3 = vld [vmem:[#allocation10 + $0x3a8] sm:$0xff]  ;;  %v2141_v25 = vld [vmem:[#allocation10 + $0x3c0] sm:$0xff] }
 0x5ab   : > { %3733 = vmatprep.subr.bf16.mxu0 %v3732_v5  ;;  %v3768_v5 = vpack.c.bf16 %v2138_v3, %v2137_v21  ;;  %v2172_v21 = vld [vmem:[#allocation10 + $0x4b8] sm:$0xff] }
 0x5ae   : > { %3735 = vmatpush3.bf16.msra.mxu0 %v3734_v36  ;;  %v3770_v36 = vpack.c.bf16 %v2122_v33, %v2121_v28  ;;  %v2173_v28 = vld [vmem:[#allocation10 + $0x4c0] sm:$0xff]  ;;  %v2174_v33 = vld [vmem:[#allocation10 + $0x4c8] sm:$0xff] }
 0x5af   : > { %3737 = vmatprep.subr.bf16.mxu0 %v3736_v15  ;;  %v3772_v15 = vpack.c.bf16 %v2140_v32, %v2139_v30  ;;  %v3808_v14 = vpack.c.bf16 %v2174_v33, %v2173_v28  ;;  %v2175_v32 = vld [vmem:[#allocation10 + $0x4d0] sm:$0xff]  ;;  %v2629_v33 = vld [vmem:[#allocation16 + $0x40] sm:$0xff] }
 0x5b2   : > { %3739 = vmatpush3.bf16.msra.mxu0 %v3738_v45  ;;  %v3776_v45 = vpack.c.bf16 %v2142_v44, %v2141_v25  ;;  %v2160_v25 = vld [vmem:[#allocation10 + $0x458] sm:$0xff]  ;;  %v2177_v44 = vld [vmem:[#allocation10 + $0x4e0] sm:$0xff] }
 0x5b3   : > { %3741 = vmatprep.subr.bf16.mxu0 %v3740_v47  ;;  %v2125_v47 = vld [vmem:[#allocation10 + $0x340] sm:$0xff] }
 0x5b4   : > { %v3778_v27 = vpack.c.bf16 %v2126_v48, %v2125_v47  ;;  %v2161_v48 = vld [vmem:[#allocation10 + $0x460] sm:$0xff] }
 0x5b6   : > { %3743 = vmatpush3.bf16.msra.mxu0 %v3742_v50  ;;  %v3780_v50 = vpack.c.bf16 %v2144_v49, %v2143_v23  ;;  %v2162_v23 = vld [vmem:[#allocation10 + $0x468] sm:$0xff]  ;;  %v2179_v49 = vld [vmem:[#allocation10 + $0x4f0] sm:$0xff] }
 0x5b7   : > { %3745 = vmatprep.subr.bf16.mxu0 %v3744_v51  ;;  %v2127_v51 = vld [vmem:[#allocation10 + $0x350] sm:$0xff] }
 0x5b8   : > { %v3782_v53 = vpack.c.bf16 %v2128_v55, %v2127_v51  ;;  %v2163_v55 = vld [vmem:[#allocation10 + $0x470] sm:$0xff] }
 0x5ba   : > { %3747 = vmatpush3.bf16.msra.mxu0 %v3746_v0  ;;  %v3784_v0 = vpack.c.bf16 %v2146_v57, %v2145_v56  ;;  %v2164_v56 = vld [vmem:[#allocation10 + $0x478] sm:$0xff] }
 0x5bb   : > { %3749 = vmatprep.subr.bf16.mxu0 %v3748_v1  ;;  %v2129_v1 = vld [vmem:[#allocation10 + $0x360] sm:$0xff]  ;;  %v3822_v57 = vpack.c.bf16 %v2164_v56, %v2163_v55 }
 0x5bc   : > { %v3786_v59 = vpack.c.bf16 %v2130_v24, %v2129_v1  ;;  %v2535_v1 = vld [vmem:[#allocation13 + $0x10] sm:$0xff]  ;;  %v4495_v24 = vmov 0.0|0.0  }
 0x5bd   : > { %3848 = vmatprep.subr.bf16.mxu1 %v4495_v24 }
 0x5be   : > { %3751 = vmatpush3.bf16.msra.mxu0 %v3750_v61  ;;  %v3788_v61 = vpack.c.bf16 %v2148_v31, %v2147_v58  ;;  %v2536_v31 = vld [vmem:[#allocation13 + $0x18] sm:$0xff] }
 0x5bf   : > { %3753 = vmatprep.subr.bf16.mxu0 %v3752_v60  ;;  %v2131_v60 = vld [vmem:[#allocation10 + $0x370] sm:$0xff] }
 0x5c0   : > { %v3790_v38 = vpack.c.bf16 %v2132_v7, %v2131_v60  ;;  %v2538_v60 = vld [vmem:[#allocation13 + $0x28] sm:$0xff] }
 0x5c2   : > { %3755 = vmatpush3.bf16.msra.mxu0 %v3754_v2  ;;  %v3792_v2 = vpack.c.bf16 %v2166_v63, %v2165_v62  ;;  %v2541_v62 = vld [vmem:[#allocation13 + $0x40] sm:$0xff]  ;;  %v2542_v63 = vld [vmem:[#allocation13 + $0x48] sm:$0xff] }
 0x5c3   : > { %3757 = vmatprep.subr.bf16.mxu0 %v3756_v8  ;;  %v2149_v8 = vld [vmem:[#allocation10 + $0x400] sm:$0xff] }
 0x5c4   : > { %v3794_v11 = vpack.c.bf16 %v2150_v9, %v2149_v8  ;;  %v2544_v8 = vld [vmem:[#allocation13 + $0x58] sm:$0xff] }
 0x5c6   : > { %3759 = vmatpush3.bf16.msra.mxu0 %v3758_v13  ;;  %v2017_v13 = vrot.slane %v5096_v26, 4 }
 0x5c7   : > { %3761 = vmatprep.subr.bf16.mxu0 %v3760_v29  ;;  %v3796_v29 = vpack.c.bf16 %v2168_v10, %v2167_v34 }
 0x5c9   : > { %2387 = vmatmul.mubr.f32.vlgmr.msra.gmra.mrb[12].mxu0 %v5096_v26  ;;  %v3802_v26 = vpack.c.bf16 %v2154_v54, %v2153_v42  ;;  %v2623_v42 = vld [vmem:[#allocation16 + $0x10] sm:$0xff] }
 0x5ca   : > { %3763 = vmatpush3.bf16.msra.mxu0 %v3762_v19  ;;  %2456 = vmatprep.mubr.f32.mxu0 %v2018_v6  ;;  %v3798_v19 = vpack.c.bf16 %v2152_v12, %v2151_v17  ;;  %v2171_v6 = vld [vmem:[#allocation10 + $0x4b0] sm:$0xff] }
 0x5cb   : > { %3765 = vmatprep.subr.bf16.mxu0 %v3764_v20  ;;  %v3800_v20 = vpack.c.bf16 %v2170_v16, %v2169_v18  ;;  %v3804_v3 = vpack.c.bf16 %v2172_v21, %v2171_v6  ;;  %v2547_v12 = vld [vmem:[#allocation13 + $0x70] sm:$0xff]  ;;  %v2548_v18 = vld [vmem:[#allocation13 + $0x78] sm:$0xff] }
 0x5cc   : > { %v3846_v16 = vpack.c.bf16 %v2548_v18, %v2547_v12  ;;  %v2624_v6 = vld [vmem:[#allocation16 + $0x18] sm:$0xff] }
 0x5cd   : > { %v3852_v21 = vpack.c.bf16 %v2624_v6, %v2623_v42 }
 0x5ce   : > { %3767 = vmatpush3.bf16.msra.mxu0 %v3766_v22  ;;  %v2155_v22 = vld [vmem:[#allocation10 + $0x430] sm:$0xff] }
 0x5cf   : > { %3769 = vmatprep.subr.bf16.mxu0 %v3768_v5  ;;  %v2156_v5 = vld [vmem:[#allocation10 + $0x438] sm:$0xff] }
 0x5d0   : > { %v3806_v30 = vpack.c.bf16 %v2156_v5, %v2155_v22  ;;  %v2628_v5 = vld [vmem:[#allocation16 + $0x38] sm:$0xff] }
 0x5d2   : > { %3771 = vmatpush3.bf16.msra.mxu0 %v3770_v36  ;;  %v2176_v36 = vld [vmem:[#allocation10 + $0x4d8] sm:$0xff] }
 0x5d3   : > { %3773 = vmatprep.subr.bf16.mxu0 %v3772_v15  ;;  %v3812_v35 = vpack.c.bf16 %v2176_v36, %v2175_v32  ;;  %v2633_v36 = vld [vmem:[#allocation16 + $0x60] sm:$0xff] }
 0x5d6   : > { %3775 = vmatpush3.bf16.msra.mxu0 %v3774_v4  ;;  %v2178_v4 = vld [vmem:[#allocation10 + $0x4e8] sm:$0xff] }
 0x5d7   : > { %3777 = vmatprep.subr.bf16.mxu0 %v3776_v45  ;;  %v3814_v45 = vpack.c.bf16 %v2160_v25, %v2159_v43  ;;  %v3816_v47 = vpack.c.bf16 %v2178_v4, %v2177_v44 }
 0x5da   : > { %3779 = vmatpush3.bf16.msra.mxu0 %v3778_v27  ;;  %v2180_v27 = vld [vmem:[#allocation10 + $0x4f8] sm:$0xff] }
 0x5db   : > { %3781 = vmatprep.subr.bf16.mxu0 %v3780_v50  ;;  %v3818_v50 = vpack.c.bf16 %v2162_v23, %v2161_v48  ;;  %v3820_v51 = vpack.c.bf16 %v2180_v27, %v2179_v49 }
 0x5de   : > { %3783 = vmatpush3.bf16.msra.mxu0 %v3782_v53  ;;  %v2533_v53 = vld [vmem:[#allocation13] sm:$0xff] }
 0x5df   : > { %3785 = vmatprep.subr.bf16.mxu0 %v3784_v0  ;;  %v2534_v0 = vld [vmem:[#allocation13 + $0x8] sm:$0xff] }
 0x5e0   : > { %v3825_v58 = vpack.c.bf16 %v2534_v0, %v2533_v53 }
 0x5e2   : > { %3787 = vmatpush3.bf16.msra.mxu0 %v3786_v59  ;;  %v3828_v59 = vpack.c.bf16 %v2536_v31, %v2535_v1  ;;  %v2635_v31 = vld [vmem:[#allocation16 + $0x70] sm:$0xff] }
 0x5e3   : > { %3789 = vmatprep.subr.bf16.mxu0 %v3788_v61  ;;  %v2537_v61 = vld [vmem:[#allocation13 + $0x20] sm:$0xff] }
 0x5e4   : > { %v3831_v7 = vpack.c.bf16 %v2538_v60, %v2537_v61 }
 0x5e6   : > { %3791 = vmatpush3.bf16.msra.mxu0 %v3790_v38  ;;  %v3837_v38 = vpack.c.bf16 %v2542_v63, %v2541_v62 }
 0x5e7   : > { %3793 = vmatprep.subr.bf16.mxu0 %v3792_v2  ;;  %v2543_v2 = vld [vmem:[#allocation13 + $0x50] sm:$0xff] }
 0x5e8   : > { %v3840_v9 = vpack.c.bf16 %v2544_v8, %v2543_v2 }
 0x5e9   : > { %2457 = vmatmul.mubr.f32.vlgmr.msra.gmra.mrb[14].mxu0 %v2017_v13  ;;  %v2545_v13 = vld [vmem:[#allocation13 + $0x60] sm:$0xff] }
 0x5ea   : > { %3795 = vmatpush3.bf16.msra.mxu0 %v3794_v11  ;;  %2526 = vmatprep.mubr.f32.mxu0 %v2008_v52  ;;  %v2158_v52 = vld [vmem:[#allocation10 + $0x448] sm:$0xff] }
 0x5eb   : > { %3797 = vmatprep.subr.bf16.mxu0 %v3796_v29  ;;  %v3810_v15 = vpack.c.bf16 %v2158_v52, %v2157_v39  ;;  %v2546_v29 = vld [vmem:[#allocation13 + $0x68] sm:$0xff]  ;;  %v2631_v39 = vld [vmem:[#allocation16 + $0x50] sm:$0xff]  ;;  %v2632_v52 = vld [vmem:[#allocation16 + $0x58] sm:$0xff] }
 0x5ec   : > { %v3843_v17 = vpack.c.bf16 %v2546_v29, %v2545_v13  ;;  %v3864_v32 = vpack.c.bf16 %v2632_v52, %v2631_v39 }
 0x5ee   : > { %3799 = vmatpush3.bf16.msra.mxu0 %v3798_v19  ;;  %v2621_v19 = vld [vmem:[#allocation16] sm:$0xff] }
 0x5ef   : > { %3801 = vmatprep.subr.bf16.mxu0 %v3800_v20  ;;  %v2622_v20 = vld [vmem:[#allocation16 + $0x8] sm:$0xff] }
 0x5f0   : > { %v3849_v54 = vpack.c.bf16 %v2622_v20, %v2621_v19 }
 0x5f2   : > { %3803 = vmatpush3.bf16.msra.mxu0 %v3802_v26  ;;  %3850 = vmatpush3.bf16.msra.mxu1 %v3849_v54  ;;  %v2625_v26 = vld [vmem:[#allocation16 + $0x20] sm:$0xff] }
 0x5f3   : > { %3805 = vmatprep.subr.bf16.mxu0 %v3804_v3  ;;  %3851 = vmatprep.subr.bf16.mxu1 %v4495_v24  ;;  %v2626_v3 = vld [vmem:[#allocation16 + $0x28] sm:$0xff] }
 0x5f4   : > { %v3855_v22 = vpack.c.bf16 %v2626_v3, %v2625_v26 }
 0x5f6   : > { %3807 = vmatpush3.bf16.msra.mxu0 %v3806_v30  ;;  %3853 = vmatpush3.bf16.msra.mxu1 %v3852_v21  ;;  %v2630_v30 = vld [vmem:[#allocation16 + $0x48] sm:$0xff] }
 0x5f7   : > { %3809 = vmatprep.subr.bf16.mxu0 %v3808_v14  ;;  %3854 = vmatprep.subr.bf16.mxu1 %v4495_v24  ;;  %v3861_v14 = vpack.c.bf16 %v2630_v30, %v2629_v33 }
 0x5fa   : > { %3811 = vmatpush3.bf16.msra.mxu0 %v3810_v15  ;;  %3856 = vmatpush3.bf16.msra.mxu1 %v3855_v22  ;;  %v2634_v15 = vld [vmem:[#allocation16 + $0x68] sm:$0xff] }
 0x5fb   : > { %3813 = vmatprep.subr.bf16.mxu0 %v3812_v35  ;;  %3857 = vmatprep.subr.bf16.mxu1 %v4495_v24  ;;  %v2181_v35 = vld [vmem:[#allocation11] sm:$0x1]  ;;  %v3867_v43 = vpack.c.bf16 %v2634_v15, %v2633_v36 }
 0x5fe   : > { %3815 = vmatpush3.bf16.msra.mxu0 %v3814_v45 }
 0x5ff   : > { %3817 = vmatprep.subr.bf16.mxu0 %v3816_v47 }
 0x602   : > { %3819 = vmatpush3.bf16.msra.mxu0 %v3818_v50 }
 0x603   : > { %3821 = vmatprep.subr.bf16.mxu0 %v3820_v51 }
 0x606   : > { %3823 = vmatpush3.bf16.msra.mxu0 %v3822_v57 }
 0x607   : > { %3824 = vmatprep.subr.bf16.mxu0 %v4495_v24 }
 0x609   : > { %2527 = vmatmul.mubr.f32.vlgmr.msra.gmra.mrb[16].mxu0 %v2007_v41  ;;  %v3834_v41 = vpack.c.bf16 %v2540_v40, %v2539_v46 }
 0x60a   : > { %3826 = vmatpush3.bf16.msra.mxu0 %v3825_v58  ;;  %3146 = vmatprep.mubr.msk.f32.mxu0 %vm4496_vm8, %v4492_v37  ;;  %v2627_v37 = vld [vmem:[#allocation16 + $0x30] sm:$0xff] }
 0x60b   : > { %3827 = vmatprep.subr.bf16.mxu0 %v4495_v24  ;;  %v3858_v28 = vpack.c.bf16 %v2628_v5, %v2627_v37 }
 0x60d   : > { %3859 = vmatpush3.bf16.msra.mxu1 %v3858_v28 }
 0x60e   : > { %3829 = vmatpush3.bf16.msra.mxu0 %v3828_v59  ;;  %3860 = vmatprep.subr.bf16.mxu1 %v4495_v24  ;;  %v2636_v59 = vld [vmem:[#allocation16 + $0x78] sm:$0xff] }
 0x60f   : > { %3830 = vmatprep.subr.bf16.mxu0 %v4495_v24  ;;  %v3870_v61 = vpack.c.bf16 %v2636_v59, %v2635_v31 }
 0x611   : > { %3862 = vmatpush3.bf16.msra.mxu1 %v3861_v14 }
 0x612   : > { %3832 = vmatpush3.bf16.msra.mxu0 %v3831_v7  ;;  %3863 = vmatprep.subr.bf16.mxu1 %v4495_v24 }
 0x613   : > { %3833 = vmatprep.subr.bf16.mxu0 %v4495_v24 }
 0x615   : > { %3865 = vmatpush3.bf16.msra.mxu1 %v3864_v32 }
 0x616   : > { %3835 = vmatpush3.bf16.msra.mxu0 %v3834_v41  ;;  %3866 = vmatprep.subr.bf16.mxu1 %v4495_v24  ;;  %v2637_v41 = vld [vmem:[#allocation17] sm:$0x1] }
 0x617   : > { %3836 = vmatprep.subr.bf16.mxu0 %v4495_v24 }
 0x619   : > { %3868 = vmatpush3.bf16.msra.mxu1 %v3867_v43 }
 0x61a   : > { %3838 = vmatpush3.bf16.msra.mxu0 %v3837_v38  ;;  %3869 = vmatprep.subr.bf16.mxu1 %v4495_v24 }
 0x61b   : > { %3839 = vmatprep.subr.bf16.mxu0 %v4495_v24 }
 0x61d   : > { %3871 = vmatpush3.bf16.msra.mxu1 %v3870_v61 }
 0x61e   : > { %3841 = vmatpush3.bf16.msra.mxu0 %v3840_v9 }
 0x61f   : > { %3842 = vmatprep.subr.bf16.mxu0 %v4495_v24 }
 0x622   : > { %3844 = vmatpush3.bf16.msra.mxu0 %v3843_v17 }
 0x623   : > { %3845 = vmatprep.subr.bf16.mxu0 %v4495_v24  ;;  %v2549_v24 = vld [vmem:[#allocation14] sm:$0x1] }
 0x626   : > { %3847 = vmatpush3.bf16.msra.mxu0 %v3846_v16 }
 0x65c   : > { %v2937_v34 = vpop.f32.mrb[8].mxu0 }
 0x65d   : > { %v2938_v10 = vpop.f32.mrb[9].mxu0 }
 0x65e   : > { %v2939_v11 = vadd.f32 %v2938_v10, %v2937_v34 }
 0x660   : > { %v2249_v4 = vadd.f32 %v2939_v11, %v2181_v35 }
 0x67c   : > { %v2972_v25 = vpop.f32.mrb[10].mxu0 }
 0x67d   : > { %v2973_v44 = vpop.f32.mrb[11].mxu0 }
 0x67e   : > { %v2974_v45 = vadd.f32 %v2973_v44, %v2972_v25 }
 0x680   : > { %v2319_v47 = vadd.f32 %v2974_v45, %v2249_v4 }
 0x69c   : > { %v3007_v48 = vpop.f32.mrb[12].mxu0 }
 0x69d   : > { %v3008_v23 = vpop.f32.mrb[13].mxu0 }
 0x69e   : > { %v3009_v49 = vadd.f32 %v3008_v23, %v3007_v48 }
 0x6a0   : > { %v2389_v27 = vadd.f32 %v3009_v49, %v2319_v47 }
 0x6bc   : > { %v3042_v50 = vpop.f32.mrb[14].mxu0 }
 0x6bd   : > { %v3043_v51 = vpop.f32.mrb[15].mxu0 }
 0x6be   : > { %v3044_v55 = vadd.f32 %v3043_v51, %v3042_v50 }
 0x6c0   : > { %v2459_v56 = vadd.f32 %v3044_v55, %v2389_v27 }
 0x6dc   : > { %v3077_v57 = vpop.f32.mrb[16].mxu0 }
 0x6dd   : > { %v3078_v53 = vpop.f32.mrb[17].mxu0 }
 0x6de   : > { %v3079_v0 = vadd.f32 %v3078_v53, %v3077_v57 }
 0x6e0   : > { %v2529_v1 = vadd.f32 %v3079_v0, %v2459_v56 }
 0x6e2   : > { %v2532_v58 = vmax.f32 %v2529_v1, 0.0 }
 0x6e4   : > { %3147 = vmatmul.mubr.f32.vlgmr.msra.gmra.mrb[18].mxu0 %v2532_v58 }
 0x7b7   : > { %v2616_v60 = vpop.f32.mrb[18].mxu0 }
 0x7b8   : > { %v2617_v7 = vadd.f32 %v2616_v60, %v2549_v24  ;;  %v3148_v46 = vpop.f32.mrb[19].mxu0 }
 0x7ba   : > { %v2620_v40 = vmax.f32 %v2617_v7, 0.0 }
 0x7bc   : > { %3182 = vmatmul.mubr.f32.vlgmr.msra.gmra.mrb[6].mxu1 %v2620_v40 }
 0x88f   : > { %v2704_v62 = vpop.f32.mrb[6].mxu1 }
 0x890   : > { %v2705_v63 = vadd.f32 %v2704_v62, %v2637_v41  ;;  %v3183_v38 = vpop.f32.mrb[7].mxu1 }
 0x892   : > { %2708 = vst [vmem:[%s514_s25] sm:$0x1] %v2705_v63 }
 0x893   : > { %4403 = shalt.err (!%p4400_p10)
}
 0x894   : > { %s4404_s14 = scalar_lea.hbm %s5144_s2, 16  ;;  %s4408_s13 = scalar_lea.hbm %s5197_s11, 32 }
 0x895   : > { %p4405_p2 = scmp.ne.s32.totalorder %s5144_s2, %s4404_s14  ;;  %p4409_p7 = scmp.lt.u32.totalorder %s5144_s2, %s5197_s11 }
 0x896   : > { %p4410_p8 = scmp.lt.u32.totalorder %s4408_s13, %s4404_s14  ;;  %p4412_p13 = scmp.lt.u32.totalorder %s4404_s14, %s5144_s2 }
 0x897   : > { %p4406_p3 = pnand %p4405_p2, %p5237_p1 }
 0x898   : > { %p4411_p11 = por %p4410_p8, %p4409_p7 }
 0x899   : > { %p4407_p4 = pneg %p4406_p3 }
 0x89a   : > { %p4413_p0 = por %p4412_p13, %p4411_p11 }
 0x89c   : > { %p4414_p6 = pnand %p4413_p0, %p4407_p4 }
 0x89e   : > { %4417 = shalt.err (!%p4414_p6)
}
 0x89f   : > { %3966 = dma.vmem_to_hbm [thread:$0]  (%p5237_p1), %s5146_s19, 16, %s5144_s2, %s2710_s16  }
 0x8a0 PF: > { %s5238_s17 = sld [smem:[#allocation27_spill]]  ;;  %s5239_s24 = sld [smem:[#allocation31_spill]] }
 0x8a1   : > { %p4023_p5 = scmp.ge.s32.totalorder %s4476_s20, 2 }
 0x8a6   : > { %s2734_s30 = sand.u32 1, %s5238_s17   ;;  %p5240_p9 = scmp.ne.s32.totalorder %s5239_s24, 0 }
 0x8a7   : > { %s2735_s22 = scalar_lea.sflag [#allocation4], %s2734_s30 }
 0x8a8   : > { %p4000_p12 = pnand %p4023_p5, %p5240_p9 }
 0x8aa   : > { %4459 = dma.done.wait (!%p4000_p12), %s2735_s22, 16  }
 0x8ab   : > { %4461 = vsyncadd (!%p4000_p12), %s2735_s22, 4294967280  ;;  %s5241_s20 = sld [smem:[#allocation29_spill]]  ;;  %s5242_s25 = sld [smem:[#allocation28_spill]] }
 0x8ac   : > { %s5243_s19 = sld [smem:[#allocation30_spill]]  ;;  %s5244_s17 = smov %s4468_s18 }
 0x8b1   : > { %p27_p10 = scmp.ge.s32.totalorder %s5241_s20, 4   ;;  %s5245_s18 = smov %s5242_s25 }
 0x8b3   :  { %29 = sbr.rel (!%p27_p10) target bundleno = 14 (0xe), region = 140 }
 0x8ba   :  { %2739 = vsyncpa [#allocation3], 1 }
 0x8bb   :  { %2741 = vsyncpa [#allocation3 + $0x1], 1 }
 0x8bc   :  { %2742 = vsyncpa [#allocation6], 1 }
 0x8bd   :  { %2743 = vsyncpa [#allocation9], 1 }
 0x8be   :  { %2744 = vsyncpa [#allocation12], 1 }
 0x8bf   :  { %2745 = vsyncpa [#allocation15], 1 }
 0x8c0   :  { %2746 = vsyncpa [#allocation18], 1 }
 0x8c1   :  { %2747 = vsyncpa [#allocation4], 1 }
 0x8c2   :  { %2749 = vsyncpa [#allocation4 + $0x1], 1 }

</bundles_post_ra>
